<compile_context>
chip_gen: v6e
topology: v6e:2x2x1
jax: 0.10.0
libtpu: 0.0.40
codegen_flags: <defaults>
</compile_context>

<pallas_src>
import functools

import jax
import jax.numpy as jnp
from jax.experimental import pallas as pl
from jax.experimental.pallas import tpu as pltpu


def _round_up(x, m):
    return ((x + m - 1) // m) * m


def _make_lstm_kernel(num_layers, hidden_pad, t_chunk, last_t_in_chunk,
                      unroll, compute_dtype):
    Hp = hidden_pad

    def kernel(*refs):
        # refs = [x, (W_ih, W_hh, b) * L, fc_w, fc_b, out,
        #         h_state, c_state, z_buf, seq_buf]
        x_ref = refs[0]
        w_ih_refs = [refs[1 + 3 * l] for l in range(num_layers)]
        w_hh_refs = [refs[2 + 3 * l] for l in range(num_layers)]
        b_refs = [refs[3 + 3 * l] for l in range(num_layers)]
        base = 1 + 3 * num_layers
        fc_w_ref = refs[base]
        fc_b_ref = refs[base + 1]
        out_ref = refs[base + 2]
        h_state = refs[base + 3]
        c_state = refs[base + 4]
        z_buf = refs[base + 5]
        seq_buf = refs[base + 6]

        b_blk = out_ref.shape[0]
        rows = t_chunk * b_blk
        t_id = pl.program_id(1)

        # Reset the recurrent state at the start of each batch block's T sweep.
        @pl.when(t_id == 0)
        def _():
            h_state[...] = jnp.zeros_like(h_state)
            c_state[...] = jnp.zeros_like(c_state)

        for l in range(num_layers):
            # Chunk-level input-to-gate projection: one big MXU matmul per
            # layer per chunk (M = t_chunk * b_blk), bias folded in here.
            if l == 0:
                inp = x_ref[...].reshape(rows, x_ref.shape[-1])
            else:
                inp = seq_buf[...].reshape(rows, Hp)
            z_all = (
                jnp.dot(inp, w_ih_refs[l][...],
                        preferred_element_type=jnp.float32)
                + b_refs[l][...]
            )
            z_buf[...] = z_all.reshape(t_chunk, b_blk, 4 * Hp)

            w_hh_ref = w_hh_refs[l]

            # Serial recurrence: only h_{t-1} @ W_hh^T + gate math inside.
            def step(t, carry, _w_hh_ref=w_hh_ref):
                h, c = carry
                z = z_buf[t] + jnp.dot(h.astype(compute_dtype),
                                       _w_hh_ref[...],
                                       preferred_element_type=jnp.float32)
                # PyTorch gate order i, f, g, o; each slice is whole-vreg.
                i_g = jax.nn.sigmoid(z[:, 0 * Hp:1 * Hp])
                f_g = jax.nn.sigmoid(z[:, 1 * Hp:2 * Hp])
                g_g = jnp.tanh(z[:, 2 * Hp:3 * Hp])
                o_g = jax.nn.sigmoid(z[:, 3 * Hp:4 * Hp])
                c_new = f_g * c + i_g * g_g
                h_new = o_g * jnp.tanh(c_new)
                seq_buf[t] = h_new.astype(seq_buf.dtype)
                return h_new, c_new

            h_fin, c_fin = jax.lax.fori_loop(
                0, t_chunk, step, (h_state[l], c_state[l]), unroll=unroll)
            # Persist the recurrence across T-chunks.
            h_state[l] = h_fin
            c_state[l] = c_fin

        # Final-timestep Linear, written lane-dense only on the last chunk.
        # Padded trailing timesteps (if any) live past last_t_in_chunk and are
        # never read.
        @pl.when(t_id == pl.num_programs(1) - 1)
        def _():
            h_last = seq_buf[last_t_in_chunk]
            out = (
                jnp.dot(h_last, fc_w_ref[...],
                        preferred_element_type=jnp.float32)
                + fc_b_ref[...]
            )
            out_ref[...] = out.astype(out_ref.dtype)

    return kernel


def init_lstm_chem_params(key, input_size, hidden_size, num_layers, output_size):
    """Deterministic init mimicking PyTorch's U(-1/sqrt(H), 1/sqrt(H))."""
    bound = 1.0 / jnp.sqrt(jnp.float32(hidden_size))
    params = {"layers": []}
    for l in range(num_layers):
        in_dim = input_size if l == 0 else hidden_size
        key, k1, k2, k3, k4 = jax.random.split(key, 5)
        params["layers"].append({
            "w_ih": jax.random.uniform(k1, (4 * hidden_size, in_dim),
                                       jnp.float32, -bound, bound),
            "w_hh": jax.random.uniform(k2, (4 * hidden_size, hidden_size),
                                       jnp.float32, -bound, bound),
            "b_ih": jax.random.uniform(k3, (4 * hidden_size,),
                                       jnp.float32, -bound, bound),
            "b_hh": jax.random.uniform(k4, (4 * hidden_size,),
                                       jnp.float32, -bound, bound),
        })
    key, k5, k6 = jax.random.split(key, 3)
    params["fc_w"] = jax.random.uniform(k5, (output_size, hidden_size),
                                        jnp.float32, -bound, bound)
    params["fc_b"] = jax.random.uniform(k6, (output_size,),
                                        jnp.float32, -bound, bound)
    return params


@functools.partial(jax.jit,
                   static_argnames=("hidden_size", "num_layers", "use_bf16"))
def lstm_chem_forward(x, params, *, hidden_size, num_layers, use_bf16=True):
    """x: (B, T, input_size) float32 -> (B, output_size) float32."""
    B, T, I = x.shape
    H = hidden_size
    O = params["fc_b"].shape[0]
    cd = jnp.bfloat16 if use_bf16 else jnp.float32
    bpe_cd = 2 if use_bf16 else 4

    Hp = _round_up(H, 128)            # per-gate width padded to whole vregs
    Ip = _round_up(I, 128)            # input lanes padded
    Op = _round_up(O, 128)            # lane-dense output

    # Batch blocking: split into >= 2 blocks when possible so v7x's second
    # TensorCore gets work via the "parallel" grid axis.
    Bp8 = _round_up(max(B, 8), 8)
    if Bp8 >= 16:
        B_BLK = min(128, _round_up(-(-Bp8 // 2), 8))
    else:
        B_BLK = Bp8
    Bp = _round_up(Bp8, B_BLK)
    n_b = Bp // B_BLK

    # ---- Weights: pre-transposed, gate-padded; W_ih and W_hh kept SEPARATE
    # (no per-timestep concat), biases fused (b_ih + b_hh), MXU dtype = cd.
    weight_inputs = []
    weight_specs = []
    for l in range(num_layers):
        lp = params["layers"][l]
        in_dim = I if l == 0 else H
        in_dim_p = Ip if l == 0 else Hp

        w_ih = lp["w_ih"].reshape(4, H, in_dim)
        w_ih = jnp.pad(w_ih, ((0, 0), (0, Hp - H), (0, in_dim_p - in_dim)))
        w_ih_t = w_ih.reshape(4 * Hp, in_dim_p).T.astype(cd)   # (in_dim_p, 4Hp)

        w_hh = lp["w_hh"].reshape(4, H, H)
        w_hh = jnp.pad(w_hh, ((0, 0), (0, Hp - H), (0, Hp - H)))
        w_hh_t = w_hh.reshape(4 * Hp, Hp).T.astype(cd)         # (Hp, 4Hp)

        b = (lp["b_ih"] + lp["b_hh"]).reshape(4, H)
        b = jnp.pad(b, ((0, 0), (0, Hp - H))).reshape(1, 4 * Hp)  # f32

        weight_inputs += [w_ih_t, w_hh_t, b]
        weight_specs += [
            pl.BlockSpec((in_dim_p, 4 * Hp), lambda bb, tt: (0, 0)),
            pl.BlockSpec((Hp, 4 * Hp), lambda bb, tt: (0, 0)),
            pl.BlockSpec((1, 4 * Hp), lambda bb, tt: (0, 0)),
        ]

    fc_w = jnp.pad(params["fc_w"], ((0, Op - O), (0, Hp - H))).T.astype(cd)
    fc_b = jnp.pad(params["fc_b"], (0, Op - O)).reshape(1, Op)
    weight_inputs += [fc_w, fc_b]
    weight_specs += [
        pl.BlockSpec((Hp, Op), lambda bb, tt: (0, 0)),
        pl.BlockSpec((1, Op), lambda bb, tt: (0, 0)),
    ]
    weight_bytes = sum(int(a.size) * a.dtype.itemsize for a in weight_inputs)

    # ---- Per-generation VMEM budget (v7x: 64 MiB/TC). -----------------------
    try:
        vmem_cap = int(pltpu.get_tpu_info().vmem_capacity_bytes)
    except Exception:
        vmem_cap = 64 << 20
    budget = int(vmem_cap * 0.9)

    def vmem_estimate(tc):
        return (2 * tc * B_BLK * Ip * bpe_cd          # x chunk, double-buffered
                + 2 * weight_bytes                    # consts are double-buffered too
                + 2 * B_BLK * Op * 4                  # output block
                + 2 * num_layers * B_BLK * Hp * 4     # h/c carried state
                + tc * B_BLK * 4 * Hp * 4             # z_buf (chunk gate pre-acts)
                + tc * B_BLK * Hp * bpe_cd)           # inter-layer h sequence

    base_chunk = 64 if vmem_cap >= (96 << 20) else 32   # bigger chunks on v5e/v6e
    n_div = max(1, -(-T // base_chunk))
    while True:
        t_chunk = _round_up(-(-T // n_div), 4)           # multiple of 4 -> clean unroll
        if vmem_estimate(t_chunk) + (8 << 20) <= budget or t_chunk <= 4:
            break
        n_div += 1
    n_tc = -(-T // t_chunk)                              # (n_tc-1)*t_chunk < T
    Tp = n_tc * t_chunk
    last_t_in_chunk = (T - 1) - (n_tc - 1) * t_chunk     # static, >= 0

    vmem_limit = min(max(vmem_estimate(t_chunk) + (8 << 20), 32 << 20), budget)

    unroll = 1
    for u in (8, 4, 2):
        if t_chunk % u == 0:
            unroll = u
            break

    # ---- Activations: time-major, zero-padded, compute dtype. --------------
    x_p = jnp.zeros((Tp, Bp, Ip), cd)
    x_p = x_p.at[:T, :B, :I].set(jnp.transpose(x, (1, 0, 2)).astype(cd))

    inputs = [x_p] + weight_inputs
    in_specs = ([pl.BlockSpec((t_chunk, B_BLK, Ip), lambda bb, tt: (tt, bb, 0))]
                + weight_specs)
    out_specs = pl.BlockSpec((B_BLK, Op), lambda bb, tt: (bb, 0))
    out_shape = jax.ShapeDtypeStruct((Bp, Op), jnp.float32)

    scratch_shapes = [
        pltpu.VMEM((num_layers, B_BLK, Hp), jnp.float32),    # h state (carried)
        pltpu.VMEM((num_layers, B_BLK, Hp), jnp.float32),    # c state (carried)
        pltpu.VMEM((t_chunk, B_BLK, 4 * Hp), jnp.float32),   # chunk gate pre-acts
        pltpu.VMEM((t_chunk, B_BLK, Hp), cd),                # inter-layer h sequence
    ]

    kernel = _make_lstm_kernel(num_layers, Hp, t_chunk, last_t_in_chunk,
                               unroll, cd)
    out = pl.pallas_call(
        kernel,
        out_shape=out_shape,
        grid=(n_b, n_tc),
        in_specs=in_specs,
        out_specs=out_specs,
        scratch_shapes=scratch_shapes,
        compiler_params=pltpu.CompilerParams(
            dimension_semantics=("parallel", "arbitrary"),
            vmem_limit_bytes=vmem_limit,
        ),
    )(*inputs)

    return out[:B, :O]


def _reference_forward(x, params, hidden_size, num_layers):
    """Pure-JAX reference of the PyTorch forward (for sanity check)."""
    B, T, _ = x.shape
    H = hidden_size
    layer_in = x
    for l in range(num_layers):
        lp = params["layers"][l]
        w_ih_T = jnp.transpose(lp["w_ih"])
        w_hh_T = jnp.transpose(lp["w_hh"])
        b = lp["b_ih"] + lp["b_hh"]
        h = jnp.zeros((B, H), jnp.float32)
        c = jnp.zeros((B, H), jnp.float32)
        outs = []
        for t in range(T):
            z = layer_in[:, t, :] @ w_ih_T + h @ w_hh_T + b
            i_g = jax.nn.sigmoid(z[:, 0 * H:1 * H])
            f_g = jax.nn.sigmoid(z[:, 1 * H:2 * H])
            g_g = jnp.tanh(z[:, 2 * H:3 * H])
            o_g = jax.nn.sigmoid(z[:, 3 * H:4 * H])
            c = f_g * c + i_g * g_g
            h = o_g * jnp.tanh(c)
            outs.append(h)
        layer_in = jnp.stack(outs, axis=1)
    return layer_in[:, -1, :] @ jnp.transpose(params["fc_w"]) + params["fc_b"]


if __name__ == "__main__":
    # Small shapes consistent with the module's forward.
    batch, seq = 2, 8
    input_size, hidden_size, num_layers, output_size = 16, 32, 2, 8

    key = jax.random.PRNGKey(0)
    key, xkey = jax.random.split(key)
    x = jax.random.normal(xkey, (batch, seq, input_size), jnp.float32)
    params = init_lstm_chem_params(key, input_size, hidden_size,
                                   num_layers, output_size)

    ref = _reference_forward(x, params, hidden_size, num_layers)

    # f32 path: tight check against the PyTorch-equivalent reference.
    out_f32 = lstm_chem_forward(x, params, hidden_size=hidden_size,
                                num_layers=num_layers, use_bf16=False)
    out_f32 = jax.block_until_ready(out_f32)
    assert out_f32.shape == (batch, output_size)
    assert jnp.allclose(out_f32, ref, rtol=1e-3, atol=1e-3), "f32 mismatch vs ref"

    # bf16 weight path (MXU-native fast path): looser smoke check.
    out_bf16 = lstm_chem_forward(x, params, hidden_size=hidden_size,
                                 num_layers=num_layers, use_bf16=True)
    out_bf16 = jax.block_until_ready(out_bf16)
    assert out_bf16.shape == (batch, output_size)
    assert jnp.allclose(out_bf16, ref, rtol=5e-2, atol=5e-2), "bf16 mismatch vs ref"

    print("KERNEL_OK")
</pallas_src>

<mosaic_0001>
module attributes {stable_mosaic.version = 11 : i64} {
  func.func @kernel(%arg0: i32, %arg1: i32, %arg2: memref<8x8x128xf32, #tpu.memory_space<vmem>>, %arg3: memref<128x512xf32, #tpu.memory_space<vmem>>, %arg4: memref<128x512xf32, #tpu.memory_space<vmem>>, %arg5: memref<1x512xf32, #tpu.memory_space<vmem>>, %arg6: memref<128x512xf32, #tpu.memory_space<vmem>>, %arg7: memref<128x512xf32, #tpu.memory_space<vmem>>, %arg8: memref<1x512xf32, #tpu.memory_space<vmem>>, %arg9: memref<128x128xf32, #tpu.memory_space<vmem>>, %arg10: memref<1x128xf32, #tpu.memory_space<vmem>>, %arg11: memref<8x128xf32, #tpu.memory_space<vmem>>, %arg12: memref<2x8x128xf32, #tpu.memory_space<vmem>>, %arg13: memref<2x8x128xf32, #tpu.memory_space<vmem>>, %arg14: memref<8x8x512xf32, #tpu.memory_space<vmem>>, %arg15: memref<8x8x128xf32, #tpu.memory_space<vmem>>) attributes {dimension_semantics = [#tpu.dimension_semantics<parallel>, #tpu.dimension_semantics<arbitrary>], iteration_bounds = array<i64: 1, 1>, scalar_prefetch = 0 : i64, scratch_operands = 4 : i64, tpu.core_type = #tpu.core_type<tc>, window_params = [{transform_indices = @transform_0, window_bounds = array<i64: 8, 8, 128>}, {pipeline_mode = #tpu.pipeline_mode<synchronous>, transform_indices = @transform_1, window_bounds = array<i64: 128, 512>}, {pipeline_mode = #tpu.pipeline_mode<synchronous>, transform_indices = @transform_2, window_bounds = array<i64: 128, 512>}, {pipeline_mode = #tpu.pipeline_mode<synchronous>, transform_indices = @transform_3, window_bounds = array<i64: 1, 512>}, {pipeline_mode = #tpu.pipeline_mode<synchronous>, transform_indices = @transform_4, window_bounds = array<i64: 128, 512>}, {pipeline_mode = #tpu.pipeline_mode<synchronous>, transform_indices = @transform_5, window_bounds = array<i64: 128, 512>}, {pipeline_mode = #tpu.pipeline_mode<synchronous>, transform_indices = @transform_6, window_bounds = array<i64: 1, 512>}, {pipeline_mode = #tpu.pipeline_mode<synchronous>, transform_indices = @transform_7, window_bounds = array<i64: 128, 128>}, {pipeline_mode = #tpu.pipeline_mode<synchronous>, transform_indices = @transform_8, window_bounds = array<i64: 1, 128>}, {transform_indices = @transform_9, window_bounds = array<i64: 8, 128>}]} {
    %c0_i32 = arith.constant 0 : i32
    %0 = arith.cmpi eq, %arg1, %c0_i32 : i32
    %1 = arith.extui %0 : i1 to i32
    %c0_i32_0 = arith.constant 0 : i32
    %2 = arith.cmpi ne, %1, %c0_i32_0 : i32
    scf.if %2 {
      %cst_216 = arith.constant 0.000000e+00 : f32
      %604 = vector.broadcast %cst_216 : f32 to vector<2x8x128xf32>
      %c0_217 = arith.constant 0 : index
      %c0_218 = arith.constant 0 : index
      %c0_219 = arith.constant 0 : index
      %605 = vector.load %arg12[%c0_217, %c0_218, %c0_219] : memref<2x8x128xf32, #tpu.memory_space<vmem>>, vector<2x8x128xf32>
      tpu.vector_store %arg12[%c0_217, %c0_218, %c0_219], %604 {strides = array<i32>} : memref<2x8x128xf32, #tpu.memory_space<vmem>>, vector<2x8x128xf32>,
      %cst_220 = arith.constant 0.000000e+00 : f32
      %606 = vector.broadcast %cst_220 : f32 to vector<2x8x128xf32>
      %c0_221 = arith.constant 0 : index
      %c0_222 = arith.constant 0 : index
      %c0_223 = arith.constant 0 : index
      %607 = vector.load %arg13[%c0_221, %c0_222, %c0_223] : memref<2x8x128xf32, #tpu.memory_space<vmem>>, vector<2x8x128xf32>
      tpu.vector_store %arg13[%c0_221, %c0_222, %c0_223], %606 {strides = array<i32>} : memref<2x8x128xf32, #tpu.memory_space<vmem>>, vector<2x8x128xf32>,
    } else {
    }
    %c0 = arith.constant 0 : index
    %c0_1 = arith.constant 0 : index
    %c0_2 = arith.constant 0 : index
    %3 = vector.load %arg2[%c0, %c0_1, %c0_2] : memref<8x8x128xf32, #tpu.memory_space<vmem>>, vector<8x8x128xf32>
    %4 = vector.shape_cast %3 : vector<8x8x128xf32> to vector<64x128xf32>
    %c0_3 = arith.constant 0 : index
    %c0_4 = arith.constant 0 : index
    %5 = vector.load %arg3[%c0_3, %c0_4] : memref<128x512xf32, #tpu.memory_space<vmem>>, vector<128x512xf32>
    %cst = arith.constant dense<0.000000e+00> : vector<64x512xf32>
    %6 = tpu.matmul %4, %5, %cst {dimension_numbers = #tpu.dot_dimension_numbers<[1], [0], [0], [1], [0, 0, 1, 1], [], []>} : vector<64x128xf32>, vector<128x512xf32>, vector<64x512xf32> -> vector<64x512xf32>
    %c0_5 = arith.constant 0 : index
    %c0_6 = arith.constant 0 : index
    %7 = vector.load %arg5[%c0_5, %c0_6] : memref<1x512xf32, #tpu.memory_space<vmem>>, vector<1x512xf32>
    %8 = vector.broadcast %7 : vector<1x512xf32> to vector<64x512xf32>
    %9 = arith.addf %6, %8 : vector<64x512xf32>
    %10 = vector.shape_cast %9 : vector<64x512xf32> to vector<8x8x512xf32>
    %c0_7 = arith.constant 0 : index
    %c0_8 = arith.constant 0 : index
    %c0_9 = arith.constant 0 : index
    %11 = vector.load %arg14[%c0_7, %c0_8, %c0_9] : memref<8x8x512xf32, #tpu.memory_space<vmem>>, vector<8x8x512xf32>
    tpu.vector_store %arg14[%c0_7, %c0_8, %c0_9], %10 {strides = array<i32>} : memref<8x8x512xf32, #tpu.memory_space<vmem>>, vector<8x8x512xf32>,
    %c0_10 = arith.constant 0 : index
    %c0_11 = arith.constant 0 : index
    %c0_12 = arith.constant 0 : index
    %12 = vector.load %arg12[%c0_10, %c0_11, %c0_12] : memref<2x8x128xf32, #tpu.memory_space<vmem>>, vector<1x8x128xf32>
    %13 = vector.shape_cast %12 : vector<1x8x128xf32> to vector<8x128xf32>
    %c0_13 = arith.constant 0 : index
    %c0_14 = arith.constant 0 : index
    %c0_15 = arith.constant 0 : index
    %14 = vector.load %arg13[%c0_13, %c0_14, %c0_15] : memref<2x8x128xf32, #tpu.memory_space<vmem>>, vector<1x8x128xf32>
    %15 = vector.shape_cast %14 : vector<1x8x128xf32> to vector<8x128xf32>
    %c0_i32_16 = arith.constant 0 : i32
    %16 = arith.index_cast %c0_i32_16 : i32 to index
    %c0_17 = arith.constant 0 : index
    %c0_18 = arith.constant 0 : index
    %17 = vector.load %arg14[%16, %c0_17, %c0_18] : memref<8x8x512xf32, #tpu.memory_space<vmem>>, vector<1x8x512xf32>
    %18 = vector.shape_cast %17 : vector<1x8x512xf32> to vector<8x512xf32>
    %c0_19 = arith.constant 0 : index
    %c0_20 = arith.constant 0 : index
    %19 = vector.load %arg4[%c0_19, %c0_20] : memref<128x512xf32, #tpu.memory_space<vmem>>, vector<128x512xf32>
    %cst_21 = arith.constant dense<0.000000e+00> : vector<8x512xf32>
    %20 = tpu.matmul %13, %19, %cst_21 {dimension_numbers = #tpu.dot_dimension_numbers<[1], [0], [0], [1], [0, 0, 1, 1], [], []>} : vector<8x128xf32>, vector<128x512xf32>, vector<8x512xf32> -> vector<8x512xf32>
    %21 = arith.addf %18, %20 : vector<8x512xf32>
    %22 = vector.extract_strided_slice %21 {offsets = [0, 0], sizes = [8, 128], strides = [1, 1]} : vector<8x512xf32> to vector<8x128xf32>
    %23 = arith.negf %22 : vector<8x128xf32>
    %24 = math.exp %23 : vector<8x128xf32>
    %cst_22 = arith.constant 1.000000e+00 : f32
    %25 = vector.broadcast %cst_22 : f32 to vector<8x128xf32>
    %26 = arith.addf %25, %24 : vector<8x128xf32>
    %27 = arith.divf %25, %26 : vector<8x128xf32>
    %28 = vector.extract_strided_slice %21 {offsets = [0, 128], sizes = [8, 128], strides = [1, 1]} : vector<8x512xf32> to vector<8x128xf32>
    %29 = arith.negf %28 : vector<8x128xf32>
    %30 = math.exp %29 : vector<8x128xf32>
    %cst_23 = arith.constant 1.000000e+00 : f32
    %31 = vector.broadcast %cst_23 : f32 to vector<8x128xf32>
    %32 = arith.addf %31, %30 : vector<8x128xf32>
    %33 = arith.divf %31, %32 : vector<8x128xf32>
    %34 = vector.extract_strided_slice %21 {offsets = [0, 256], sizes = [8, 128], strides = [1, 1]} : vector<8x512xf32> to vector<8x128xf32>
    %35 = math.tanh %34 : vector<8x128xf32>
    %36 = vector.extract_strided_slice %21 {offsets = [0, 384], sizes = [8, 128], strides = [1, 1]} : vector<8x512xf32> to vector<8x128xf32>
    %37 = arith.negf %36 : vector<8x128xf32>
    %38 = math.exp %37 : vector<8x128xf32>
    %cst_24 = arith.constant 1.000000e+00 : f32
    %39 = vector.broadcast %cst_24 : f32 to vector<8x128xf32>
    %40 = arith.addf %39, %38 : vector<8x128xf32>
    %41 = arith.divf %39, %40 : vector<8x128xf32>
    %42 = arith.mulf %33, %15 : vector<8x128xf32>
    %43 = arith.mulf %27, %35 : vector<8x128xf32>
    %44 = arith.addf %42, %43 : vector<8x128xf32>
    %45 = math.tanh %44 : vector<8x128xf32>
    %46 = arith.mulf %41, %45 : vector<8x128xf32>
    %47 = arith.index_cast %c0_i32_16 : i32 to index
    %c0_25 = arith.constant 0 : index
    %c0_26 = arith.constant 0 : index
    %48 = vector.load %arg15[%47, %c0_25, %c0_26] : memref<8x8x128xf32, #tpu.memory_space<vmem>>, vector<1x8x128xf32>
    %49 = vector.shape_cast %48 : vector<1x8x128xf32> to vector<8x128xf32>
    %50 = vector.shape_cast %46 : vector<8x128xf32> to vector<1x8x128xf32>
    tpu.vector_store %arg15[%47, %c0_25, %c0_26], %50 {strides = array<i32>} : memref<8x8x128xf32, #tpu.memory_space<vmem>>, vector<1x8x128xf32>,
    %c1_i32 = arith.constant 1 : i32
    %51 = arith.index_cast %c1_i32 : i32 to index
    %c0_27 = arith.constant 0 : index
    %c0_28 = arith.constant 0 : index
    %52 = vector.load %arg14[%51, %c0_27, %c0_28] : memref<8x8x512xf32, #tpu.memory_space<vmem>>, vector<1x8x512xf32>
    %53 = vector.shape_cast %52 : vector<1x8x512xf32> to vector<8x512xf32>
    %c0_29 = arith.constant 0 : index
    %c0_30 = arith.constant 0 : index
    %54 = vector.load %arg4[%c0_29, %c0_30] : memref<128x512xf32, #tpu.memory_space<vmem>>, vector<128x512xf32>
    %cst_31 = arith.constant dense<0.000000e+00> : vector<8x512xf32>
    %55 = tpu.matmul %46, %54, %cst_31 {dimension_numbers = #tpu.dot_dimension_numbers<[1], [0], [0], [1], [0, 0, 1, 1], [], []>} : vector<8x128xf32>, vector<128x512xf32>, vector<8x512xf32> -> vector<8x512xf32>
    %56 = arith.addf %53, %55 : vector<8x512xf32>
    %57 = vector.extract_strided_slice %56 {offsets = [0, 0], sizes = [8, 128], strides = [1, 1]} : vector<8x512xf32> to vector<8x128xf32>
    %58 = arith.negf %57 : vector<8x128xf32>
    %59 = math.exp %58 : vector<8x128xf32>
    %cst_32 = arith.constant 1.000000e+00 : f32
    %60 = vector.broadcast %cst_32 : f32 to vector<8x128xf32>
    %61 = arith.addf %60, %59 : vector<8x128xf32>
    %62 = arith.divf %60, %61 : vector<8x128xf32>
    %63 = vector.extract_strided_slice %56 {offsets = [0, 128], sizes = [8, 128], strides = [1, 1]} : vector<8x512xf32> to vector<8x128xf32>
    %64 = arith.negf %63 : vector<8x128xf32>
    %65 = math.exp %64 : vector<8x128xf32>
    %cst_33 = arith.constant 1.000000e+00 : f32
    %66 = vector.broadcast %cst_33 : f32 to vector<8x128xf32>
    %67 = arith.addf %66, %65 : vector<8x128xf32>
    %68 = arith.divf %66, %67 : vector<8x128xf32>
    %69 = vector.extract_strided_slice %56 {offsets = [0, 256], sizes = [8, 128], strides = [1, 1]} : vector<8x512xf32> to vector<8x128xf32>
    %70 = math.tanh %69 : vector<8x128xf32>
    %71 = vector.extract_strided_slice %56 {offsets = [0, 384], sizes = [8, 128], strides = [1, 1]} : vector<8x512xf32> to vector<8x128xf32>
    %72 = arith.negf %71 : vector<8x128xf32>
    %73 = math.exp %72 : vector<8x128xf32>
    %cst_34 = arith.constant 1.000000e+00 : f32
    %74 = vector.broadcast %cst_34 : f32 to vector<8x128xf32>
    %75 = arith.addf %74, %73 : vector<8x128xf32>
    %76 = arith.divf %74, %75 : vector<8x128xf32>
    %77 = arith.mulf %68, %44 : vector<8x128xf32>
    %78 = arith.mulf %62, %70 : vector<8x128xf32>
    %79 = arith.addf %77, %78 : vector<8x128xf32>
    %80 = math.tanh %79 : vector<8x128xf32>
    %81 = arith.mulf %76, %80 : vector<8x128xf32>
    %82 = arith.index_cast %c1_i32 : i32 to index
    %c0_35 = arith.constant 0 : index
    %c0_36 = arith.constant 0 : index
    %83 = vector.load %arg15[%82, %c0_35, %c0_36] : memref<8x8x128xf32, #tpu.memory_space<vmem>>, vector<1x8x128xf32>
    %84 = vector.shape_cast %83 : vector<1x8x128xf32> to vector<8x128xf32>
    %85 = vector.shape_cast %81 : vector<8x128xf32> to vector<1x8x128xf32>
    tpu.vector_store %arg15[%82, %c0_35, %c0_36], %85 {strides = array<i32>} : memref<8x8x128xf32, #tpu.memory_space<vmem>>, vector<1x8x128xf32>,
    %c2_i32 = arith.constant 2 : i32
    %86 = arith.index_cast %c2_i32 : i32 to index
    %c0_37 = arith.constant 0 : index
    %c0_38 = arith.constant 0 : index
    %87 = vector.load %arg14[%86, %c0_37, %c0_38] : memref<8x8x512xf32, #tpu.memory_space<vmem>>, vector<1x8x512xf32>
    %88 = vector.shape_cast %87 : vector<1x8x512xf32> to vector<8x512xf32>
    %c0_39 = arith.constant 0 : index
    %c0_40 = arith.constant 0 : index
    %89 = vector.load %arg4[%c0_39, %c0_40] : memref<128x512xf32, #tpu.memory_space<vmem>>, vector<128x512xf32>
    %cst_41 = arith.constant dense<0.000000e+00> : vector<8x512xf32>
    %90 = tpu.matmul %81, %89, %cst_41 {dimension_numbers = #tpu.dot_dimension_numbers<[1], [0], [0], [1], [0, 0, 1, 1], [], []>} : vector<8x128xf32>, vector<128x512xf32>, vector<8x512xf32> -> vector<8x512xf32>
    %91 = arith.addf %88, %90 : vector<8x512xf32>
    %92 = vector.extract_strided_slice %91 {offsets = [0, 0], sizes = [8, 128], strides = [1, 1]} : vector<8x512xf32> to vector<8x128xf32>
    %93 = arith.negf %92 : vector<8x128xf32>
    %94 = math.exp %93 : vector<8x128xf32>
    %cst_42 = arith.constant 1.000000e+00 : f32
    %95 = vector.broadcast %cst_42 : f32 to vector<8x128xf32>
    %96 = arith.addf %95, %94 : vector<8x128xf32>
    %97 = arith.divf %95, %96 : vector<8x128xf32>
    %98 = vector.extract_strided_slice %91 {offsets = [0, 128], sizes = [8, 128], strides = [1, 1]} : vector<8x512xf32> to vector<8x128xf32>
    %99 = arith.negf %98 : vector<8x128xf32>
    %100 = math.exp %99 : vector<8x128xf32>
    %cst_43 = arith.constant 1.000000e+00 : f32
    %101 = vector.broadcast %cst_43 : f32 to vector<8x128xf32>
    %102 = arith.addf %101, %100 : vector<8x128xf32>
    %103 = arith.divf %101, %102 : vector<8x128xf32>
    %104 = vector.extract_strided_slice %91 {offsets = [0, 256], sizes = [8, 128], strides = [1, 1]} : vector<8x512xf32> to vector<8x128xf32>
    %105 = math.tanh %104 : vector<8x128xf32>
    %106 = vector.extract_strided_slice %91 {offsets = [0, 384], sizes = [8, 128], strides = [1, 1]} : vector<8x512xf32> to vector<8x128xf32>
    %107 = arith.negf %106 : vector<8x128xf32>
    %108 = math.exp %107 : vector<8x128xf32>
    %cst_44 = arith.constant 1.000000e+00 : f32
    %109 = vector.broadcast %cst_44 : f32 to vector<8x128xf32>
    %110 = arith.addf %109, %108 : vector<8x128xf32>
    %111 = arith.divf %109, %110 : vector<8x128xf32>
    %112 = arith.mulf %103, %79 : vector<8x128xf32>
    %113 = arith.mulf %97, %105 : vector<8x128xf32>
    %114 = arith.addf %112, %113 : vector<8x128xf32>
    %115 = math.tanh %114 : vector<8x128xf32>
    %116 = arith.mulf %111, %115 : vector<8x128xf32>
    %117 = arith.index_cast %c2_i32 : i32 to index
    %c0_45 = arith.constant 0 : index
    %c0_46 = arith.constant 0 : index
    %118 = vector.load %arg15[%117, %c0_45, %c0_46] : memref<8x8x128xf32, #tpu.memory_space<vmem>>, vector<1x8x128xf32>
    %119 = vector.shape_cast %118 : vector<1x8x128xf32> to vector<8x128xf32>
    %120 = vector.shape_cast %116 : vector<8x128xf32> to vector<1x8x128xf32>
    tpu.vector_store %arg15[%117, %c0_45, %c0_46], %120 {strides = array<i32>} : memref<8x8x128xf32, #tpu.memory_space<vmem>>, vector<1x8x128xf32>,
    %c3_i32 = arith.constant 3 : i32
    %121 = arith.index_cast %c3_i32 : i32 to index
    %c0_47 = arith.constant 0 : index
    %c0_48 = arith.constant 0 : index
    %122 = vector.load %arg14[%121, %c0_47, %c0_48] : memref<8x8x512xf32, #tpu.memory_space<vmem>>, vector<1x8x512xf32>
    %123 = vector.shape_cast %122 : vector<1x8x512xf32> to vector<8x512xf32>
    %c0_49 = arith.constant 0 : index
    %c0_50 = arith.constant 0 : index
    %124 = vector.load %arg4[%c0_49, %c0_50] : memref<128x512xf32, #tpu.memory_space<vmem>>, vector<128x512xf32>
    %cst_51 = arith.constant dense<0.000000e+00> : vector<8x512xf32>
    %125 = tpu.matmul %116, %124, %cst_51 {dimension_numbers = #tpu.dot_dimension_numbers<[1], [0], [0], [1], [0, 0, 1, 1], [], []>} : vector<8x128xf32>, vector<128x512xf32>, vector<8x512xf32> -> vector<8x512xf32>
    %126 = arith.addf %123, %125 : vector<8x512xf32>
    %127 = vector.extract_strided_slice %126 {offsets = [0, 0], sizes = [8, 128], strides = [1, 1]} : vector<8x512xf32> to vector<8x128xf32>
    %128 = arith.negf %127 : vector<8x128xf32>
    %129 = math.exp %128 : vector<8x128xf32>
    %cst_52 = arith.constant 1.000000e+00 : f32
    %130 = vector.broadcast %cst_52 : f32 to vector<8x128xf32>
    %131 = arith.addf %130, %129 : vector<8x128xf32>
    %132 = arith.divf %130, %131 : vector<8x128xf32>
    %133 = vector.extract_strided_slice %126 {offsets = [0, 128], sizes = [8, 128], strides = [1, 1]} : vector<8x512xf32> to vector<8x128xf32>
    %134 = arith.negf %133 : vector<8x128xf32>
    %135 = math.exp %134 : vector<8x128xf32>
    %cst_53 = arith.constant 1.000000e+00 : f32
    %136 = vector.broadcast %cst_53 : f32 to vector<8x128xf32>
    %137 = arith.addf %136, %135 : vector<8x128xf32>
    %138 = arith.divf %136, %137 : vector<8x128xf32>
    %139 = vector.extract_strided_slice %126 {offsets = [0, 256], sizes = [8, 128], strides = [1, 1]} : vector<8x512xf32> to vector<8x128xf32>
    %140 = math.tanh %139 : vector<8x128xf32>
    %141 = vector.extract_strided_slice %126 {offsets = [0, 384], sizes = [8, 128], strides = [1, 1]} : vector<8x512xf32> to vector<8x128xf32>
    %142 = arith.negf %141 : vector<8x128xf32>
    %143 = math.exp %142 : vector<8x128xf32>
    %cst_54 = arith.constant 1.000000e+00 : f32
    %144 = vector.broadcast %cst_54 : f32 to vector<8x128xf32>
    %145 = arith.addf %144, %143 : vector<8x128xf32>
    %146 = arith.divf %144, %145 : vector<8x128xf32>
    %147 = arith.mulf %138, %114 : vector<8x128xf32>
    %148 = arith.mulf %132, %140 : vector<8x128xf32>
    %149 = arith.addf %147, %148 : vector<8x128xf32>
    %150 = math.tanh %149 : vector<8x128xf32>
    %151 = arith.mulf %146, %150 : vector<8x128xf32>
    %152 = arith.index_cast %c3_i32 : i32 to index
    %c0_55 = arith.constant 0 : index
    %c0_56 = arith.constant 0 : index
    %153 = vector.load %arg15[%152, %c0_55, %c0_56] : memref<8x8x128xf32, #tpu.memory_space<vmem>>, vector<1x8x128xf32>
    %154 = vector.shape_cast %153 : vector<1x8x128xf32> to vector<8x128xf32>
    %155 = vector.shape_cast %151 : vector<8x128xf32> to vector<1x8x128xf32>
    tpu.vector_store %arg15[%152, %c0_55, %c0_56], %155 {strides = array<i32>} : memref<8x8x128xf32, #tpu.memory_space<vmem>>, vector<1x8x128xf32>,
    %c4_i32 = arith.constant 4 : i32
    %156 = arith.index_cast %c4_i32 : i32 to index
    %c0_57 = arith.constant 0 : index
    %c0_58 = arith.constant 0 : index
    %157 = vector.load %arg14[%156, %c0_57, %c0_58] : memref<8x8x512xf32, #tpu.memory_space<vmem>>, vector<1x8x512xf32>
    %158 = vector.shape_cast %157 : vector<1x8x512xf32> to vector<8x512xf32>
    %c0_59 = arith.constant 0 : index
    %c0_60 = arith.constant 0 : index
    %159 = vector.load %arg4[%c0_59, %c0_60] : memref<128x512xf32, #tpu.memory_space<vmem>>, vector<128x512xf32>
    %cst_61 = arith.constant dense<0.000000e+00> : vector<8x512xf32>
    %160 = tpu.matmul %151, %159, %cst_61 {dimension_numbers = #tpu.dot_dimension_numbers<[1], [0], [0], [1], [0, 0, 1, 1], [], []>} : vector<8x128xf32>, vector<128x512xf32>, vector<8x512xf32> -> vector<8x512xf32>
    %161 = arith.addf %158, %160 : vector<8x512xf32>
    %162 = vector.extract_strided_slice %161 {offsets = [0, 0], sizes = [8, 128], strides = [1, 1]} : vector<8x512xf32> to vector<8x128xf32>
    %163 = arith.negf %162 : vector<8x128xf32>
    %164 = math.exp %163 : vector<8x128xf32>
    %cst_62 = arith.constant 1.000000e+00 : f32
    %165 = vector.broadcast %cst_62 : f32 to vector<8x128xf32>
    %166 = arith.addf %165, %164 : vector<8x128xf32>
    %167 = arith.divf %165, %166 : vector<8x128xf32>
    %168 = vector.extract_strided_slice %161 {offsets = [0, 128], sizes = [8, 128], strides = [1, 1]} : vector<8x512xf32> to vector<8x128xf32>
    %169 = arith.negf %168 : vector<8x128xf32>
    %170 = math.exp %169 : vector<8x128xf32>
    %cst_63 = arith.constant 1.000000e+00 : f32
    %171 = vector.broadcast %cst_63 : f32 to vector<8x128xf32>
    %172 = arith.addf %171, %170 : vector<8x128xf32>
    %173 = arith.divf %171, %172 : vector<8x128xf32>
    %174 = vector.extract_strided_slice %161 {offsets = [0, 256], sizes = [8, 128], strides = [1, 1]} : vector<8x512xf32> to vector<8x128xf32>
    %175 = math.tanh %174 : vector<8x128xf32>
    %176 = vector.extract_strided_slice %161 {offsets = [0, 384], sizes = [8, 128], strides = [1, 1]} : vector<8x512xf32> to vector<8x128xf32>
    %177 = arith.negf %176 : vector<8x128xf32>
    %178 = math.exp %177 : vector<8x128xf32>
    %cst_64 = arith.constant 1.000000e+00 : f32
    %179 = vector.broadcast %cst_64 : f32 to vector<8x128xf32>
    %180 = arith.addf %179, %178 : vector<8x128xf32>
    %181 = arith.divf %179, %180 : vector<8x128xf32>
    %182 = arith.mulf %173, %149 : vector<8x128xf32>
    %183 = arith.mulf %167, %175 : vector<8x128xf32>
    %184 = arith.addf %182, %183 : vector<8x128xf32>
    %185 = math.tanh %184 : vector<8x128xf32>
    %186 = arith.mulf %181, %185 : vector<8x128xf32>
    %187 = arith.index_cast %c4_i32 : i32 to index
    %c0_65 = arith.constant 0 : index
    %c0_66 = arith.constant 0 : index
    %188 = vector.load %arg15[%187, %c0_65, %c0_66] : memref<8x8x128xf32, #tpu.memory_space<vmem>>, vector<1x8x128xf32>
    %189 = vector.shape_cast %188 : vector<1x8x128xf32> to vector<8x128xf32>
    %190 = vector.shape_cast %186 : vector<8x128xf32> to vector<1x8x128xf32>
    tpu.vector_store %arg15[%187, %c0_65, %c0_66], %190 {strides = array<i32>} : memref<8x8x128xf32, #tpu.memory_space<vmem>>, vector<1x8x128xf32>,
    %c5_i32 = arith.constant 5 : i32
    %191 = arith.index_cast %c5_i32 : i32 to index
    %c0_67 = arith.constant 0 : index
    %c0_68 = arith.constant 0 : index
    %192 = vector.load %arg14[%191, %c0_67, %c0_68] : memref<8x8x512xf32, #tpu.memory_space<vmem>>, vector<1x8x512xf32>
    %193 = vector.shape_cast %192 : vector<1x8x512xf32> to vector<8x512xf32>
    %c0_69 = arith.constant 0 : index
    %c0_70 = arith.constant 0 : index
    %194 = vector.load %arg4[%c0_69, %c0_70] : memref<128x512xf32, #tpu.memory_space<vmem>>, vector<128x512xf32>
    %cst_71 = arith.constant dense<0.000000e+00> : vector<8x512xf32>
    %195 = tpu.matmul %186, %194, %cst_71 {dimension_numbers = #tpu.dot_dimension_numbers<[1], [0], [0], [1], [0, 0, 1, 1], [], []>} : vector<8x128xf32>, vector<128x512xf32>, vector<8x512xf32> -> vector<8x512xf32>
    %196 = arith.addf %193, %195 : vector<8x512xf32>
    %197 = vector.extract_strided_slice %196 {offsets = [0, 0], sizes = [8, 128], strides = [1, 1]} : vector<8x512xf32> to vector<8x128xf32>
    %198 = arith.negf %197 : vector<8x128xf32>
    %199 = math.exp %198 : vector<8x128xf32>
    %cst_72 = arith.constant 1.000000e+00 : f32
    %200 = vector.broadcast %cst_72 : f32 to vector<8x128xf32>
    %201 = arith.addf %200, %199 : vector<8x128xf32>
    %202 = arith.divf %200, %201 : vector<8x128xf32>
    %203 = vector.extract_strided_slice %196 {offsets = [0, 128], sizes = [8, 128], strides = [1, 1]} : vector<8x512xf32> to vector<8x128xf32>
    %204 = arith.negf %203 : vector<8x128xf32>
    %205 = math.exp %204 : vector<8x128xf32>
    %cst_73 = arith.constant 1.000000e+00 : f32
    %206 = vector.broadcast %cst_73 : f32 to vector<8x128xf32>
    %207 = arith.addf %206, %205 : vector<8x128xf32>
    %208 = arith.divf %206, %207 : vector<8x128xf32>
    %209 = vector.extract_strided_slice %196 {offsets = [0, 256], sizes = [8, 128], strides = [1, 1]} : vector<8x512xf32> to vector<8x128xf32>
    %210 = math.tanh %209 : vector<8x128xf32>
    %211 = vector.extract_strided_slice %196 {offsets = [0, 384], sizes = [8, 128], strides = [1, 1]} : vector<8x512xf32> to vector<8x128xf32>
    %212 = arith.negf %211 : vector<8x128xf32>
    %213 = math.exp %212 : vector<8x128xf32>
    %cst_74 = arith.constant 1.000000e+00 : f32
    %214 = vector.broadcast %cst_74 : f32 to vector<8x128xf32>
    %215 = arith.addf %214, %213 : vector<8x128xf32>
    %216 = arith.divf %214, %215 : vector<8x128xf32>
    %217 = arith.mulf %208, %184 : vector<8x128xf32>
    %218 = arith.mulf %202, %210 : vector<8x128xf32>
    %219 = arith.addf %217, %218 : vector<8x128xf32>
    %220 = math.tanh %219 : vector<8x128xf32>
    %221 = arith.mulf %216, %220 : vector<8x128xf32>
    %222 = arith.index_cast %c5_i32 : i32 to index
    %c0_75 = arith.constant 0 : index
    %c0_76 = arith.constant 0 : index
    %223 = vector.load %arg15[%222, %c0_75, %c0_76] : memref<8x8x128xf32, #tpu.memory_space<vmem>>, vector<1x8x128xf32>
    %224 = vector.shape_cast %223 : vector<1x8x128xf32> to vector<8x128xf32>
    %225 = vector.shape_cast %221 : vector<8x128xf32> to vector<1x8x128xf32>
    tpu.vector_store %arg15[%222, %c0_75, %c0_76], %225 {strides = array<i32>} : memref<8x8x128xf32, #tpu.memory_space<vmem>>, vector<1x8x128xf32>,
    %c6_i32 = arith.constant 6 : i32
    %226 = arith.index_cast %c6_i32 : i32 to index
    %c0_77 = arith.constant 0 : index
    %c0_78 = arith.constant 0 : index
    %227 = vector.load %arg14[%226, %c0_77, %c0_78] : memref<8x8x512xf32, #tpu.memory_space<vmem>>, vector<1x8x512xf32>
    %228 = vector.shape_cast %227 : vector<1x8x512xf32> to vector<8x512xf32>
    %c0_79 = arith.constant 0 : index
    %c0_80 = arith.constant 0 : index
    %229 = vector.load %arg4[%c0_79, %c0_80] : memref<128x512xf32, #tpu.memory_space<vmem>>, vector<128x512xf32>
    %cst_81 = arith.constant dense<0.000000e+00> : vector<8x512xf32>
    %230 = tpu.matmul %221, %229, %cst_81 {dimension_numbers = #tpu.dot_dimension_numbers<[1], [0], [0], [1], [0, 0, 1, 1], [], []>} : vector<8x128xf32>, vector<128x512xf32>, vector<8x512xf32> -> vector<8x512xf32>
    %231 = arith.addf %228, %230 : vector<8x512xf32>
    %232 = vector.extract_strided_slice %231 {offsets = [0, 0], sizes = [8, 128], strides = [1, 1]} : vector<8x512xf32> to vector<8x128xf32>
    %233 = arith.negf %232 : vector<8x128xf32>
    %234 = math.exp %233 : vector<8x128xf32>
    %cst_82 = arith.constant 1.000000e+00 : f32
    %235 = vector.broadcast %cst_82 : f32 to vector<8x128xf32>
    %236 = arith.addf %235, %234 : vector<8x128xf32>
    %237 = arith.divf %235, %236 : vector<8x128xf32>
    %238 = vector.extract_strided_slice %231 {offsets = [0, 128], sizes = [8, 128], strides = [1, 1]} : vector<8x512xf32> to vector<8x128xf32>
    %239 = arith.negf %238 : vector<8x128xf32>
    %240 = math.exp %239 : vector<8x128xf32>
    %cst_83 = arith.constant 1.000000e+00 : f32
    %241 = vector.broadcast %cst_83 : f32 to vector<8x128xf32>
    %242 = arith.addf %241, %240 : vector<8x128xf32>
    %243 = arith.divf %241, %242 : vector<8x128xf32>
    %244 = vector.extract_strided_slice %231 {offsets = [0, 256], sizes = [8, 128], strides = [1, 1]} : vector<8x512xf32> to vector<8x128xf32>
    %245 = math.tanh %244 : vector<8x128xf32>
    %246 = vector.extract_strided_slice %231 {offsets = [0, 384], sizes = [8, 128], strides = [1, 1]} : vector<8x512xf32> to vector<8x128xf32>
    %247 = arith.negf %246 : vector<8x128xf32>
    %248 = math.exp %247 : vector<8x128xf32>
    %cst_84 = arith.constant 1.000000e+00 : f32
    %249 = vector.broadcast %cst_84 : f32 to vector<8x128xf32>
    %250 = arith.addf %249, %248 : vector<8x128xf32>
    %251 = arith.divf %249, %250 : vector<8x128xf32>
    %252 = arith.mulf %243, %219 : vector<8x128xf32>
    %253 = arith.mulf %237, %245 : vector<8x128xf32>
    %254 = arith.addf %252, %253 : vector<8x128xf32>
    %255 = math.tanh %254 : vector<8x128xf32>
    %256 = arith.mulf %251, %255 : vector<8x128xf32>
    %257 = arith.index_cast %c6_i32 : i32 to index
    %c0_85 = arith.constant 0 : index
    %c0_86 = arith.constant 0 : index
    %258 = vector.load %arg15[%257, %c0_85, %c0_86] : memref<8x8x128xf32, #tpu.memory_space<vmem>>, vector<1x8x128xf32>
    %259 = vector.shape_cast %258 : vector<1x8x128xf32> to vector<8x128xf32>
    %260 = vector.shape_cast %256 : vector<8x128xf32> to vector<1x8x128xf32>
    tpu.vector_store %arg15[%257, %c0_85, %c0_86], %260 {strides = array<i32>} : memref<8x8x128xf32, #tpu.memory_space<vmem>>, vector<1x8x128xf32>,
    %c7_i32 = arith.constant 7 : i32
    %261 = arith.index_cast %c7_i32 : i32 to index
    %c0_87 = arith.constant 0 : index
    %c0_88 = arith.constant 0 : index
    %262 = vector.load %arg14[%261, %c0_87, %c0_88] : memref<8x8x512xf32, #tpu.memory_space<vmem>>, vector<1x8x512xf32>
    %263 = vector.shape_cast %262 : vector<1x8x512xf32> to vector<8x512xf32>
    %c0_89 = arith.constant 0 : index
    %c0_90 = arith.constant 0 : index
    %264 = vector.load %arg4[%c0_89, %c0_90] : memref<128x512xf32, #tpu.memory_space<vmem>>, vector<128x512xf32>
    %cst_91 = arith.constant dense<0.000000e+00> : vector<8x512xf32>
    %265 = tpu.matmul %256, %264, %cst_91 {dimension_numbers = #tpu.dot_dimension_numbers<[1], [0], [0], [1], [0, 0, 1, 1], [], []>} : vector<8x128xf32>, vector<128x512xf32>, vector<8x512xf32> -> vector<8x512xf32>
    %266 = arith.addf %263, %265 : vector<8x512xf32>
    %267 = vector.extract_strided_slice %266 {offsets = [0, 0], sizes = [8, 128], strides = [1, 1]} : vector<8x512xf32> to vector<8x128xf32>
    %268 = arith.negf %267 : vector<8x128xf32>
    %269 = math.exp %268 : vector<8x128xf32>
    %cst_92 = arith.constant 1.000000e+00 : f32
    %270 = vector.broadcast %cst_92 : f32 to vector<8x128xf32>
    %271 = arith.addf %270, %269 : vector<8x128xf32>
    %272 = arith.divf %270, %271 : vector<8x128xf32>
    %273 = vector.extract_strided_slice %266 {offsets = [0, 128], sizes = [8, 128], strides = [1, 1]} : vector<8x512xf32> to vector<8x128xf32>
    %274 = arith.negf %273 : vector<8x128xf32>
    %275 = math.exp %274 : vector<8x128xf32>
    %cst_93 = arith.constant 1.000000e+00 : f32
    %276 = vector.broadcast %cst_93 : f32 to vector<8x128xf32>
    %277 = arith.addf %276, %275 : vector<8x128xf32>
    %278 = arith.divf %276, %277 : vector<8x128xf32>
    %279 = vector.extract_strided_slice %266 {offsets = [0, 256], sizes = [8, 128], strides = [1, 1]} : vector<8x512xf32> to vector<8x128xf32>
    %280 = math.tanh %279 : vector<8x128xf32>
    %281 = vector.extract_strided_slice %266 {offsets = [0, 384], sizes = [8, 128], strides = [1, 1]} : vector<8x512xf32> to vector<8x128xf32>
    %282 = arith.negf %281 : vector<8x128xf32>
    %283 = math.exp %282 : vector<8x128xf32>
    %cst_94 = arith.constant 1.000000e+00 : f32
    %284 = vector.broadcast %cst_94 : f32 to vector<8x128xf32>
    %285 = arith.addf %284, %283 : vector<8x128xf32>
    %286 = arith.divf %284, %285 : vector<8x128xf32>
    %287 = arith.mulf %278, %254 : vector<8x128xf32>
    %288 = arith.mulf %272, %280 : vector<8x128xf32>
    %289 = arith.addf %287, %288 : vector<8x128xf32>
    %290 = math.tanh %289 : vector<8x128xf32>
    %291 = arith.mulf %286, %290 : vector<8x128xf32>
    %292 = arith.index_cast %c7_i32 : i32 to index
    %c0_95 = arith.constant 0 : index
    %c0_96 = arith.constant 0 : index
    %293 = vector.load %arg15[%292, %c0_95, %c0_96] : memref<8x8x128xf32, #tpu.memory_space<vmem>>, vector<1x8x128xf32>
    %294 = vector.shape_cast %293 : vector<1x8x128xf32> to vector<8x128xf32>
    %295 = vector.shape_cast %291 : vector<8x128xf32> to vector<1x8x128xf32>
    tpu.vector_store %arg15[%292, %c0_95, %c0_96], %295 {strides = array<i32>} : memref<8x8x128xf32, #tpu.memory_space<vmem>>, vector<1x8x128xf32>,
    %c8_i32 = arith.constant 8 : i32
    %c0_97 = arith.constant 0 : index
    %c0_98 = arith.constant 0 : index
    %c0_99 = arith.constant 0 : index
    %296 = vector.load %arg12[%c0_97, %c0_98, %c0_99] : memref<2x8x128xf32, #tpu.memory_space<vmem>>, vector<1x8x128xf32>
    %297 = vector.shape_cast %296 : vector<1x8x128xf32> to vector<8x128xf32>
    %298 = vector.shape_cast %291 : vector<8x128xf32> to vector<1x8x128xf32>
    tpu.vector_store %arg12[%c0_97, %c0_98, %c0_99], %298 {strides = array<i32>} : memref<2x8x128xf32, #tpu.memory_space<vmem>>, vector<1x8x128xf32>,
    %c0_100 = arith.constant 0 : index
    %c0_101 = arith.constant 0 : index
    %c0_102 = arith.constant 0 : index
    %299 = vector.load %arg13[%c0_100, %c0_101, %c0_102] : memref<2x8x128xf32, #tpu.memory_space<vmem>>, vector<1x8x128xf32>
    %300 = vector.shape_cast %299 : vector<1x8x128xf32> to vector<8x128xf32>
    %301 = vector.shape_cast %289 : vector<8x128xf32> to vector<1x8x128xf32>
    tpu.vector_store %arg13[%c0_100, %c0_101, %c0_102], %301 {strides = array<i32>} : memref<2x8x128xf32, #tpu.memory_space<vmem>>, vector<1x8x128xf32>,
    %c0_103 = arith.constant 0 : index
    %c0_104 = arith.constant 0 : index
    %c0_105 = arith.constant 0 : index
    %302 = vector.load %arg15[%c0_103, %c0_104, %c0_105] : memref<8x8x128xf32, #tpu.memory_space<vmem>>, vector<8x8x128xf32>
    %303 = vector.shape_cast %302 : vector<8x8x128xf32> to vector<64x128xf32>
    %c0_106 = arith.constant 0 : index
    %c0_107 = arith.constant 0 : index
    %304 = vector.load %arg6[%c0_106, %c0_107] : memref<128x512xf32, #tpu.memory_space<vmem>>, vector<128x512xf32>
    %cst_108 = arith.constant dense<0.000000e+00> : vector<64x512xf32>
    %305 = tpu.matmul %303, %304, %cst_108 {dimension_numbers = #tpu.dot_dimension_numbers<[1], [0], [0], [1], [0, 0, 1, 1], [], []>} : vector<64x128xf32>, vector<128x512xf32>, vector<64x512xf32> -> vector<64x512xf32>
    %c0_109 = arith.constant 0 : index
    %c0_110 = arith.constant 0 : index
    %306 = vector.load %arg8[%c0_109, %c0_110] : memref<1x512xf32, #tpu.memory_space<vmem>>, vector<1x512xf32>
    %307 = vector.broadcast %306 : vector<1x512xf32> to vector<64x512xf32>
    %308 = arith.addf %305, %307 : vector<64x512xf32>
    %309 = vector.shape_cast %308 : vector<64x512xf32> to vector<8x8x512xf32>
    %c0_111 = arith.constant 0 : index
    %c0_112 = arith.constant 0 : index
    %c0_113 = arith.constant 0 : index
    %310 = vector.load %arg14[%c0_111, %c0_112, %c0_113] : memref<8x8x512xf32, #tpu.memory_space<vmem>>, vector<8x8x512xf32>
    tpu.vector_store %arg14[%c0_111, %c0_112, %c0_113], %309 {strides = array<i32>} : memref<8x8x512xf32, #tpu.memory_space<vmem>>, vector<8x8x512xf32>,
    %c1 = arith.constant 1 : index
    %c0_114 = arith.constant 0 : index
    %c0_115 = arith.constant 0 : index
    %311 = vector.load %arg12[%c1, %c0_114, %c0_115] : memref<2x8x128xf32, #tpu.memory_space<vmem>>, vector<1x8x128xf32>
    %312 = vector.shape_cast %311 : vector<1x8x128xf32> to vector<8x128xf32>
    %c1_116 = arith.constant 1 : index
    %c0_117 = arith.constant 0 : index
    %c0_118 = arith.constant 0 : index
    %313 = vector.load %arg13[%c1_116, %c0_117, %c0_118] : memref<2x8x128xf32, #tpu.memory_space<vmem>>, vector<1x8x128xf32>
    %314 = vector.shape_cast %313 : vector<1x8x128xf32> to vector<8x128xf32>
    %c0_i32_119 = arith.constant 0 : i32
    %315 = arith.index_cast %c0_i32_119 : i32 to index
    %c0_120 = arith.constant 0 : index
    %c0_121 = arith.constant 0 : index
    %316 = vector.load %arg14[%315, %c0_120, %c0_121] : memref<8x8x512xf32, #tpu.memory_space<vmem>>, vector<1x8x512xf32>
    %317 = vector.shape_cast %316 : vector<1x8x512xf32> to vector<8x512xf32>
    %c0_122 = arith.constant 0 : index
    %c0_123 = arith.constant 0 : index
    %318 = vector.load %arg7[%c0_122, %c0_123] : memref<128x512xf32, #tpu.memory_space<vmem>>, vector<128x512xf32>
    %cst_124 = arith.constant dense<0.000000e+00> : vector<8x512xf32>
    %319 = tpu.matmul %312, %318, %cst_124 {dimension_numbers = #tpu.dot_dimension_numbers<[1], [0], [0], [1], [0, 0, 1, 1], [], []>} : vector<8x128xf32>, vector<128x512xf32>, vector<8x512xf32> -> vector<8x512xf32>
    %320 = arith.addf %317, %319 : vector<8x512xf32>
    %321 = vector.extract_strided_slice %320 {offsets = [0, 0], sizes = [8, 128], strides = [1, 1]} : vector<8x512xf32> to vector<8x128xf32>
    %322 = arith.negf %321 : vector<8x128xf32>
    %323 = math.exp %322 : vector<8x128xf32>
    %cst_125 = arith.constant 1.000000e+00 : f32
    %324 = vector.broadcast %cst_125 : f32 to vector<8x128xf32>
    %325 = arith.addf %324, %323 : vector<8x128xf32>
    %326 = arith.divf %324, %325 : vector<8x128xf32>
    %327 = vector.extract_strided_slice %320 {offsets = [0, 128], sizes = [8, 128], strides = [1, 1]} : vector<8x512xf32> to vector<8x128xf32>
    %328 = arith.negf %327 : vector<8x128xf32>
    %329 = math.exp %328 : vector<8x128xf32>
    %cst_126 = arith.constant 1.000000e+00 : f32
    %330 = vector.broadcast %cst_126 : f32 to vector<8x128xf32>
    %331 = arith.addf %330, %329 : vector<8x128xf32>
    %332 = arith.divf %330, %331 : vector<8x128xf32>
    %333 = vector.extract_strided_slice %320 {offsets = [0, 256], sizes = [8, 128], strides = [1, 1]} : vector<8x512xf32> to vector<8x128xf32>
    %334 = math.tanh %333 : vector<8x128xf32>
    %335 = vector.extract_strided_slice %320 {offsets = [0, 384], sizes = [8, 128], strides = [1, 1]} : vector<8x512xf32> to vector<8x128xf32>
    %336 = arith.negf %335 : vector<8x128xf32>
    %337 = math.exp %336 : vector<8x128xf32>
    %cst_127 = arith.constant 1.000000e+00 : f32
    %338 = vector.broadcast %cst_127 : f32 to vector<8x128xf32>
    %339 = arith.addf %338, %337 : vector<8x128xf32>
    %340 = arith.divf %338, %339 : vector<8x128xf32>
    %341 = arith.mulf %332, %314 : vector<8x128xf32>
    %342 = arith.mulf %326, %334 : vector<8x128xf32>
    %343 = arith.addf %341, %342 : vector<8x128xf32>
    %344 = math.tanh %343 : vector<8x128xf32>
    %345 = arith.mulf %340, %344 : vector<8x128xf32>
    %346 = arith.index_cast %c0_i32_119 : i32 to index
    %c0_128 = arith.constant 0 : index
    %c0_129 = arith.constant 0 : index
    %347 = vector.load %arg15[%346, %c0_128, %c0_129] : memref<8x8x128xf32, #tpu.memory_space<vmem>>, vector<1x8x128xf32>
    %348 = vector.shape_cast %347 : vector<1x8x128xf32> to vector<8x128xf32>
    %349 = vector.shape_cast %345 : vector<8x128xf32> to vector<1x8x128xf32>
    tpu.vector_store %arg15[%346, %c0_128, %c0_129], %349 {strides = array<i32>} : memref<8x8x128xf32, #tpu.memory_space<vmem>>, vector<1x8x128xf32>,
    %c1_i32_130 = arith.constant 1 : i32
    %350 = arith.index_cast %c1_i32_130 : i32 to index
    %c0_131 = arith.constant 0 : index
    %c0_132 = arith.constant 0 : index
    %351 = vector.load %arg14[%350, %c0_131, %c0_132] : memref<8x8x512xf32, #tpu.memory_space<vmem>>, vector<1x8x512xf32>
    %352 = vector.shape_cast %351 : vector<1x8x512xf32> to vector<8x512xf32>
    %c0_133 = arith.constant 0 : index
    %c0_134 = arith.constant 0 : index
    %353 = vector.load %arg7[%c0_133, %c0_134] : memref<128x512xf32, #tpu.memory_space<vmem>>, vector<128x512xf32>
    %cst_135 = arith.constant dense<0.000000e+00> : vector<8x512xf32>
    %354 = tpu.matmul %345, %353, %cst_135 {dimension_numbers = #tpu.dot_dimension_numbers<[1], [0], [0], [1], [0, 0, 1, 1], [], []>} : vector<8x128xf32>, vector<128x512xf32>, vector<8x512xf32> -> vector<8x512xf32>
    %355 = arith.addf %352, %354 : vector<8x512xf32>
    %356 = vector.extract_strided_slice %355 {offsets = [0, 0], sizes = [8, 128], strides = [1, 1]} : vector<8x512xf32> to vector<8x128xf32>
    %357 = arith.negf %356 : vector<8x128xf32>
    %358 = math.exp %357 : vector<8x128xf32>
    %cst_136 = arith.constant 1.000000e+00 : f32
    %359 = vector.broadcast %cst_136 : f32 to vector<8x128xf32>
    %360 = arith.addf %359, %358 : vector<8x128xf32>
    %361 = arith.divf %359, %360 : vector<8x128xf32>
    %362 = vector.extract_strided_slice %355 {offsets = [0, 128], sizes = [8, 128], strides = [1, 1]} : vector<8x512xf32> to vector<8x128xf32>
    %363 = arith.negf %362 : vector<8x128xf32>
    %364 = math.exp %363 : vector<8x128xf32>
    %cst_137 = arith.constant 1.000000e+00 : f32
    %365 = vector.broadcast %cst_137 : f32 to vector<8x128xf32>
    %366 = arith.addf %365, %364 : vector<8x128xf32>
    %367 = arith.divf %365, %366 : vector<8x128xf32>
    %368 = vector.extract_strided_slice %355 {offsets = [0, 256], sizes = [8, 128], strides = [1, 1]} : vector<8x512xf32> to vector<8x128xf32>
    %369 = math.tanh %368 : vector<8x128xf32>
    %370 = vector.extract_strided_slice %355 {offsets = [0, 384], sizes = [8, 128], strides = [1, 1]} : vector<8x512xf32> to vector<8x128xf32>
    %371 = arith.negf %370 : vector<8x128xf32>
    %372 = math.exp %371 : vector<8x128xf32>
    %cst_138 = arith.constant 1.000000e+00 : f32
    %373 = vector.broadcast %cst_138 : f32 to vector<8x128xf32>
    %374 = arith.addf %373, %372 : vector<8x128xf32>
    %375 = arith.divf %373, %374 : vector<8x128xf32>
    %376 = arith.mulf %367, %343 : vector<8x128xf32>
    %377 = arith.mulf %361, %369 : vector<8x128xf32>
    %378 = arith.addf %376, %377 : vector<8x128xf32>
    %379 = math.tanh %378 : vector<8x128xf32>
    %380 = arith.mulf %375, %379 : vector<8x128xf32>
    %381 = arith.index_cast %c1_i32_130 : i32 to index
    %c0_139 = arith.constant 0 : index
    %c0_140 = arith.constant 0 : index
    %382 = vector.load %arg15[%381, %c0_139, %c0_140] : memref<8x8x128xf32, #tpu.memory_space<vmem>>, vector<1x8x128xf32>
    %383 = vector.shape_cast %382 : vector<1x8x128xf32> to vector<8x128xf32>
    %384 = vector.shape_cast %380 : vector<8x128xf32> to vector<1x8x128xf32>
    tpu.vector_store %arg15[%381, %c0_139, %c0_140], %384 {strides = array<i32>} : memref<8x8x128xf32, #tpu.memory_space<vmem>>, vector<1x8x128xf32>,
    %c2_i32_141 = arith.constant 2 : i32
    %385 = arith.index_cast %c2_i32_141 : i32 to index
    %c0_142 = arith.constant 0 : index
    %c0_143 = arith.constant 0 : index
    %386 = vector.load %arg14[%385, %c0_142, %c0_143] : memref<8x8x512xf32, #tpu.memory_space<vmem>>, vector<1x8x512xf32>
    %387 = vector.shape_cast %386 : vector<1x8x512xf32> to vector<8x512xf32>
    %c0_144 = arith.constant 0 : index
    %c0_145 = arith.constant 0 : index
    %388 = vector.load %arg7[%c0_144, %c0_145] : memref<128x512xf32, #tpu.memory_space<vmem>>, vector<128x512xf32>
    %cst_146 = arith.constant dense<0.000000e+00> : vector<8x512xf32>
    %389 = tpu.matmul %380, %388, %cst_146 {dimension_numbers = #tpu.dot_dimension_numbers<[1], [0], [0], [1], [0, 0, 1, 1], [], []>} : vector<8x128xf32>, vector<128x512xf32>, vector<8x512xf32> -> vector<8x512xf32>
    %390 = arith.addf %387, %389 : vector<8x512xf32>
    %391 = vector.extract_strided_slice %390 {offsets = [0, 0], sizes = [8, 128], strides = [1, 1]} : vector<8x512xf32> to vector<8x128xf32>
    %392 = arith.negf %391 : vector<8x128xf32>
    %393 = math.exp %392 : vector<8x128xf32>
    %cst_147 = arith.constant 1.000000e+00 : f32
    %394 = vector.broadcast %cst_147 : f32 to vector<8x128xf32>
    %395 = arith.addf %394, %393 : vector<8x128xf32>
    %396 = arith.divf %394, %395 : vector<8x128xf32>
    %397 = vector.extract_strided_slice %390 {offsets = [0, 128], sizes = [8, 128], strides = [1, 1]} : vector<8x512xf32> to vector<8x128xf32>
    %398 = arith.negf %397 : vector<8x128xf32>
    %399 = math.exp %398 : vector<8x128xf32>
    %cst_148 = arith.constant 1.000000e+00 : f32
    %400 = vector.broadcast %cst_148 : f32 to vector<8x128xf32>
    %401 = arith.addf %400, %399 : vector<8x128xf32>
    %402 = arith.divf %400, %401 : vector<8x128xf32>
    %403 = vector.extract_strided_slice %390 {offsets = [0, 256], sizes = [8, 128], strides = [1, 1]} : vector<8x512xf32> to vector<8x128xf32>
    %404 = math.tanh %403 : vector<8x128xf32>
    %405 = vector.extract_strided_slice %390 {offsets = [0, 384], sizes = [8, 128], strides = [1, 1]} : vector<8x512xf32> to vector<8x128xf32>
    %406 = arith.negf %405 : vector<8x128xf32>
    %407 = math.exp %406 : vector<8x128xf32>
    %cst_149 = arith.constant 1.000000e+00 : f32
    %408 = vector.broadcast %cst_149 : f32 to vector<8x128xf32>
    %409 = arith.addf %408, %407 : vector<8x128xf32>
    %410 = arith.divf %408, %409 : vector<8x128xf32>
    %411 = arith.mulf %402, %378 : vector<8x128xf32>
    %412 = arith.mulf %396, %404 : vector<8x128xf32>
    %413 = arith.addf %411, %412 : vector<8x128xf32>
    %414 = math.tanh %413 : vector<8x128xf32>
    %415 = arith.mulf %410, %414 : vector<8x128xf32>
    %416 = arith.index_cast %c2_i32_141 : i32 to index
    %c0_150 = arith.constant 0 : index
    %c0_151 = arith.constant 0 : index
    %417 = vector.load %arg15[%416, %c0_150, %c0_151] : memref<8x8x128xf32, #tpu.memory_space<vmem>>, vector<1x8x128xf32>
    %418 = vector.shape_cast %417 : vector<1x8x128xf32> to vector<8x128xf32>
    %419 = vector.shape_cast %415 : vector<8x128xf32> to vector<1x8x128xf32>
    tpu.vector_store %arg15[%416, %c0_150, %c0_151], %419 {strides = array<i32>} : memref<8x8x128xf32, #tpu.memory_space<vmem>>, vector<1x8x128xf32>,
    %c3_i32_152 = arith.constant 3 : i32
    %420 = arith.index_cast %c3_i32_152 : i32 to index
    %c0_153 = arith.constant 0 : index
    %c0_154 = arith.constant 0 : index
    %421 = vector.load %arg14[%420, %c0_153, %c0_154] : memref<8x8x512xf32, #tpu.memory_space<vmem>>, vector<1x8x512xf32>
    %422 = vector.shape_cast %421 : vector<1x8x512xf32> to vector<8x512xf32>
    %c0_155 = arith.constant 0 : index
    %c0_156 = arith.constant 0 : index
    %423 = vector.load %arg7[%c0_155, %c0_156] : memref<128x512xf32, #tpu.memory_space<vmem>>, vector<128x512xf32>
    %cst_157 = arith.constant dense<0.000000e+00> : vector<8x512xf32>
    %424 = tpu.matmul %415, %423, %cst_157 {dimension_numbers = #tpu.dot_dimension_numbers<[1], [0], [0], [1], [0, 0, 1, 1], [], []>} : vector<8x128xf32>, vector<128x512xf32>, vector<8x512xf32> -> vector<8x512xf32>
    %425 = arith.addf %422, %424 : vector<8x512xf32>
    %426 = vector.extract_strided_slice %425 {offsets = [0, 0], sizes = [8, 128], strides = [1, 1]} : vector<8x512xf32> to vector<8x128xf32>
    %427 = arith.negf %426 : vector<8x128xf32>
    %428 = math.exp %427 : vector<8x128xf32>
    %cst_158 = arith.constant 1.000000e+00 : f32
    %429 = vector.broadcast %cst_158 : f32 to vector<8x128xf32>
    %430 = arith.addf %429, %428 : vector<8x128xf32>
    %431 = arith.divf %429, %430 : vector<8x128xf32>
    %432 = vector.extract_strided_slice %425 {offsets = [0, 128], sizes = [8, 128], strides = [1, 1]} : vector<8x512xf32> to vector<8x128xf32>
    %433 = arith.negf %432 : vector<8x128xf32>
    %434 = math.exp %433 : vector<8x128xf32>
    %cst_159 = arith.constant 1.000000e+00 : f32
    %435 = vector.broadcast %cst_159 : f32 to vector<8x128xf32>
    %436 = arith.addf %435, %434 : vector<8x128xf32>
    %437 = arith.divf %435, %436 : vector<8x128xf32>
    %438 = vector.extract_strided_slice %425 {offsets = [0, 256], sizes = [8, 128], strides = [1, 1]} : vector<8x512xf32> to vector<8x128xf32>
    %439 = math.tanh %438 : vector<8x128xf32>
    %440 = vector.extract_strided_slice %425 {offsets = [0, 384], sizes = [8, 128], strides = [1, 1]} : vector<8x512xf32> to vector<8x128xf32>
    %441 = arith.negf %440 : vector<8x128xf32>
    %442 = math.exp %441 : vector<8x128xf32>
    %cst_160 = arith.constant 1.000000e+00 : f32
    %443 = vector.broadcast %cst_160 : f32 to vector<8x128xf32>
    %444 = arith.addf %443, %442 : vector<8x128xf32>
    %445 = arith.divf %443, %444 : vector<8x128xf32>
    %446 = arith.mulf %437, %413 : vector<8x128xf32>
    %447 = arith.mulf %431, %439 : vector<8x128xf32>
    %448 = arith.addf %446, %447 : vector<8x128xf32>
    %449 = math.tanh %448 : vector<8x128xf32>
    %450 = arith.mulf %445, %449 : vector<8x128xf32>
    %451 = arith.index_cast %c3_i32_152 : i32 to index
    %c0_161 = arith.constant 0 : index
    %c0_162 = arith.constant 0 : index
    %452 = vector.load %arg15[%451, %c0_161, %c0_162] : memref<8x8x128xf32, #tpu.memory_space<vmem>>, vector<1x8x128xf32>
    %453 = vector.shape_cast %452 : vector<1x8x128xf32> to vector<8x128xf32>
    %454 = vector.shape_cast %450 : vector<8x128xf32> to vector<1x8x128xf32>
    tpu.vector_store %arg15[%451, %c0_161, %c0_162], %454 {strides = array<i32>} : memref<8x8x128xf32, #tpu.memory_space<vmem>>, vector<1x8x128xf32>,
    %c4_i32_163 = arith.constant 4 : i32
    %455 = arith.index_cast %c4_i32_163 : i32 to index
    %c0_164 = arith.constant 0 : index
    %c0_165 = arith.constant 0 : index
    %456 = vector.load %arg14[%455, %c0_164, %c0_165] : memref<8x8x512xf32, #tpu.memory_space<vmem>>, vector<1x8x512xf32>
    %457 = vector.shape_cast %456 : vector<1x8x512xf32> to vector<8x512xf32>
    %c0_166 = arith.constant 0 : index
    %c0_167 = arith.constant 0 : index
    %458 = vector.load %arg7[%c0_166, %c0_167] : memref<128x512xf32, #tpu.memory_space<vmem>>, vector<128x512xf32>
    %cst_168 = arith.constant dense<0.000000e+00> : vector<8x512xf32>
    %459 = tpu.matmul %450, %458, %cst_168 {dimension_numbers = #tpu.dot_dimension_numbers<[1], [0], [0], [1], [0, 0, 1, 1], [], []>} : vector<8x128xf32>, vector<128x512xf32>, vector<8x512xf32> -> vector<8x512xf32>
    %460 = arith.addf %457, %459 : vector<8x512xf32>
    %461 = vector.extract_strided_slice %460 {offsets = [0, 0], sizes = [8, 128], strides = [1, 1]} : vector<8x512xf32> to vector<8x128xf32>
    %462 = arith.negf %461 : vector<8x128xf32>
    %463 = math.exp %462 : vector<8x128xf32>
    %cst_169 = arith.constant 1.000000e+00 : f32
    %464 = vector.broadcast %cst_169 : f32 to vector<8x128xf32>
    %465 = arith.addf %464, %463 : vector<8x128xf32>
    %466 = arith.divf %464, %465 : vector<8x128xf32>
    %467 = vector.extract_strided_slice %460 {offsets = [0, 128], sizes = [8, 128], strides = [1, 1]} : vector<8x512xf32> to vector<8x128xf32>
    %468 = arith.negf %467 : vector<8x128xf32>
    %469 = math.exp %468 : vector<8x128xf32>
    %cst_170 = arith.constant 1.000000e+00 : f32
    %470 = vector.broadcast %cst_170 : f32 to vector<8x128xf32>
    %471 = arith.addf %470, %469 : vector<8x128xf32>
    %472 = arith.divf %470, %471 : vector<8x128xf32>
    %473 = vector.extract_strided_slice %460 {offsets = [0, 256], sizes = [8, 128], strides = [1, 1]} : vector<8x512xf32> to vector<8x128xf32>
    %474 = math.tanh %473 : vector<8x128xf32>
    %475 = vector.extract_strided_slice %460 {offsets = [0, 384], sizes = [8, 128], strides = [1, 1]} : vector<8x512xf32> to vector<8x128xf32>
    %476 = arith.negf %475 : vector<8x128xf32>
    %477 = math.exp %476 : vector<8x128xf32>
    %cst_171 = arith.constant 1.000000e+00 : f32
    %478 = vector.broadcast %cst_171 : f32 to vector<8x128xf32>
    %479 = arith.addf %478, %477 : vector<8x128xf32>
    %480 = arith.divf %478, %479 : vector<8x128xf32>
    %481 = arith.mulf %472, %448 : vector<8x128xf32>
    %482 = arith.mulf %466, %474 : vector<8x128xf32>
    %483 = arith.addf %481, %482 : vector<8x128xf32>
    %484 = math.tanh %483 : vector<8x128xf32>
    %485 = arith.mulf %480, %484 : vector<8x128xf32>
    %486 = arith.index_cast %c4_i32_163 : i32 to index
    %c0_172 = arith.constant 0 : index
    %c0_173 = arith.constant 0 : index
    %487 = vector.load %arg15[%486, %c0_172, %c0_173] : memref<8x8x128xf32, #tpu.memory_space<vmem>>, vector<1x8x128xf32>
    %488 = vector.shape_cast %487 : vector<1x8x128xf32> to vector<8x128xf32>
    %489 = vector.shape_cast %485 : vector<8x128xf32> to vector<1x8x128xf32>
    tpu.vector_store %arg15[%486, %c0_172, %c0_173], %489 {strides = array<i32>} : memref<8x8x128xf32, #tpu.memory_space<vmem>>, vector<1x8x128xf32>,
    %c5_i32_174 = arith.constant 5 : i32
    %490 = arith.index_cast %c5_i32_174 : i32 to index
    %c0_175 = arith.constant 0 : index
    %c0_176 = arith.constant 0 : index
    %491 = vector.load %arg14[%490, %c0_175, %c0_176] : memref<8x8x512xf32, #tpu.memory_space<vmem>>, vector<1x8x512xf32>
    %492 = vector.shape_cast %491 : vector<1x8x512xf32> to vector<8x512xf32>
    %c0_177 = arith.constant 0 : index
    %c0_178 = arith.constant 0 : index
    %493 = vector.load %arg7[%c0_177, %c0_178] : memref<128x512xf32, #tpu.memory_space<vmem>>, vector<128x512xf32>
    %cst_179 = arith.constant dense<0.000000e+00> : vector<8x512xf32>
    %494 = tpu.matmul %485, %493, %cst_179 {dimension_numbers = #tpu.dot_dimension_numbers<[1], [0], [0], [1], [0, 0, 1, 1], [], []>} : vector<8x128xf32>, vector<128x512xf32>, vector<8x512xf32> -> vector<8x512xf32>
    %495 = arith.addf %492, %494 : vector<8x512xf32>
    %496 = vector.extract_strided_slice %495 {offsets = [0, 0], sizes = [8, 128], strides = [1, 1]} : vector<8x512xf32> to vector<8x128xf32>
    %497 = arith.negf %496 : vector<8x128xf32>
    %498 = math.exp %497 : vector<8x128xf32>
    %cst_180 = arith.constant 1.000000e+00 : f32
    %499 = vector.broadcast %cst_180 : f32 to vector<8x128xf32>
    %500 = arith.addf %499, %498 : vector<8x128xf32>
    %501 = arith.divf %499, %500 : vector<8x128xf32>
    %502 = vector.extract_strided_slice %495 {offsets = [0, 128], sizes = [8, 128], strides = [1, 1]} : vector<8x512xf32> to vector<8x128xf32>
    %503 = arith.negf %502 : vector<8x128xf32>
    %504 = math.exp %503 : vector<8x128xf32>
    %cst_181 = arith.constant 1.000000e+00 : f32
    %505 = vector.broadcast %cst_181 : f32 to vector<8x128xf32>
    %506 = arith.addf %505, %504 : vector<8x128xf32>
    %507 = arith.divf %505, %506 : vector<8x128xf32>
    %508 = vector.extract_strided_slice %495 {offsets = [0, 256], sizes = [8, 128], strides = [1, 1]} : vector<8x512xf32> to vector<8x128xf32>
    %509 = math.tanh %508 : vector<8x128xf32>
    %510 = vector.extract_strided_slice %495 {offsets = [0, 384], sizes = [8, 128], strides = [1, 1]} : vector<8x512xf32> to vector<8x128xf32>
    %511 = arith.negf %510 : vector<8x128xf32>
    %512 = math.exp %511 : vector<8x128xf32>
    %cst_182 = arith.constant 1.000000e+00 : f32
    %513 = vector.broadcast %cst_182 : f32 to vector<8x128xf32>
    %514 = arith.addf %513, %512 : vector<8x128xf32>
    %515 = arith.divf %513, %514 : vector<8x128xf32>
    %516 = arith.mulf %507, %483 : vector<8x128xf32>
    %517 = arith.mulf %501, %509 : vector<8x128xf32>
    %518 = arith.addf %516, %517 : vector<8x128xf32>
    %519 = math.tanh %518 : vector<8x128xf32>
    %520 = arith.mulf %515, %519 : vector<8x128xf32>
    %521 = arith.index_cast %c5_i32_174 : i32 to index
    %c0_183 = arith.constant 0 : index
    %c0_184 = arith.constant 0 : index
    %522 = vector.load %arg15[%521, %c0_183, %c0_184] : memref<8x8x128xf32, #tpu.memory_space<vmem>>, vector<1x8x128xf32>
    %523 = vector.shape_cast %522 : vector<1x8x128xf32> to vector<8x128xf32>
    %524 = vector.shape_cast %520 : vector<8x128xf32> to vector<1x8x128xf32>
    tpu.vector_store %arg15[%521, %c0_183, %c0_184], %524 {strides = array<i32>} : memref<8x8x128xf32, #tpu.memory_space<vmem>>, vector<1x8x128xf32>,
    %c6_i32_185 = arith.constant 6 : i32
    %525 = arith.index_cast %c6_i32_185 : i32 to index
    %c0_186 = arith.constant 0 : index
    %c0_187 = arith.constant 0 : index
    %526 = vector.load %arg14[%525, %c0_186, %c0_187] : memref<8x8x512xf32, #tpu.memory_space<vmem>>, vector<1x8x512xf32>
    %527 = vector.shape_cast %526 : vector<1x8x512xf32> to vector<8x512xf32>
    %c0_188 = arith.constant 0 : index
    %c0_189 = arith.constant 0 : index
    %528 = vector.load %arg7[%c0_188, %c0_189] : memref<128x512xf32, #tpu.memory_space<vmem>>, vector<128x512xf32>
    %cst_190 = arith.constant dense<0.000000e+00> : vector<8x512xf32>
    %529 = tpu.matmul %520, %528, %cst_190 {dimension_numbers = #tpu.dot_dimension_numbers<[1], [0], [0], [1], [0, 0, 1, 1], [], []>} : vector<8x128xf32>, vector<128x512xf32>, vector<8x512xf32> -> vector<8x512xf32>
    %530 = arith.addf %527, %529 : vector<8x512xf32>
    %531 = vector.extract_strided_slice %530 {offsets = [0, 0], sizes = [8, 128], strides = [1, 1]} : vector<8x512xf32> to vector<8x128xf32>
    %532 = arith.negf %531 : vector<8x128xf32>
    %533 = math.exp %532 : vector<8x128xf32>
    %cst_191 = arith.constant 1.000000e+00 : f32
    %534 = vector.broadcast %cst_191 : f32 to vector<8x128xf32>
    %535 = arith.addf %534, %533 : vector<8x128xf32>
    %536 = arith.divf %534, %535 : vector<8x128xf32>
    %537 = vector.extract_strided_slice %530 {offsets = [0, 128], sizes = [8, 128], strides = [1, 1]} : vector<8x512xf32> to vector<8x128xf32>
    %538 = arith.negf %537 : vector<8x128xf32>
    %539 = math.exp %538 : vector<8x128xf32>
    %cst_192 = arith.constant 1.000000e+00 : f32
    %540 = vector.broadcast %cst_192 : f32 to vector<8x128xf32>
    %541 = arith.addf %540, %539 : vector<8x128xf32>
    %542 = arith.divf %540, %541 : vector<8x128xf32>
    %543 = vector.extract_strided_slice %530 {offsets = [0, 256], sizes = [8, 128], strides = [1, 1]} : vector<8x512xf32> to vector<8x128xf32>
    %544 = math.tanh %543 : vector<8x128xf32>
    %545 = vector.extract_strided_slice %530 {offsets = [0, 384], sizes = [8, 128], strides = [1, 1]} : vector<8x512xf32> to vector<8x128xf32>
    %546 = arith.negf %545 : vector<8x128xf32>
    %547 = math.exp %546 : vector<8x128xf32>
    %cst_193 = arith.constant 1.000000e+00 : f32
    %548 = vector.broadcast %cst_193 : f32 to vector<8x128xf32>
    %549 = arith.addf %548, %547 : vector<8x128xf32>
    %550 = arith.divf %548, %549 : vector<8x128xf32>
    %551 = arith.mulf %542, %518 : vector<8x128xf32>
    %552 = arith.mulf %536, %544 : vector<8x128xf32>
    %553 = arith.addf %551, %552 : vector<8x128xf32>
    %554 = math.tanh %553 : vector<8x128xf32>
    %555 = arith.mulf %550, %554 : vector<8x128xf32>
    %556 = arith.index_cast %c6_i32_185 : i32 to index
    %c0_194 = arith.constant 0 : index
    %c0_195 = arith.constant 0 : index
    %557 = vector.load %arg15[%556, %c0_194, %c0_195] : memref<8x8x128xf32, #tpu.memory_space<vmem>>, vector<1x8x128xf32>
    %558 = vector.shape_cast %557 : vector<1x8x128xf32> to vector<8x128xf32>
    %559 = vector.shape_cast %555 : vector<8x128xf32> to vector<1x8x128xf32>
    tpu.vector_store %arg15[%556, %c0_194, %c0_195], %559 {strides = array<i32>} : memref<8x8x128xf32, #tpu.memory_space<vmem>>, vector<1x8x128xf32>,
    %c7_i32_196 = arith.constant 7 : i32
    %560 = arith.index_cast %c7_i32_196 : i32 to index
    %c0_197 = arith.constant 0 : index
    %c0_198 = arith.constant 0 : index
    %561 = vector.load %arg14[%560, %c0_197, %c0_198] : memref<8x8x512xf32, #tpu.memory_space<vmem>>, vector<1x8x512xf32>
    %562 = vector.shape_cast %561 : vector<1x8x512xf32> to vector<8x512xf32>
    %c0_199 = arith.constant 0 : index
    %c0_200 = arith.constant 0 : index
    %563 = vector.load %arg7[%c0_199, %c0_200] : memref<128x512xf32, #tpu.memory_space<vmem>>, vector<128x512xf32>
    %cst_201 = arith.constant dense<0.000000e+00> : vector<8x512xf32>
    %564 = tpu.matmul %555, %563, %cst_201 {dimension_numbers = #tpu.dot_dimension_numbers<[1], [0], [0], [1], [0, 0, 1, 1], [], []>} : vector<8x128xf32>, vector<128x512xf32>, vector<8x512xf32> -> vector<8x512xf32>
    %565 = arith.addf %562, %564 : vector<8x512xf32>
    %566 = vector.extract_strided_slice %565 {offsets = [0, 0], sizes = [8, 128], strides = [1, 1]} : vector<8x512xf32> to vector<8x128xf32>
    %567 = arith.negf %566 : vector<8x128xf32>
    %568 = math.exp %567 : vector<8x128xf32>
    %cst_202 = arith.constant 1.000000e+00 : f32
    %569 = vector.broadcast %cst_202 : f32 to vector<8x128xf32>
    %570 = arith.addf %569, %568 : vector<8x128xf32>
    %571 = arith.divf %569, %570 : vector<8x128xf32>
    %572 = vector.extract_strided_slice %565 {offsets = [0, 128], sizes = [8, 128], strides = [1, 1]} : vector<8x512xf32> to vector<8x128xf32>
    %573 = arith.negf %572 : vector<8x128xf32>
    %574 = math.exp %573 : vector<8x128xf32>
    %cst_203 = arith.constant 1.000000e+00 : f32
    %575 = vector.broadcast %cst_203 : f32 to vector<8x128xf32>
    %576 = arith.addf %575, %574 : vector<8x128xf32>
    %577 = arith.divf %575, %576 : vector<8x128xf32>
    %578 = vector.extract_strided_slice %565 {offsets = [0, 256], sizes = [8, 128], strides = [1, 1]} : vector<8x512xf32> to vector<8x128xf32>
    %579 = math.tanh %578 : vector<8x128xf32>
    %580 = vector.extract_strided_slice %565 {offsets = [0, 384], sizes = [8, 128], strides = [1, 1]} : vector<8x512xf32> to vector<8x128xf32>
    %581 = arith.negf %580 : vector<8x128xf32>
    %582 = math.exp %581 : vector<8x128xf32>
    %cst_204 = arith.constant 1.000000e+00 : f32
    %583 = vector.broadcast %cst_204 : f32 to vector<8x128xf32>
    %584 = arith.addf %583, %582 : vector<8x128xf32>
    %585 = arith.divf %583, %584 : vector<8x128xf32>
    %586 = arith.mulf %577, %553 : vector<8x128xf32>
    %587 = arith.mulf %571, %579 : vector<8x128xf32>
    %588 = arith.addf %586, %587 : vector<8x128xf32>
    %589 = math.tanh %588 : vector<8x128xf32>
    %590 = arith.mulf %585, %589 : vector<8x128xf32>
    %591 = arith.index_cast %c7_i32_196 : i32 to index
    %c0_205 = arith.constant 0 : index
    %c0_206 = arith.constant 0 : index
    %592 = vector.load %arg15[%591, %c0_205, %c0_206] : memref<8x8x128xf32, #tpu.memory_space<vmem>>, vector<1x8x128xf32>
    %593 = vector.shape_cast %592 : vector<1x8x128xf32> to vector<8x128xf32>
    %594 = vector.shape_cast %590 : vector<8x128xf32> to vector<1x8x128xf32>
    tpu.vector_store %arg15[%591, %c0_205, %c0_206], %594 {strides = array<i32>} : memref<8x8x128xf32, #tpu.memory_space<vmem>>, vector<1x8x128xf32>,
    %c8_i32_207 = arith.constant 8 : i32
    %c1_208 = arith.constant 1 : index
    %c0_209 = arith.constant 0 : index
    %c0_210 = arith.constant 0 : index
    %595 = vector.load %arg12[%c1_208, %c0_209, %c0_210] : memref<2x8x128xf32, #tpu.memory_space<vmem>>, vector<1x8x128xf32>
    %596 = vector.shape_cast %595 : vector<1x8x128xf32> to vector<8x128xf32>
    %597 = vector.shape_cast %590 : vector<8x128xf32> to vector<1x8x128xf32>
    tpu.vector_store %arg12[%c1_208, %c0_209, %c0_210], %597 {strides = array<i32>} : memref<2x8x128xf32, #tpu.memory_space<vmem>>, vector<1x8x128xf32>,
    %c1_211 = arith.constant 1 : index
    %c0_212 = arith.constant 0 : index
    %c0_213 = arith.constant 0 : index
    %598 = vector.load %arg13[%c1_211, %c0_212, %c0_213] : memref<2x8x128xf32, #tpu.memory_space<vmem>>, vector<1x8x128xf32>
    %599 = vector.shape_cast %598 : vector<1x8x128xf32> to vector<8x128xf32>
    %600 = vector.shape_cast %588 : vector<8x128xf32> to vector<1x8x128xf32>
    tpu.vector_store %arg13[%c1_211, %c0_212, %c0_213], %600 {strides = array<i32>} : memref<2x8x128xf32, #tpu.memory_space<vmem>>, vector<1x8x128xf32>,
    %c0_i32_214 = arith.constant 0 : i32
    %601 = arith.cmpi eq, %arg1, %c0_i32_214 : i32
    %602 = arith.extui %601 : i1 to i32
    %c0_i32_215 = arith.constant 0 : i32
    %603 = arith.cmpi ne, %602, %c0_i32_215 : i32
    scf.if %603 {
      %c7 = arith.constant 7 : index
      %c0_216 = arith.constant 0 : index
      %c0_217 = arith.constant 0 : index
      %604 = vector.load %arg15[%c7, %c0_216, %c0_217] : memref<8x8x128xf32, #tpu.memory_space<vmem>>, vector<1x8x128xf32>
      %605 = vector.shape_cast %604 : vector<1x8x128xf32> to vector<8x128xf32>
      %c0_218 = arith.constant 0 : index
      %c0_219 = arith.constant 0 : index
      %606 = vector.load %arg9[%c0_218, %c0_219] : memref<128x128xf32, #tpu.memory_space<vmem>>, vector<128x128xf32>
      %cst_220 = arith.constant dense<0.000000e+00> : vector<8x128xf32>
      %607 = tpu.matmul %605, %606, %cst_220 {dimension_numbers = #tpu.dot_dimension_numbers<[1], [0], [0], [1], [0, 0, 1, 1], [], []>} : vector<8x128xf32>, vector<128x128xf32>, vector<8x128xf32> -> vector<8x128xf32>
      %c0_221 = arith.constant 0 : index
      %c0_222 = arith.constant 0 : index
      %608 = vector.load %arg10[%c0_221, %c0_222] : memref<1x128xf32, #tpu.memory_space<vmem>>, vector<1x128xf32>
      %609 = vector.broadcast %608 : vector<1x128xf32> to vector<8x128xf32>
      %610 = arith.addf %607, %609 : vector<8x128xf32>
      %c0_223 = arith.constant 0 : index
      %c0_224 = arith.constant 0 : index
      %611 = vector.load %arg11[%c0_223, %c0_224] : memref<8x128xf32, #tpu.memory_space<vmem>>, vector<8x128xf32>
      tpu.vector_store %arg11[%c0_223, %c0_224], %610 {strides = array<i32>} : memref<8x128xf32, #tpu.memory_space<vmem>>, vector<8x128xf32>,
    } else {
    }
    return
  }
  func.func @transform_0(%arg0: i32, %arg1: i32) -> (i32, i32, i32) {
    %c0_i32 = arith.constant 0 : i32
    %c0_i32_0 = arith.constant 0 : i32
    return %arg1, %arg0, %c0_i32 : i32, i32, i32
  }
  func.func @transform_1(%arg0: i32, %arg1: i32) -> (i32, i32) {
    %c0_i32 = arith.constant 0 : i32
    %c0_i32_0 = arith.constant 0 : i32
    %c0_i32_1 = arith.constant 0 : i32
    return %c0_i32, %c0_i32_0 : i32, i32
  }
  func.func @transform_2(%arg0: i32, %arg1: i32) -> (i32, i32) {
    %c0_i32 = arith.constant 0 : i32
    %c0_i32_0 = arith.constant 0 : i32
    %c0_i32_1 = arith.constant 0 : i32
    return %c0_i32, %c0_i32_0 : i32, i32
  }
  func.func @transform_3(%arg0: i32, %arg1: i32) -> (i32, i32) {
    %c0_i32 = arith.constant 0 : i32
    %c0_i32_0 = arith.constant 0 : i32
    %c0_i32_1 = arith.constant 0 : i32
    return %c0_i32, %c0_i32_0 : i32, i32
  }
  func.func @transform_4(%arg0: i32, %arg1: i32) -> (i32, i32) {
    %c0_i32 = arith.constant 0 : i32
    %c0_i32_0 = arith.constant 0 : i32
    %c0_i32_1 = arith.constant 0 : i32
    return %c0_i32, %c0_i32_0 : i32, i32
  }
  func.func @transform_5(%arg0: i32, %arg1: i32) -> (i32, i32) {
    %c0_i32 = arith.constant 0 : i32
    %c0_i32_0 = arith.constant 0 : i32
    %c0_i32_1 = arith.constant 0 : i32
    return %c0_i32, %c0_i32_0 : i32, i32
  }
  func.func @transform_6(%arg0: i32, %arg1: i32) -> (i32, i32) {
    %c0_i32 = arith.constant 0 : i32
    %c0_i32_0 = arith.constant 0 : i32
    %c0_i32_1 = arith.constant 0 : i32
    return %c0_i32, %c0_i32_0 : i32, i32
  }
  func.func @transform_7(%arg0: i32, %arg1: i32) -> (i32, i32) {
    %c0_i32 = arith.constant 0 : i32
    %c0_i32_0 = arith.constant 0 : i32
    %c0_i32_1 = arith.constant 0 : i32
    return %c0_i32, %c0_i32_0 : i32, i32
  }
  func.func @transform_8(%arg0: i32, %arg1: i32) -> (i32, i32) {
    %c0_i32 = arith.constant 0 : i32
    %c0_i32_0 = arith.constant 0 : i32
    %c0_i32_1 = arith.constant 0 : i32
    return %c0_i32, %c0_i32_0 : i32, i32
  }
  func.func @transform_9(%arg0: i32, %arg1: i32) -> (i32, i32) {
    %c0_i32 = arith.constant 0 : i32
    %c0_i32_0 = arith.constant 0 : i32
    return %arg0, %c0_i32 : i32, i32
  }
}

</mosaic_0001>

<bundles_post_ra>
// kernel: lstm_chem_forward.1
= control target key start
LH: loop header
LB: loop body
LE: loop exit
PB: predicated region body
PF: predicated region fallthrough
CT: control target
= control target key end

     0   :  { %v8524_v3 = vmov 0.0   ;;  %vm5054_vm0 = vmmov 0   ;;  %s8514_s1 = inlined_call_operand.vmem [shape: f32[128,512], index: 1, kind: input, shape index: {}]   ;;  %s8515_s0 = inlined_call_operand.vmem [shape: f32[8,8,128], index: 0, kind: input, shape index: {}]   ;;  %s8516_s2 = inlined_call_operand.vmem [shape: f32[128,512], index: 2, kind: input, shape index: {}]   ;;  %s8517_s3 = inlined_call_operand.vmem [shape: f32[1,512], index: 3, kind: input, shape index: {}]   ;;  %s8518_s4 = inlined_call_operand.vmem [shape: f32[128,512], index: 4, kind: input, shape index: {}]   ;;  %s8519_s5 = inlined_call_operand.vmem [shape: f32[128,512], index: 5, kind: input, shape index: {}]   ;;  %s8520_s6 = inlined_call_operand.vmem [shape: f32[1,512], index: 6, kind: input, shape index: {}]   ;;  %s8521_s7 = inlined_call_operand.vmem [shape: f32[128,128], index: 7, kind: input, shape index: {}]   ;;  %s8522_s8 = inlined_call_operand.vmem [shape: f32[1,128], index: 8, kind: input, shape index: {}]   ;;  %s8523_s9 = inlined_call_operand.vmem [shape: f32[8,128], index: 9, kind: output, shape index: {}]  }
   0x1   :  { %v109_v0 = vld [vmem:[%s8514_s1 + $0x1e8] sm:$0xff]  ;;  %v111_v1 = vld [vmem:[%s8514_s1 + $0x1f8] sm:$0xff]  ;;  %v108_v2 = vld [vmem:[%s8514_s1 + $0x1e0] sm:$0xff]  ;;  %198 = vmatprep.mubr.f32.mxu0 %v8524_v3  ;;  %311 = vmatprep.mubr.f32.mxu1 %v8524_v3 }
   0x2   :  { %134 = vmatprep.subr.mxu0 %v109_v0  ;;  %247 = vmatprep.subr.mxu1 %v111_v1  ;;  %v110_v4 = vld [vmem:[%s8514_s1 + $0x1f0] sm:$0xff]  ;;  %v105_v5 = vld [vmem:[%s8514_s1 + $0x1c8] sm:$0xff]  ;;  %v107_v6 = vld [vmem:[%s8514_s1 + $0x1d8] sm:$0xff] }
   0x3   :  { %135 = vmatpush1.msra.mxu0 %v108_v2  ;;  %248 = vmatpush1.msra.mxu1 %v110_v4  ;;  %v104_v7 = vld [vmem:[%s8514_s1 + $0x1c0] sm:$0xff]  ;;  %v106_v8 = vld [vmem:[%s8514_s1 + $0x1d0] sm:$0xff]  ;;  %v101_v9 = vld [vmem:[%s8514_s1 + $0x1a8] sm:$0xff] }
   0x4   :  { %136 = vmatprep.subr.mxu0 %v105_v5  ;;  %249 = vmatprep.subr.mxu1 %v107_v6  ;;  %v103_v10 = vld [vmem:[%s8514_s1 + $0x1b8] sm:$0xff]  ;;  %v100_v11 = vld [vmem:[%s8514_s1 + $0x1a0] sm:$0xff]  ;;  %v102_v12 = vld [vmem:[%s8514_s1 + $0x1b0] sm:$0xff] }
   0x5   :  { %137 = vmatpush1.msra.mxu0 %v104_v7  ;;  %250 = vmatpush1.msra.mxu1 %v106_v8  ;;  %v97_v13 = vld [vmem:[%s8514_s1 + $0x188] sm:$0xff]  ;;  %v99_v14 = vld [vmem:[%s8514_s1 + $0x198] sm:$0xff]  ;;  %v96_v15 = vld [vmem:[%s8514_s1 + $0x180] sm:$0xff] }
   0x6   :  { %138 = vmatprep.subr.mxu0 %v101_v9  ;;  %251 = vmatprep.subr.mxu1 %v103_v10  ;;  %v98_v16 = vld [vmem:[%s8514_s1 + $0x190] sm:$0xff]  ;;  %v93_v17 = vld [vmem:[%s8514_s1 + $0x168] sm:$0xff]  ;;  %v95_v18 = vld [vmem:[%s8514_s1 + $0x178] sm:$0xff] }
   0x7   :  { %139 = vmatpush1.msra.mxu0 %v100_v11  ;;  %252 = vmatpush1.msra.mxu1 %v102_v12  ;;  %v92_v19 = vld [vmem:[%s8514_s1 + $0x160] sm:$0xff]  ;;  %v94_v20 = vld [vmem:[%s8514_s1 + $0x170] sm:$0xff]  ;;  %v89_v21 = vld [vmem:[%s8514_s1 + $0x148] sm:$0xff] }
   0x8   :  { %140 = vmatprep.subr.mxu0 %v97_v13  ;;  %253 = vmatprep.subr.mxu1 %v99_v14  ;;  %v91_v22 = vld [vmem:[%s8514_s1 + $0x158] sm:$0xff]  ;;  %v88_v23 = vld [vmem:[%s8514_s1 + $0x140] sm:$0xff]  ;;  %v90_v24 = vld [vmem:[%s8514_s1 + $0x150] sm:$0xff] }
   0x9   :  { %141 = vmatpush1.msra.mxu0 %v96_v15  ;;  %254 = vmatpush1.msra.mxu1 %v98_v16  ;;  %v85_v25 = vld [vmem:[%s8514_s1 + $0x128] sm:$0xff]  ;;  %v87_v26 = vld [vmem:[%s8514_s1 + $0x138] sm:$0xff]  ;;  %v84_v27 = vld [vmem:[%s8514_s1 + $0x120] sm:$0xff] }
   0xa   :  { %142 = vmatprep.subr.mxu0 %v93_v17  ;;  %255 = vmatprep.subr.mxu1 %v95_v18  ;;  %v86_v28 = vld [vmem:[%s8514_s1 + $0x130] sm:$0xff]  ;;  %v81_v29 = vld [vmem:[%s8514_s1 + $0x108] sm:$0xff]  ;;  %v83_v30 = vld [vmem:[%s8514_s1 + $0x118] sm:$0xff] }
   0xb   :  { %143 = vmatpush1.msra.mxu0 %v92_v19  ;;  %256 = vmatpush1.msra.mxu1 %v94_v20  ;;  %v80_v31 = vld [vmem:[%s8514_s1 + $0x100] sm:$0xff]  ;;  %v82_v32 = vld [vmem:[%s8514_s1 + $0x110] sm:$0xff]  ;;  %v77_v33 = vld [vmem:[%s8514_s1 + $0xe8] sm:$0xff] }
   0xc   :  { %144 = vmatprep.subr.mxu0 %v89_v21  ;;  %257 = vmatprep.subr.mxu1 %v91_v22  ;;  %v79_v34 = vld [vmem:[%s8514_s1 + $0xf8] sm:$0xff]  ;;  %v76_v35 = vld [vmem:[%s8514_s1 + $0xe0] sm:$0xff]  ;;  %v78_v36 = vld [vmem:[%s8514_s1 + $0xf0] sm:$0xff] }
   0xd   :  { %145 = vmatpush1.msra.mxu0 %v88_v23  ;;  %258 = vmatpush1.msra.mxu1 %v90_v24  ;;  %v73_v37 = vld [vmem:[%s8514_s1 + $0xc8] sm:$0xff]  ;;  %v75_v38 = vld [vmem:[%s8514_s1 + $0xd8] sm:$0xff]  ;;  %v72_v39 = vld [vmem:[%s8514_s1 + $0xc0] sm:$0xff] }
   0xe   :  { %146 = vmatprep.subr.mxu0 %v85_v25  ;;  %259 = vmatprep.subr.mxu1 %v87_v26  ;;  %v74_v40 = vld [vmem:[%s8514_s1 + $0xd0] sm:$0xff]  ;;  %v69_v41 = vld [vmem:[%s8514_s1 + $0xa8] sm:$0xff]  ;;  %v71_v42 = vld [vmem:[%s8514_s1 + $0xb8] sm:$0xff] }
   0xf   :  { %147 = vmatpush1.msra.mxu0 %v84_v27  ;;  %260 = vmatpush1.msra.mxu1 %v86_v28  ;;  %v68_v43 = vld [vmem:[%s8514_s1 + $0xa0] sm:$0xff]  ;;  %v70_v44 = vld [vmem:[%s8514_s1 + $0xb0] sm:$0xff]  ;;  %v65_v45 = vld [vmem:[%s8514_s1 + $0x88] sm:$0xff] }
  0x10   :  { %148 = vmatprep.subr.mxu0 %v81_v29  ;;  %261 = vmatprep.subr.mxu1 %v83_v30  ;;  %v67_v46 = vld [vmem:[%s8514_s1 + $0x98] sm:$0xff]  ;;  %v64_v47 = vld [vmem:[%s8514_s1 + $0x80] sm:$0xff]  ;;  %v66_v48 = vld [vmem:[%s8514_s1 + $0x90] sm:$0xff] }
  0x11   :  { %149 = vmatpush1.msra.mxu0 %v80_v31  ;;  %262 = vmatpush1.msra.mxu1 %v82_v32  ;;  %v61_v49 = vld [vmem:[%s8514_s1 + $0x68] sm:$0xff]  ;;  %v63_v50 = vld [vmem:[%s8514_s1 + $0x78] sm:$0xff]  ;;  %v60_v51 = vld [vmem:[%s8514_s1 + $0x60] sm:$0xff] }
  0x12   :  { %150 = vmatprep.subr.mxu0 %v77_v33  ;;  %263 = vmatprep.subr.mxu1 %v79_v34  ;;  %v62_v52 = vld [vmem:[%s8514_s1 + $0x70] sm:$0xff]  ;;  %v57_v53 = vld [vmem:[%s8514_s1 + $0x48] sm:$0xff]  ;;  %v59_v54 = vld [vmem:[%s8514_s1 + $0x58] sm:$0xff] }
  0x13   :  { %151 = vmatpush1.msra.mxu0 %v76_v35  ;;  %264 = vmatpush1.msra.mxu1 %v78_v36  ;;  %v56_v55 = vld [vmem:[%s8514_s1 + $0x40] sm:$0xff]  ;;  %v58_v56 = vld [vmem:[%s8514_s1 + $0x50] sm:$0xff]  ;;  %v53_v57 = vld [vmem:[%s8514_s1 + $0x28] sm:$0xff] }
  0x14   :  { %152 = vmatprep.subr.mxu0 %v73_v37  ;;  %265 = vmatprep.subr.mxu1 %v75_v38  ;;  %v55_v58 = vld [vmem:[%s8514_s1 + $0x38] sm:$0xff]  ;;  %v52_v59 = vld [vmem:[%s8514_s1 + $0x20] sm:$0xff]  ;;  %v54_v60 = vld [vmem:[%s8514_s1 + $0x30] sm:$0xff] }
  0x15   :  { %153 = vmatpush1.msra.mxu0 %v72_v39  ;;  %266 = vmatpush1.msra.mxu1 %v74_v40  ;;  %v49_v61 = vld [vmem:[%s8514_s1 + $0x8] sm:$0xff]  ;;  %v51_v62 = vld [vmem:[%s8514_s1 + $0x18] sm:$0xff]  ;;  %v48_v63 = vld [vmem:[%s8514_s1] sm:$0xff] }
  0x16   :  { %154 = vmatprep.subr.mxu0 %v69_v41  ;;  %267 = vmatprep.subr.mxu1 %v71_v42  ;;  %v50_v0 = vld [vmem:[%s8514_s1 + $0x10] sm:$0xff]  ;;  %v40_v1 = vld [vmem:[%s8515_s0] sm:$0xff]  ;;  %v5305_v2 = vld [vmem:[%s8516_s2 + $0x1e8] sm:$0xff] }
  0x17   :  { %155 = vmatpush1.msra.mxu0 %v68_v43  ;;  %268 = vmatpush1.msra.mxu1 %v70_v44  ;;  %v5310_v4 = vld [vmem:[%s8516_s2 + $0x1f8] sm:$0xff]  ;;  %v5315_v5 = vld [vmem:[%s8516_s2 + $0x1e0] sm:$0xff]  ;;  %v5320_v6 = vld [vmem:[%s8516_s2 + $0x1f0] sm:$0xff] }
  0x18   :  { %156 = vmatprep.subr.mxu0 %v65_v45  ;;  %269 = vmatprep.subr.mxu1 %v67_v46  ;;  %v5325_v7 = vld [vmem:[%s8516_s2 + $0x1c8] sm:$0xff]  ;;  %v5330_v8 = vld [vmem:[%s8516_s2 + $0x1d8] sm:$0xff]  ;;  %v5339_v9 = vld [vmem:[%s8516_s2 + $0x1c0] sm:$0xff] }
  0x19   :  { %157 = vmatpush1.msra.mxu0 %v64_v47  ;;  %270 = vmatpush1.msra.mxu1 %v66_v48  ;;  %v5344_v10 = vld [vmem:[%s8516_s2 + $0x1d0] sm:$0xff]  ;;  %v41_v11 = vld [vmem:[%s8515_s0 + $0x8] sm:$0xff]  ;;  %v5361_v13 = vld [vmem:[%s8516_s2 + $0x1b8] sm:$0xff] }
  0x1a   :  { %158 = vmatprep.subr.mxu0 %v61_v49  ;;  %271 = vmatprep.subr.mxu1 %v63_v50  ;;  %v5356_v12 = vld [vmem:[%s8516_s2 + $0x1a8] sm:$0xff]  ;;  %v5368_v14 = vld [vmem:[%s8516_s2 + $0x1a0] sm:$0xff]  ;;  %v5373_v15 = vld [vmem:[%s8516_s2 + $0x1b0] sm:$0xff] }
  0x1b   :  { %159 = vmatpush1.msra.mxu0 %v60_v51  ;;  %272 = vmatpush1.msra.mxu1 %v62_v52  ;;  %v5378_v16 = vld [vmem:[%s8516_s2 + $0x188] sm:$0xff]  ;;  %v5383_v17 = vld [vmem:[%s8516_s2 + $0x198] sm:$0xff]  ;;  %v5392_v18 = vld [vmem:[%s8516_s2 + $0x180] sm:$0xff] }
  0x1c   :  { %160 = vmatprep.subr.mxu0 %v57_v53  ;;  %273 = vmatprep.subr.mxu1 %v59_v54  ;;  %v5397_v19 = vld [vmem:[%s8516_s2 + $0x190] sm:$0xff]  ;;  %v5409_v21 = vld [vmem:[%s8516_s2 + $0x168] sm:$0xff]  ;;  %v5414_v22 = vld [vmem:[%s8516_s2 + $0x178] sm:$0xff] }
  0x1d   :  { %161 = vmatpush1.msra.mxu0 %v56_v55  ;;  %274 = vmatpush1.msra.mxu1 %v58_v56  ;;  %v42_v20 = vld [vmem:[%s8515_s0 + $0x10] sm:$0xff]  ;;  %v5421_v23 = vld [vmem:[%s8516_s2 + $0x160] sm:$0xff]  ;;  %v5431_v25 = vld [vmem:[%s8516_s2 + $0x148] sm:$0xff] }
  0x1e   :  { %162 = vmatprep.subr.mxu0 %v53_v57  ;;  %275 = vmatprep.subr.mxu1 %v55_v58  ;;  %v5426_v24 = vld [vmem:[%s8516_s2 + $0x170] sm:$0xff]  ;;  %v5436_v26 = vld [vmem:[%s8516_s2 + $0x158] sm:$0xff]  ;;  %v5445_v27 = vld [vmem:[%s8516_s2 + $0x140] sm:$0xff] }
  0x1f   :  { %163 = vmatpush1.msra.mxu0 %v52_v59  ;;  %276 = vmatpush1.msra.mxu1 %v54_v60  ;;  %v5450_v28 = vld [vmem:[%s8516_s2 + $0x150] sm:$0xff]  ;;  %v43_v29 = vld [vmem:[%s8515_s0 + $0x18] sm:$0xff]  ;;  %v5462_v30 = vld [vmem:[%s8516_s2 + $0x128] sm:$0xff] }
  0x20   :  { %164 = vmatprep.subr.mxu0 %v49_v61  ;;  %277 = vmatprep.subr.mxu1 %v51_v62  ;;  %v5467_v31 = vld [vmem:[%s8516_s2 + $0x138] sm:$0xff]  ;;  %v5474_v32 = vld [vmem:[%s8516_s2 + $0x120] sm:$0xff]  ;;  %v5479_v33 = vld [vmem:[%s8516_s2 + $0x130] sm:$0xff] }
  0x21   :  { %165 = vmatpush1.msra.mxu0 %v48_v63  ;;  %278 = vmatpush1.msra.mxu1 %v50_v0  ;;  %v5484_v34 = vld [vmem:[%s8516_s2 + $0x108] sm:$0xff]  ;;  %v5489_v35 = vld [vmem:[%s8516_s2 + $0x118] sm:$0xff]  ;;  %v5498_v36 = vld [vmem:[%s8516_s2 + $0x100] sm:$0xff] }
  0x22   :  { %199 = vmatmul.mubr.f32.vlgmr.msra.gmra.mxu0 %v40_v1  ;;  %312 = vmatmul.mubr.f32.vlgmr.msra.gmra.mxu1 %v40_v1  ;;  %v5503_v37 = vld [vmem:[%s8516_s2 + $0x110] sm:$0xff]  ;;  %v44_v38 = vld [vmem:[%s8515_s0 + $0x20] sm:$0xff]  ;;  %v5515_v39 = vld [vmem:[%s8516_s2 + $0xe8] sm:$0xff] }
  0x23   :  { %462 = vmatprep.subr.mxu0 %v5305_v2  ;;  %533 = vmatprep.subr.mxu1 %v5310_v4  ;;  %v5520_v40 = vld [vmem:[%s8516_s2 + $0xf8] sm:$0xff]  ;;  %v5527_v41 = vld [vmem:[%s8516_s2 + $0xe0] sm:$0xff]  ;;  %v5532_v42 = vld [vmem:[%s8516_s2 + $0xf0] sm:$0xff] }
  0x24   :  { %463 = vmatpush1.msra.mxu0 %v5315_v5  ;;  %534 = vmatpush1.msra.mxu1 %v5320_v6  ;;  %v5537_v43 = vld [vmem:[%s8516_s2 + $0xc8] sm:$0xff]  ;;  %v5542_v44 = vld [vmem:[%s8516_s2 + $0xd8] sm:$0xff]  ;;  %v5551_v45 = vld [vmem:[%s8516_s2 + $0xc0] sm:$0xff] }
  0x25   :  { %464 = vmatprep.subr.mxu0 %v5325_v7  ;;  %535 = vmatprep.subr.mxu1 %v5330_v8  ;;  %v5556_v46 = vld [vmem:[%s8516_s2 + $0xd0] sm:$0xff]  ;;  %v45_v47 = vld [vmem:[%s8515_s0 + $0x28] sm:$0xff]  ;;  %v5573_v49 = vld [vmem:[%s8516_s2 + $0xb8] sm:$0xff] }
  0x26   :  { %204 = vmatprep.mubr.f32.mxu0 %v8524_v3  ;;  %317 = vmatprep.mubr.f32.mxu1 %v8524_v3  ;;  %v5568_v48 = vld [vmem:[%s8516_s2 + $0xa8] sm:$0xff]  ;;  %v5580_v50 = vld [vmem:[%s8516_s2 + $0xa0] sm:$0xff]  ;;  %v5585_v51 = vld [vmem:[%s8516_s2 + $0xb0] sm:$0xff] }
  0x27   :  { %465 = vmatpush1.msra.mxu0 %v5339_v9  ;;  %536 = vmatpush1.msra.mxu1 %v5344_v10  ;;  %8708 = vst [vmem:[#allocation6_spill] sm:$0xff] %v5585_v51  ;;  %v5590_v52 = vld [vmem:[%s8516_s2 + $0x88] sm:$0xff]  ;;  %v5595_v53 = vld [vmem:[%s8516_s2 + $0x98] sm:$0xff]  ;;  %v5604_v54 = vld [vmem:[%s8516_s2 + $0x80] sm:$0xff] }
  0x28   :  { %205 = vmatmul.mubr.f32.gmra.mxu0 %v41_v11  ;;  %318 = vmatmul.mubr.f32.gmra.mxu1 %v41_v11  ;;  %8709 = vst [vmem:[#allocation7_spill] sm:$0xff] %v5590_v52  ;;  %8710 = vst [vmem:[#allocation8_spill] sm:$0xff] %v5595_v53  ;;  %v5609_v55 = vld [vmem:[%s8516_s2 + $0x90] sm:$0xff]  ;;  %v5621_v57 = vld [vmem:[%s8516_s2 + $0x68] sm:$0xff] }
  0x29   :  { %466 = vmatprep.subr.mxu0 %v5356_v12  ;;  %537 = vmatprep.subr.mxu1 %v5361_v13  ;;  %8711 = vst [vmem:[#allocation9_spill] sm:$0xff] %v5604_v54  ;;  %8712 = vst [vmem:[#allocation10_spill] sm:$0xff] %v5609_v55  ;;  %v46_v56 = vld [vmem:[%s8515_s0 + $0x30] sm:$0xff]  ;;  %v5626_v58 = vld [vmem:[%s8516_s2 + $0x78] sm:$0xff] }
  0x2a   :  { %467 = vmatpush1.msra.mxu0 %v5368_v14  ;;  %538 = vmatpush1.msra.mxu1 %v5373_v15  ;;  %8713 = vst [vmem:[#allocation11_spill] sm:$0xff] %v5621_v57  ;;  %8714 = vst [vmem:[#allocation12_spill] sm:$0xff] %v5626_v58  ;;  %v5633_v59 = vld [vmem:[%s8516_s2 + $0x60] sm:$0xff]  ;;  %v5638_v60 = vld [vmem:[%s8516_s2 + $0x70] sm:$0xff] }
  0x2b   :  { %468 = vmatprep.subr.mxu0 %v5378_v16  ;;  %539 = vmatprep.subr.mxu1 %v5383_v17  ;;  %8715 = vst [vmem:[#allocation13_spill] sm:$0xff] %v5633_v59  ;;  %8716 = vst [vmem:[#allocation14_spill] sm:$0xff] %v5638_v60  ;;  %v5643_v61 = vld [vmem:[%s8516_s2 + $0x48] sm:$0xff]  ;;  %v5648_v62 = vld [vmem:[%s8516_s2 + $0x58] sm:$0xff] }
  0x2c   :  { %210 = vmatprep.mubr.f32.mxu0 %v8524_v3  ;;  %323 = vmatprep.mubr.f32.mxu1 %v8524_v3  ;;  %8717 = vst [vmem:[#allocation15_spill] sm:$0xff] %v5643_v61  ;;  %8718 = vst [vmem:[#allocation16_spill] sm:$0xff] %v5648_v62  ;;  %v5657_v63 = vld [vmem:[%s8516_s2 + $0x40] sm:$0xff]  ;;  %v5662_v0 = vld [vmem:[%s8516_s2 + $0x50] sm:$0xff] }
  0x2d   :  { %469 = vmatpush1.msra.mxu0 %v5392_v18  ;;  %540 = vmatpush1.msra.mxu1 %v5397_v19  ;;  %8719 = vst [vmem:[#allocation17_spill] sm:$0xff] %v5657_v63  ;;  %8720 = vst [vmem:[#allocation18_spill] sm:$0xff] %v5662_v0  ;;  %v47_v1 = vld [vmem:[%s8515_s0 + $0x38] sm:$0xff]  ;;  %v5674_v11 = vld [vmem:[%s8516_s2 + $0x28] sm:$0xff] }
  0x2e   :  { %211 = vmatmul.mubr.f32.gmra.mxu0 %v42_v20  ;;  %324 = vmatmul.mubr.f32.gmra.mxu1 %v42_v20  ;;  %8721 = vst [vmem:[#allocation19_spill] sm:$0xff] %v5674_v11  ;;  %v5679_v20 = vld [vmem:[%s8516_s2 + $0x38] sm:$0xff] }
  0x2f   :  { %470 = vmatprep.subr.mxu0 %v5409_v21  ;;  %541 = vmatprep.subr.mxu1 %v5414_v22  ;;  %8722 = vst [vmem:[#allocation20_spill] sm:$0xff] %v5679_v20 }
  0x30   :  { %471 = vmatpush1.msra.mxu0 %v5421_v23  ;;  %542 = vmatpush1.msra.mxu1 %v5426_v24 }
  0x31   :  { %472 = vmatprep.subr.mxu0 %v5431_v25  ;;  %543 = vmatprep.subr.mxu1 %v5436_v26 }
  0x32   :  { %216 = vmatprep.mubr.f32.mxu0 %v8524_v3  ;;  %329 = vmatprep.mubr.f32.mxu1 %v8524_v3 }
  0x33   :  { %473 = vmatpush1.msra.mxu0 %v5445_v27  ;;  %544 = vmatpush1.msra.mxu1 %v5450_v28 }
  0x34   :  { %217 = vmatmul.mubr.f32.gmra.mxu0 %v43_v29  ;;  %330 = vmatmul.mubr.f32.gmra.mxu1 %v43_v29  ;;  %v5686_v29 = vld [vmem:[%s8516_s2 + $0x20] sm:$0xff] }
  0x35   :  { %474 = vmatprep.subr.mxu0 %v5462_v30  ;;  %545 = vmatprep.subr.mxu1 %v5467_v31  ;;  %8723 = vst [vmem:[#allocation21_spill] sm:$0xff] %v5686_v29 }
  0x36   :  { %475 = vmatpush1.msra.mxu0 %v5474_v32  ;;  %546 = vmatpush1.msra.mxu1 %v5479_v33 }
  0x37   :  { %476 = vmatprep.subr.mxu0 %v5484_v34  ;;  %547 = vmatprep.subr.mxu1 %v5489_v35 }
  0x38   :  { %222 = vmatprep.mubr.f32.mxu0 %v8524_v3  ;;  %335 = vmatprep.mubr.f32.mxu1 %v8524_v3 }
  0x39   :  { %477 = vmatpush1.msra.mxu0 %v5498_v36  ;;  %548 = vmatpush1.msra.mxu1 %v5503_v37 }
  0x3a   :  { %223 = vmatmul.mubr.f32.gmra.mxu0 %v44_v38  ;;  %336 = vmatmul.mubr.f32.gmra.mxu1 %v44_v38  ;;  %v5691_v38 = vld [vmem:[%s8516_s2 + $0x30] sm:$0xff] }
  0x3b   :  { %478 = vmatprep.subr.mxu0 %v5515_v39  ;;  %549 = vmatprep.subr.mxu1 %v5520_v40  ;;  %8724 = vst [vmem:[#allocation22_spill] sm:$0xff] %v5691_v38 }
  0x3c   :  { %479 = vmatpush1.msra.mxu0 %v5527_v41  ;;  %550 = vmatpush1.msra.mxu1 %v5532_v42 }
  0x3d   :  { %480 = vmatprep.subr.mxu0 %v5537_v43  ;;  %551 = vmatprep.subr.mxu1 %v5542_v44 }
  0x3e   :  { %228 = vmatprep.mubr.f32.mxu0 %v8524_v3  ;;  %341 = vmatprep.mubr.f32.mxu1 %v8524_v3 }
  0x3f   :  { %481 = vmatpush1.msra.mxu0 %v5551_v45  ;;  %552 = vmatpush1.msra.mxu1 %v5556_v46 }
  0x40   :  { %229 = vmatmul.mubr.f32.gmra.mxu0 %v45_v47  ;;  %342 = vmatmul.mubr.f32.gmra.mxu1 %v45_v47  ;;  %v5696_v47 = vld [vmem:[%s8516_s2 + $0x8] sm:$0xff] }
  0x41   :  { %482 = vmatprep.subr.mxu0 %v5568_v48  ;;  %553 = vmatprep.subr.mxu1 %v5573_v49  ;;  %8725 = vst [vmem:[#allocation23_spill] sm:$0xff] %v5696_v47 }
  0x42   :  { %483 = vmatpush1.msra.mxu0 %v5580_v50  ;;  %554 = vmatpush1.msra.mxu1 %v5585_v51 }
  0x43   :  { %484 = vmatprep.subr.mxu0 %v5590_v52  ;;  %555 = vmatprep.subr.mxu1 %v5595_v53 }
  0x44   :  { %234 = vmatprep.mubr.f32.mxu0 %v8524_v3  ;;  %347 = vmatprep.mubr.f32.mxu1 %v8524_v3 }
  0x45   :  { %485 = vmatpush1.msra.mxu0 %v5604_v54  ;;  %556 = vmatpush1.msra.mxu1 %v5609_v55 }
  0x46   :  { %235 = vmatmul.mubr.f32.gmra.mxu0 %v46_v56  ;;  %348 = vmatmul.mubr.f32.gmra.mxu1 %v46_v56  ;;  %v5701_v56 = vld [vmem:[%s8516_s2 + $0x18] sm:$0xff] }
  0x47   :  { %486 = vmatprep.subr.mxu0 %v5621_v57  ;;  %557 = vmatprep.subr.mxu1 %v5626_v58  ;;  %8726 = vst [vmem:[#allocation24_spill] sm:$0xff] %v5701_v56 }
  0x48   :  { %487 = vmatpush1.msra.mxu0 %v5633_v59  ;;  %558 = vmatpush1.msra.mxu1 %v5638_v60 }
  0x49   :  { %488 = vmatprep.subr.mxu0 %v5643_v61  ;;  %559 = vmatprep.subr.mxu1 %v5648_v62 }
  0x4a   :  { %240 = vmatprep.mubr.f32.mxu0 %v8524_v3  ;;  %353 = vmatprep.mubr.f32.mxu1 %v8524_v3  ;;  %v5708_v3 = vld [vmem:[%s8516_s2] sm:$0xff] }
  0x4b   :  { %489 = vmatpush1.msra.mxu0 %v5657_v63  ;;  %560 = vmatpush1.msra.mxu1 %v5662_v0  ;;  %8727 = vst [vmem:[#allocation25_spill] sm:$0xff] %v5708_v3 }
  0x4c   :  { %241 = vmatmul.mubr.f32.gmra.mxu0 %v47_v1  ;;  %354 = vmatmul.mubr.f32.gmra.mxu1 %v47_v1  ;;  %v5715_v1 = vld [vmem:[%s8516_s2 + $0x10] sm:$0xff] }
  0x4d   :  { %490 = vmatprep.subr.mxu0 %v5674_v11  ;;  %561 = vmatprep.subr.mxu1 %v5679_v20  ;;  %8728 = vst [vmem:[#allocation26_spill] sm:$0xff] %v5715_v1  ;;  %v8729_v20 = vmov 0.0  }
  0x4e   :  { %491 = vmatpush1.msra.mxu0 %v5686_v29  ;;  %562 = vmatpush1.msra.mxu1 %v5691_v38 }
  0x4f   :  { %492 = vmatprep.subr.mxu0 %v5696_v47  ;;  %563 = vmatprep.subr.mxu1 %v5701_v56 }
  0x50   :  { %493 = vmatpush1.msra.mxu0 %v5708_v3  ;;  %526 = vmatprep.mubr.f32.mxu0 %v8729_v20 }
  0x51   :  { %564 = vmatpush1.msra.mxu1 %v5715_v1  ;;  %597 = vmatprep.mubr.f32.mxu1 %v8729_v20 }
  0x52   :  { %527 = vmatmul.mubr.f32.vlgmr.msra.gmra.mxu0 %v8729_v20  ;;  %598 = vmatmul.mubr.f32.vlgmr.msra.gmra.mxu1 %v8729_v20 }
  0x53   :  { %702 = vmatprep.subr.mxu0 %v5305_v2  ;;  %773 = vmatprep.subr.mxu1 %v5310_v4 }
  0x54   :  { %703 = vmatpush1.msra.mxu0 %v5315_v5  ;;  %774 = vmatpush1.msra.mxu1 %v5320_v6 }
  0x55   :  { %704 = vmatprep.subr.mxu0 %v5325_v7  ;;  %775 = vmatprep.subr.mxu1 %v5330_v8 }
  0x56   :  { %705 = vmatpush1.msra.mxu0 %v5339_v9  ;;  %776 = vmatpush1.msra.mxu1 %v5344_v10 }
  0x57   :  { %706 = vmatprep.subr.mxu0 %v5356_v12  ;;  %777 = vmatprep.subr.mxu1 %v5361_v13 }
  0x58   :  { %707 = vmatpush1.msra.mxu0 %v5368_v14  ;;  %778 = vmatpush1.msra.mxu1 %v5373_v15 }
  0x59   :  { %708 = vmatprep.subr.mxu0 %v5378_v16  ;;  %779 = vmatprep.subr.mxu1 %v5383_v17 }
  0x5a   :  { %709 = vmatpush1.msra.mxu0 %v5392_v18  ;;  %780 = vmatpush1.msra.mxu1 %v5397_v19 }
  0x5b   :  { %710 = vmatprep.subr.mxu0 %v5409_v21  ;;  %781 = vmatprep.subr.mxu1 %v5414_v22 }
  0x5c   :  { %711 = vmatpush1.msra.mxu0 %v5421_v23  ;;  %782 = vmatpush1.msra.mxu1 %v5426_v24 }
  0x5d   :  { %712 = vmatprep.subr.mxu0 %v5431_v25  ;;  %783 = vmatprep.subr.mxu1 %v5436_v26 }
  0x5e   :  { %713 = vmatpush1.msra.mxu0 %v5445_v27  ;;  %784 = vmatpush1.msra.mxu1 %v5450_v28 }
  0x5f   :  { %714 = vmatprep.subr.mxu0 %v5462_v30  ;;  %785 = vmatprep.subr.mxu1 %v5467_v31 }
  0x60   :  { %715 = vmatpush1.msra.mxu0 %v5474_v32  ;;  %786 = vmatpush1.msra.mxu1 %v5479_v33 }
  0x61   :  { %716 = vmatprep.subr.mxu0 %v5484_v34  ;;  %787 = vmatprep.subr.mxu1 %v5489_v35 }
  0x62   :  { %717 = vmatpush1.msra.mxu0 %v5498_v36  ;;  %788 = vmatpush1.msra.mxu1 %v5503_v37 }
  0x63   :  { %718 = vmatprep.subr.mxu0 %v5515_v39  ;;  %789 = vmatprep.subr.mxu1 %v5520_v40 }
  0x64   :  { %719 = vmatpush1.msra.mxu0 %v5527_v41  ;;  %790 = vmatpush1.msra.mxu1 %v5532_v42 }
  0x65   :  { %720 = vmatprep.subr.mxu0 %v5537_v43  ;;  %791 = vmatprep.subr.mxu1 %v5542_v44 }
  0x66   :  { %721 = vmatpush1.msra.mxu0 %v5551_v45  ;;  %792 = vmatpush1.msra.mxu1 %v5556_v46 }
  0x67   :  { %722 = vmatprep.subr.mxu0 %v5568_v48  ;;  %793 = vmatprep.subr.mxu1 %v5573_v49 }
  0x68   :  { %723 = vmatpush1.msra.mxu0 %v5580_v50  ;;  %794 = vmatpush1.msra.mxu1 %v5585_v51 }
  0x69   :  { %724 = vmatprep.subr.mxu0 %v5590_v52  ;;  %795 = vmatprep.subr.mxu1 %v5595_v53 }
  0x6a   :  { %725 = vmatpush1.msra.mxu0 %v5604_v54  ;;  %796 = vmatpush1.msra.mxu1 %v5609_v55  ;;  %v8730_v54 = vld [vmem:[#allocation20_spill] sm:$0xff] }
  0x6b   :  { %726 = vmatprep.subr.mxu0 %v5621_v57  ;;  %797 = vmatprep.subr.mxu1 %v5626_v58 }
  0x6c   :  { %727 = vmatpush1.msra.mxu0 %v5633_v59  ;;  %798 = vmatpush1.msra.mxu1 %v5638_v60 }
  0x6d   :  { %728 = vmatprep.subr.mxu0 %v5643_v61  ;;  %799 = vmatprep.subr.mxu1 %v5648_v62 }
  0x6e   :  { %729 = vmatpush1.msra.mxu0 %v5657_v63  ;;  %800 = vmatpush1.msra.mxu1 %v5662_v0 }
  0x6f   :  { %730 = vmatprep.subr.mxu0 %v5674_v11  ;;  %801 = vmatprep.subr.mxu1 %v8730_v54  ;;  %v114_v54 = vlaneseq }
  0x70   :  { %731 = vmatpush1.msra.mxu0 %v5686_v29  ;;  %802 = vmatpush1.msra.mxu1 %v5691_v38 }
  0x71   :  { %732 = vmatprep.subr.mxu0 %v5696_v47  ;;  %803 = vmatprep.subr.mxu1 %v5701_v56  ;;  %v5793_v29 = vshrl.u32 %v114_v54, 7 }
  0x72   :  { %733 = vmatpush1.msra.mxu0 %v5708_v3  ;;  %766 = vmatprep.mubr.f32.mxu0 %v8729_v20 }
  0x73   :  { %804 = vmatpush1.msra.mxu1 %v5715_v1  ;;  %837 = vmatprep.mubr.f32.mxu1 %v8729_v20  ;;  %8731 = vst [vmem:[#allocation27_spill] sm:$0xff] %v5793_v29  ;;  %v8545_v56 = vsub.s32 0, %v5793_v29  ;;  %v8547_v3 = vsub.s32 2, %v5793_v29  ;;  %v112_v1 = vld [vmem:[%s8517_s3] sm:$0xf]  ;;  %v8552_v54 = vsub.s32 3, %v5793_v29 }
  0x74   :  { %943 = vmatprep.subr.mxu0 %v5305_v2  ;;  %1014 = vmatprep.subr.mxu1 %v5310_v4  ;;  %v8551_v4 = vsub.s32 1, %v5793_v29 }
  0x75   :  { %v117_v11 = vrot.slane %v112_v1, %v8545_v56  ;;  %v5814_v0 = vrot.slane %v112_v1, %v8547_v3  ;;  %v5820_v60 = vrot.slane %v112_v1, %v8552_v54 }
  0x76   :  { %v121_v61 = vrot.slane %v112_v1, %v8551_v4 }
  0xe2   :  { %v5795_v38 = vpop.f32.mrf.mxu0  ;;  %v5797_v47 = vpop.f32.mrf.mxu1 }
  0xe4   :  { %v5804_v20 = vpop.f32.mrf.mxu0  ;;  %v5806_v2 = vpop.f32.mrf.mxu1 }
  0xe8   :  { %v206_v63 = vpop.f32.mrf.mxu0  ;;  %v319_v62 = vpop.f32.mrf.mxu1 }
  0xe9   :  { %v5822_v59 = vadd.f32 %v206_v63, %v117_v11  ;;  %v5825_v58 = vadd.f32 %v319_v62, %v5814_v0 }
  0xea   :  { %v208_v57 = vpop.f32.mrf.mxu0  ;;  %v321_v56 = vpop.f32.mrf.mxu1 }
  0xeb   :  { %8732 = vst [vmem:[#allocation28_spill] sm:$0xff] %v5825_v58  ;;  %v5827_v55 = vadd.f32 %v208_v57, %v121_v61  ;;  %v5830_v3 = vadd.f32 %v321_v56, %v5820_v60 }
  0xed   :  { %8733 = vst [vmem:[#allocation29_spill] sm:$0xff] %v5827_v55  ;;  %8734 = vst [vmem:[#allocation30_spill] sm:$0xff] %v5830_v3 }
  0xee   :  { %v212_v53 = vpop.f32.mrf.mxu0  ;;  %v325_v52 = vpop.f32.mrf.mxu1 }
  0xef   :  { %v5832_v51 = vadd.f32 %v212_v53, %v117_v11  ;;  %v5835_v4 = vadd.f32 %v325_v52, %v5814_v0 }
  0xf0   :  { %v214_v1 = vpop.f32.mrf.mxu0  ;;  %v327_v63 = vpop.f32.mrf.mxu1 }
  0xf1   :  { %8735 = vst [vmem:[#allocation31_spill] sm:$0xff] %v5832_v51  ;;  %8736 = vst [vmem:[#allocation32_spill] sm:$0xff] %v5835_v4  ;;  %v5837_v54 = vadd.f32 %v214_v1, %v121_v61  ;;  %v5840_v62 = vadd.f32 %v327_v63, %v5820_v60 }
  0xf3   :  { %8737 = vst [vmem:[#allocation33_spill] sm:$0xff] %v5837_v54  ;;  %8738 = vst [vmem:[#allocation34_spill] sm:$0xff] %v5840_v62 }
  0xf4   :  { %v218_v29 = vpop.f32.mrf.mxu0  ;;  %v331_v57 = vpop.f32.mrf.mxu1 }
  0xf5   :  { %v5842_v58 = vadd.f32 %v218_v29, %v117_v11  ;;  %v5845_v56 = vadd.f32 %v331_v57, %v5814_v0 }
  0xf6   :  { %v220_v3 = vpop.f32.mrf.mxu0  ;;  %v333_v53 = vpop.f32.mrf.mxu1 }
  0xf7   :  { %8739 = vst [vmem:[#allocation35_spill] sm:$0xff] %v5842_v58  ;;  %8740 = vst [vmem:[#allocation36_spill] sm:$0xff] %v5845_v56  ;;  %v5847_v51 = vadd.f32 %v220_v3, %v121_v61  ;;  %v5850_v52 = vadd.f32 %v333_v53, %v5820_v60 }
  0xf9   :  { %8741 = vst [vmem:[#allocation37_spill] sm:$0xff] %v5847_v51  ;;  %8742 = vst [vmem:[#allocation38_spill] sm:$0xff] %v5850_v52 }
  0xfa   :  { %v224_v4 = vpop.f32.mrf.mxu0  ;;  %v337_v1 = vpop.f32.mrf.mxu1 }
  0xfb   :  { %v5852_v54 = vadd.f32 %v224_v4, %v117_v11  ;;  %v5855_v63 = vadd.f32 %v337_v1, %v5814_v0 }
  0xfc   :  { %v226_v62 = vpop.f32.mrf.mxu0  ;;  %v339_v29 = vpop.f32.mrf.mxu1 }
  0xfd   :  { %8743 = vst [vmem:[#allocation39_spill] sm:$0xff] %v5852_v54  ;;  %8744 = vst [vmem:[#allocation40_spill] sm:$0xff] %v5855_v63  ;;  %v5857_v58 = vadd.f32 %v226_v62, %v121_v61  ;;  %v5860_v57 = vadd.f32 %v339_v29, %v5820_v60 }
  0xff   :  { %8745 = vst [vmem:[#allocation41_spill] sm:$0xff] %v5857_v58  ;;  %8746 = vst [vmem:[#allocation42_spill] sm:$0xff] %v5860_v57 }
 0x100   :  { %v230_v56 = vpop.f32.mrf.mxu0  ;;  %v343_v3 = vpop.f32.mrf.mxu1 }
 0x101   :  { %v5862_v51 = vadd.f32 %v230_v56, %v117_v11  ;;  %v5865_v53 = vadd.f32 %v343_v3, %v5814_v0 }
 0x102   :  { %v232_v52 = vpop.f32.mrf.mxu0  ;;  %v345_v4 = vpop.f32.mrf.mxu1 }
 0x103   :  { %8747 = vst [vmem:[#allocation43_spill] sm:$0xff] %v5862_v51  ;;  %8748 = vst [vmem:[#allocation44_spill] sm:$0xff] %v5865_v53  ;;  %v5867_v54 = vadd.f32 %v232_v52, %v121_v61  ;;  %v5870_v1 = vadd.f32 %v345_v4, %v5820_v60 }
 0x105   :  { %8749 = vst [vmem:[#allocation45_spill] sm:$0xff] %v5867_v54  ;;  %8750 = vst [vmem:[#allocation46_spill] sm:$0xff] %v5870_v1 }
 0x106   :  { %v236_v63 = vpop.f32.mrf.mxu0  ;;  %v349_v62 = vpop.f32.mrf.mxu1 }
 0x107   :  { %v5872_v58 = vadd.f32 %v236_v63, %v117_v11  ;;  %v5875_v29 = vadd.f32 %v349_v62, %v5814_v0 }
 0x108   :  { %v238_v57 = vpop.f32.mrf.mxu0  ;;  %v351_v56 = vpop.f32.mrf.mxu1 }
 0x109   :  { %8751 = vst [vmem:[#allocation47_spill] sm:$0xff] %v5872_v58  ;;  %8752 = vst [vmem:[#allocation48_spill] sm:$0xff] %v5875_v29  ;;  %v5877_v51 = vadd.f32 %v238_v57, %v121_v61  ;;  %v5880_v3 = vadd.f32 %v351_v56, %v5820_v60  ;;  %v201_v57 = vadd.f32 %v5795_v38, %v117_v11 }
 0x10a   :  { %v203_v56 = vadd.f32 %v5804_v20, %v121_v61 }
 0x10b   :  { %8753 = vst [vmem:[#allocation49_spill] sm:$0xff] %v5877_v51  ;;  %8754 = vst [vmem:[#allocation50_spill] sm:$0xff] %v5880_v3 }
 0x10c   :  { %v242_v53 = vpop.f32.mrf.mxu0  ;;  %v355_v52 = vpop.f32.mrf.mxu1 }
 0x10d   :  { %v5882_v54 = vadd.f32 %v242_v53, %v117_v11  ;;  %v5885_v4 = vadd.f32 %v355_v52, %v5814_v0 }
 0x10e   :  { %v244_v1 = vpop.f32.mrf.mxu0  ;;  %v357_v63 = vpop.f32.mrf.mxu1 }
 0x10f   :  { %8755 = vst [vmem:[#allocation51_spill] sm:$0xff] %v5882_v54  ;;  %8756 = vst [vmem:[#allocation52_spill] sm:$0xff] %v5885_v4  ;;  %v5887_v58 = vadd.f32 %v244_v1, %v121_v61  ;;  %v5890_v62 = vadd.f32 %v357_v63, %v5820_v60  ;;  %v316_v1 = vadd.f32 %v5806_v2, %v5820_v60 }
 0x110   :  { %v314_v63 = vadd.f32 %v5797_v47, %v5814_v0 }
 0x111   :  { %8757 = vst [vmem:[#allocation53_spill] sm:$0xff] %v5887_v58  ;;  %8758 = vst [vmem:[#allocation54_spill] sm:$0xff] %v5890_v62 }
 0x112   :  { %v528_v29 = vpop.f32.mrf.mxu0  ;;  %v599_v54 = vpop.f32.mrf.mxu1 }
 0x113   :  { %v604_v3 = vadd.f32 %v528_v29, %v201_v57  ;;  %v606_v62 = vadd.f32 %v599_v54, %v314_v63 }
 0x114   :  { %v530_v51 = vpop.f32.mrf.mxu0  ;;  %v601_v4 = vpop.f32.mrf.mxu1 }
 0x115   :  { %v4694_v55 = vmul.f32 -1.442695, %v604_v3  ;;  %v605_v53 = vadd.f32 %v530_v51, %v203_v56  ;;  %v607_v58 = vadd.f32 %v601_v4, %v316_v1 }
 0x117   :  { %4797 = vpow2.f32 %v4694_v55  ;;  %v4695_v52 = vmul.f32 -1.442695, %v605_v53  ;;  %v4696_v11 = vmul.f32 -1.442695, %v607_v58 }
 0x119   :  { %4799 = vpow2.f32 %v4695_v52 }
 0x11a   :  { %4801 = vpow2.f32 %v4696_v11 }
 0x124   :  { %v4798_v38 = vpop.eup %4797 }
 0x125   :  { %v611_v61 = vadd.f32 1.0, %v4798_v38 }
 0x126   :  { %v4800_v20 = vpop.eup %4799 }
 0x127   :  { %4803 = vrcp.f32 %v611_v61  ;;  %v617_v51 = vadd.f32 1.0, %v4800_v20  ;;  %v4802_v55 = vpop.eup %4801  ;;  %v5986_v20 = vld [vmem:[%s8516_s2 + $0x1e8] sm:$0xff] }
 0x128   :  { %4805 = vtanh.f32 %v606_v62  ;;  %v624_v56 = vadd.f32 1.0, %v4802_v55  ;;  %v5998_v55 = vld [vmem:[%s8516_s2 + $0x1e0] sm:$0xff] }
 0x129   :  { %4807 = vrcp.f32 %v617_v51  ;;  %v5991_v51 = vld [vmem:[%s8516_s2 + $0x1f8] sm:$0xff] }
 0x12a   :  { %4809 = vrcp.f32 %v624_v56  ;;  %v6022_v56 = vld [vmem:[%s8516_s2 + $0x1c0] sm:$0xff] }
 0x134   :  { %v4804_v29 = vpop.eup %4803 }
 0x135   :  { %v4806_v3 = vpop.eup %4805 }
 0x136   :  { %v4808_v57 = vpop.eup %4807  ;;  %v628_v2 = vmul.f32 %v4806_v3, %v4804_v29  ;;  %v6003_v29 = vld [vmem:[%s8516_s2 + $0x1f0] sm:$0xff]  ;;  %v6010_v3 = vld [vmem:[%s8516_s2 + $0x1c8] sm:$0xff] }
 0x137   :  { %v627_v60 = vmul.f32 0.0, %v4808_v57  ;;  %v4810_v58 = vpop.eup %4809  ;;  %v6015_v57 = vld [vmem:[%s8516_s2 + $0x1d8] sm:$0xff] }
 0x139   :  { %v5898_v4 = vadd.f32 %v628_v2, %v627_v60  ;;  %v6027_v60 = vld [vmem:[%s8516_s2 + $0x1d0] sm:$0xff]  ;;  %v6034_v2 = vld [vmem:[%s8516_s2 + $0x1a8] sm:$0xff] }
 0x13b   :  { %4811 = vtanh.f32 %v5898_v4 }
 0x148   :  { %v4812_v0 = vpop.eup %4811 }
 0x149   :  { %v5901_v47 = vmul.f32 %v4812_v0, %v4810_v58  ;;  %v6046_v58 = vld [vmem:[%s8516_s2 + $0x1a0] sm:$0xff]  ;;  %v6051_v0 = vld [vmem:[%s8516_s2 + $0x1b0] sm:$0xff] }
 0x14b   :  { %8759 = vst [vmem:[#allocation55_spill] sm:$0xff] %v5901_v47  ;;  %767 = vmatmul.mubr.f32.vlgmr.msra.gmra.mxu0 %v5901_v47  ;;  %838 = vmatmul.mubr.f32.vlgmr.msra.gmra.mxu1 %v5901_v47  ;;  %v6347_v47 = vld [vmem:[%s8516_s2 + $0x18] sm:$0xff] }
 0x14c   :  { %944 = vmatpush1.msra.mxu0 %v5315_v5  ;;  %1015 = vmatpush1.msra.mxu1 %v5320_v6  ;;  %v8760_v5 = vld [vmem:[#allocation6_spill] sm:$0xff]  ;;  %v8761_v6 = vld [vmem:[#allocation7_spill] sm:$0xff] }
 0x14d   :  { %945 = vmatprep.subr.mxu0 %v5325_v7  ;;  %1016 = vmatprep.subr.mxu1 %v5330_v8  ;;  %v8762_v7 = vld [vmem:[#allocation8_spill] sm:$0xff]  ;;  %v8763_v8 = vld [vmem:[#allocation9_spill] sm:$0xff]  ;;  %8786 = vst [vmem:[#allocation7_spill] sm:$0xff] %v5986_v20 }
 0x14e   :  { %946 = vmatpush1.msra.mxu0 %v5339_v9  ;;  %1017 = vmatpush1.msra.mxu1 %v5344_v10  ;;  %v8764_v9 = vld [vmem:[#allocation10_spill] sm:$0xff]  ;;  %v8765_v10 = vld [vmem:[#allocation11_spill] sm:$0xff]  ;;  %8787 = vst [vmem:[#allocation8_spill] sm:$0xff] %v5991_v51 }
 0x14f   :  { %947 = vmatprep.subr.mxu0 %v5356_v12  ;;  %1018 = vmatprep.subr.mxu1 %v5361_v13  ;;  %v8766_v12 = vld [vmem:[#allocation12_spill] sm:$0xff]  ;;  %v8767_v13 = vld [vmem:[#allocation13_spill] sm:$0xff] }
 0x150   :  { %948 = vmatpush1.msra.mxu0 %v5368_v14  ;;  %1019 = vmatpush1.msra.mxu1 %v5373_v15  ;;  %v8768_v14 = vld [vmem:[#allocation14_spill] sm:$0xff]  ;;  %v8769_v15 = vld [vmem:[#allocation15_spill] sm:$0xff] }
 0x151   :  { %949 = vmatprep.subr.mxu0 %v5378_v16  ;;  %1020 = vmatprep.subr.mxu1 %v5383_v17  ;;  %v8770_v16 = vld [vmem:[#allocation16_spill] sm:$0xff]  ;;  %v8771_v17 = vld [vmem:[#allocation17_spill] sm:$0xff] }
 0x152   :  { %950 = vmatpush1.msra.mxu0 %v5392_v18  ;;  %1021 = vmatpush1.msra.mxu1 %v5397_v19  ;;  %v8772_v18 = vld [vmem:[#allocation18_spill] sm:$0xff]  ;;  %v8773_v19 = vld [vmem:[#allocation19_spill] sm:$0xff] }
 0x153   :  { %951 = vmatprep.subr.mxu0 %v5409_v21  ;;  %1022 = vmatprep.subr.mxu1 %v5414_v22  ;;  %v8774_v21 = vld [vmem:[#allocation20_spill] sm:$0xff]  ;;  %v8775_v22 = vld [vmem:[#allocation21_spill] sm:$0xff] }
 0x154   :  { %952 = vmatpush1.msra.mxu0 %v5421_v23  ;;  %1023 = vmatpush1.msra.mxu1 %v5426_v24  ;;  %v8776_v23 = vld [vmem:[#allocation22_spill] sm:$0xff]  ;;  %v8777_v24 = vld [vmem:[#allocation23_spill] sm:$0xff] }
 0x155   :  { %953 = vmatprep.subr.mxu0 %v5431_v25  ;;  %1024 = vmatprep.subr.mxu1 %v5436_v26  ;;  %v8778_v25 = vld [vmem:[#allocation24_spill] sm:$0xff]  ;;  %v8779_v26 = vld [vmem:[#allocation25_spill] sm:$0xff]  ;;  %8802 = vst [vmem:[#allocation23_spill] sm:$0xff] %v6347_v47 }
 0x156   :  { %954 = vmatpush1.msra.mxu0 %v5445_v27  ;;  %1025 = vmatpush1.msra.mxu1 %v5450_v28  ;;  %v8780_v27 = vmov 0.0   ;;  %v8781_v28 = vld [vmem:[#allocation26_spill] sm:$0xff] }
 0x157   :  { %955 = vmatprep.subr.mxu0 %v5462_v30  ;;  %1026 = vmatprep.subr.mxu1 %v5467_v31 }
 0x158   :  { %956 = vmatpush1.msra.mxu0 %v5474_v32  ;;  %1027 = vmatpush1.msra.mxu1 %v5479_v33 }
 0x159   :  { %957 = vmatprep.subr.mxu0 %v5484_v34  ;;  %1028 = vmatprep.subr.mxu1 %v5489_v35  ;;  %v8782_v34 = vld [vmem:[#allocation29_spill] sm:$0xff] }
 0x15a   :  { %958 = vmatpush1.msra.mxu0 %v5498_v36  ;;  %1029 = vmatpush1.msra.mxu1 %v5503_v37 }
 0x15b   :  { %959 = vmatprep.subr.mxu0 %v5515_v39  ;;  %1030 = vmatprep.subr.mxu1 %v5520_v40  ;;  %v8783_v40 = vld [vmem:[#allocation30_spill] sm:$0xff] }
 0x15c   :  { %960 = vmatpush1.msra.mxu0 %v5527_v41  ;;  %1031 = vmatpush1.msra.mxu1 %v5532_v42  ;;  %v8784_v42 = vld [vmem:[#allocation28_spill] sm:$0xff] }
 0x15d   :  { %961 = vmatprep.subr.mxu0 %v5537_v43  ;;  %1032 = vmatprep.subr.mxu1 %v5542_v44 }
 0x15e   :  { %962 = vmatpush1.msra.mxu0 %v5551_v45  ;;  %1033 = vmatpush1.msra.mxu1 %v5556_v46 }
 0x15f   :  { %963 = vmatprep.subr.mxu0 %v5568_v48  ;;  %1034 = vmatprep.subr.mxu1 %v5573_v49 }
 0x160   :  { %964 = vmatpush1.msra.mxu0 %v5580_v50  ;;  %1035 = vmatpush1.msra.mxu1 %v8760_v5  ;;  %v6058_v5 = vld [vmem:[%s8516_s2 + $0x188] sm:$0xff] }
 0x161   :  { %965 = vmatprep.subr.mxu0 %v8761_v6  ;;  %1036 = vmatprep.subr.mxu1 %v8762_v7  ;;  %v6063_v6 = vld [vmem:[%s8516_s2 + $0x198] sm:$0xff]  ;;  %v6070_v7 = vld [vmem:[%s8516_s2 + $0x180] sm:$0xff] }
 0x162   :  { %966 = vmatpush1.msra.mxu0 %v8763_v8  ;;  %1037 = vmatpush1.msra.mxu1 %v8764_v9  ;;  %v6075_v8 = vld [vmem:[%s8516_s2 + $0x190] sm:$0xff]  ;;  %v6082_v9 = vld [vmem:[%s8516_s2 + $0x168] sm:$0xff] }
 0x163   :  { %967 = vmatprep.subr.mxu0 %v8765_v10  ;;  %1038 = vmatprep.subr.mxu1 %v8766_v12  ;;  %v6087_v10 = vld [vmem:[%s8516_s2 + $0x178] sm:$0xff]  ;;  %v6094_v12 = vld [vmem:[%s8516_s2 + $0x160] sm:$0xff] }
 0x164   :  { %968 = vmatpush1.msra.mxu0 %v8767_v13  ;;  %1039 = vmatpush1.msra.mxu1 %v8768_v14  ;;  %v6099_v13 = vld [vmem:[%s8516_s2 + $0x170] sm:$0xff]  ;;  %v6106_v14 = vld [vmem:[%s8516_s2 + $0x148] sm:$0xff] }
 0x165   :  { %969 = vmatprep.subr.mxu0 %v8769_v15  ;;  %1040 = vmatprep.subr.mxu1 %v8770_v16  ;;  %v6111_v15 = vld [vmem:[%s8516_s2 + $0x158] sm:$0xff]  ;;  %v6118_v16 = vld [vmem:[%s8516_s2 + $0x140] sm:$0xff] }
 0x166   :  { %970 = vmatpush1.msra.mxu0 %v8771_v17  ;;  %1041 = vmatpush1.msra.mxu1 %v8772_v18  ;;  %v6123_v17 = vld [vmem:[%s8516_s2 + $0x150] sm:$0xff]  ;;  %v6130_v18 = vld [vmem:[%s8516_s2 + $0x128] sm:$0xff] }
 0x167   :  { %971 = vmatprep.subr.mxu0 %v8773_v19  ;;  %1042 = vmatprep.subr.mxu1 %v8774_v21  ;;  %v6135_v19 = vld [vmem:[%s8516_s2 + $0x138] sm:$0xff]  ;;  %v6142_v21 = vld [vmem:[%s8516_s2 + $0x120] sm:$0xff] }
 0x168   :  { %972 = vmatpush1.msra.mxu0 %v8775_v22  ;;  %1043 = vmatpush1.msra.mxu1 %v8776_v23  ;;  %v6147_v22 = vld [vmem:[%s8516_s2 + $0x130] sm:$0xff]  ;;  %v6154_v23 = vld [vmem:[%s8516_s2 + $0x108] sm:$0xff] }
 0x169   :  { %973 = vmatprep.subr.mxu0 %v8777_v24  ;;  %1044 = vmatprep.subr.mxu1 %v8778_v25  ;;  %v6159_v24 = vld [vmem:[%s8516_s2 + $0x118] sm:$0xff]  ;;  %v6164_v25 = vld [vmem:[%s8516_s2 + $0x100] sm:$0xff] }
 0x16a   :  { %974 = vmatpush1.msra.mxu0 %v8779_v26  ;;  %1007 = vmatprep.mubr.f32.mxu0 %v8780_v27  ;;  %v6171_v26 = vld [vmem:[%s8516_s2 + $0x110] sm:$0xff] }
 0x16b   :  { %1045 = vmatpush1.msra.mxu1 %v8781_v28  ;;  %1078 = vmatprep.mubr.f32.mxu1 %v8780_v27  ;;  %v6176_v28 = vld [vmem:[%s8516_s2 + $0xe8] sm:$0xff] }
 0x16c   :  { %1184 = vmatprep.subr.mxu0 %v5986_v20  ;;  %1255 = vmatprep.subr.mxu1 %v5991_v51 }
 0x20b   :  { %v768_v30 = vpop.f32.mrf.mxu0  ;;  %v839_v36 = vpop.f32.mrf.mxu1 }
 0x20c   :  { %v844_v31 = vadd.f32 %v768_v30, %v5822_v59  ;;  %v846_v43 = vadd.f32 %v839_v36, %v8784_v42  ;;  %v6181_v30 = vld [vmem:[%s8516_s2 + $0xf8] sm:$0xff]  ;;  %v6215_v36 = vld [vmem:[%s8516_s2 + $0xd0] sm:$0xff]  ;;  %v6246_v42 = vld [vmem:[%s8516_s2 + $0x88] sm:$0xff] }
 0x20d   :  { %v770_v32 = vpop.f32.mrf.mxu0  ;;  %v841_v39 = vpop.f32.mrf.mxu1 }
 0x20e   :  { %v4697_v33 = vmul.f32 -1.442695, %v844_v31  ;;  %v845_v35 = vadd.f32 %v770_v32, %v8782_v34  ;;  %v847_v41 = vadd.f32 %v841_v39, %v8783_v40  ;;  %v6188_v31 = vld [vmem:[%s8516_s2 + $0xe0] sm:$0xff]  ;;  %v6193_v32 = vld [vmem:[%s8516_s2 + $0xf0] sm:$0xff]  ;;  %v6205_v34 = vld [vmem:[%s8516_s2 + $0xd8] sm:$0xff] }
 0x20f   :  { %v6227_v39 = vld [vmem:[%s8516_s2 + $0xb8] sm:$0xff]  ;;  %v6234_v40 = vld [vmem:[%s8516_s2 + $0xa0] sm:$0xff] }
 0x210   :  { %4813 = vpow2.f32 %v4697_v33  ;;  %v4698_v37 = vmul.f32 -1.442695, %v845_v35  ;;  %v4699_v44 = vmul.f32 -1.442695, %v847_v41  ;;  %v6198_v33 = vld [vmem:[%s8516_s2 + $0xc8] sm:$0xff]  ;;  %v6210_v35 = vld [vmem:[%s8516_s2 + $0xc0] sm:$0xff] }
 0x211   :  { %v6239_v41 = vld [vmem:[%s8516_s2 + $0xb0] sm:$0xff] }
 0x212   :  { %4815 = vpow2.f32 %v4698_v37  ;;  %v6222_v37 = vld [vmem:[%s8516_s2 + $0xa8] sm:$0xff] }
 0x213   :  { %4817 = vtanh.f32 %v846_v43  ;;  %v6251_v43 = vld [vmem:[%s8516_s2 + $0x98] sm:$0xff] }
 0x214   :  { %4819 = vpow2.f32 %v4699_v44  ;;  %v6258_v44 = vld [vmem:[%s8516_s2 + $0x80] sm:$0xff] }
 0x21d   :  { %v4814_v45 = vpop.eup %4813 }
 0x21e   :  { %v851_v46 = vadd.f32 1.0, %v4814_v45  ;;  %v6263_v45 = vld [vmem:[%s8516_s2 + $0x90] sm:$0xff] }
 0x21f   :  { %v4816_v48 = vpop.eup %4815  ;;  %8788 = vst [vmem:[#allocation9_spill] sm:$0xff] %v6263_v45 }
 0x220   :  { %4821 = vrcp.f32 %v851_v46  ;;  %v857_v49 = vadd.f32 1.0, %v4816_v48  ;;  %v4818_v50 = vpop.eup %4817  ;;  %v6270_v46 = vld [vmem:[%s8516_s2 + $0x68] sm:$0xff]  ;;  %v6275_v48 = vld [vmem:[%s8516_s2 + $0x78] sm:$0xff] }
 0x221   :  { %v4820_v59 = vpop.eup %4819  ;;  %8789 = vst [vmem:[#allocation10_spill] sm:$0xff] %v6270_v46  ;;  %8790 = vst [vmem:[#allocation11_spill] sm:$0xff] %v6275_v48 }
 0x222   :  { %4823 = vrcp.f32 %v857_v49  ;;  %v864_v52 = vadd.f32 1.0, %v4820_v59  ;;  %v6282_v49 = vld [vmem:[%s8516_s2 + $0x60] sm:$0xff]  ;;  %v6294_v59 = vld [vmem:[%s8516_s2 + $0x48] sm:$0xff] }
 0x223   :  { %8791 = vst [vmem:[#allocation12_spill] sm:$0xff] %v6282_v49  ;;  %8793 = vst [vmem:[#allocation14_spill] sm:$0xff] %v6294_v59 }
 0x224   :  { %4825 = vrcp.f32 %v864_v52  ;;  %v6318_v52 = vld [vmem:[%s8516_s2 + $0x28] sm:$0xff] }
 0x225   :  { %8797 = vst [vmem:[#allocation18_spill] sm:$0xff] %v6318_v52 }
 0x22d   :  { %v4822_v54 = vpop.eup %4821 }
 0x22e   :  { %v868_v62 = vmul.f32 %v4822_v54, %v4818_v50  ;;  %v6287_v50 = vld [vmem:[%s8516_s2 + $0x70] sm:$0xff]  ;;  %v6299_v54 = vld [vmem:[%s8516_s2 + $0x58] sm:$0xff] }
 0x22f   :  { %v4824_v53 = vpop.eup %4823  ;;  %8792 = vst [vmem:[#allocation13_spill] sm:$0xff] %v6287_v50  ;;  %8794 = vst [vmem:[#allocation15_spill] sm:$0xff] %v6299_v54 }
 0x230   :  { %v867_v1 = vmul.f32 %v4824_v53, %v5898_v4  ;;  %v6039_v4 = vld [vmem:[%s8516_s2 + $0x1b8] sm:$0xff]  ;;  %v6311_v53 = vld [vmem:[%s8516_s2 + $0x50] sm:$0xff] }
 0x231   :  { %v4826_v11 = vpop.eup %4825  ;;  %8796 = vst [vmem:[#allocation17_spill] sm:$0xff] %v6311_v53 }
 0x232   :  { %v5974_v63 = vadd.f32 %v868_v62, %v867_v1  ;;  %v6306_v62 = vld [vmem:[%s8516_s2 + $0x40] sm:$0xff]  ;;  %v6323_v1 = vld [vmem:[%s8516_s2 + $0x38] sm:$0xff] }
 0x233   :  { %8795 = vst [vmem:[#allocation16_spill] sm:$0xff] %v6306_v62  ;;  %8798 = vst [vmem:[#allocation19_spill] sm:$0xff] %v6323_v1 }
 0x234   :  { %4827 = vtanh.f32 %v5974_v63 }
 0x241   :  { %v4828_v38 = vpop.eup %4827 }
 0x242   :  { %v5977_v61 = vmul.f32 %v4828_v38, %v4826_v11  ;;  %v6330_v11 = vld [vmem:[%s8516_s2 + $0x20] sm:$0xff]  ;;  %v6335_v38 = vld [vmem:[%s8516_s2 + $0x30] sm:$0xff] }
 0x243   :  { %8799 = vst [vmem:[#allocation20_spill] sm:$0xff] %v6330_v11  ;;  %8800 = vst [vmem:[#allocation21_spill] sm:$0xff] %v6335_v38 }
 0x244   :  { %8785 = vst [vmem:[#allocation6_spill] sm:$0xff] %v5977_v61  ;;  %1008 = vmatmul.mubr.f32.vlgmr.msra.gmra.mxu0 %v5977_v61  ;;  %1079 = vmatmul.mubr.f32.vlgmr.msra.gmra.mxu1 %v5977_v61  ;;  %v6342_v61 = vld [vmem:[%s8516_s2 + $0x8] sm:$0xff] }
 0x245   :  { %1248 = vmatprep.mubr.f32.mxu0 %v8780_v27  ;;  %1319 = vmatprep.mubr.f32.mxu1 %v8780_v27  ;;  %8801 = vst [vmem:[#allocation22_spill] sm:$0xff] %v6342_v61  ;;  %v6354_v27 = vld [vmem:[%s8516_s2] sm:$0xff] }
 0x246   :  { %1185 = vmatpush1.msra.mxu0 %v5998_v55  ;;  %1256 = vmatpush1.msra.mxu1 %v6003_v29  ;;  %8803 = vst [vmem:[#allocation24_spill] sm:$0xff] %v6354_v27 }
 0x247   :  { %1186 = vmatprep.subr.mxu0 %v6010_v3  ;;  %1257 = vmatprep.subr.mxu1 %v6015_v57 }
 0x248   :  { %1187 = vmatpush1.msra.mxu0 %v6022_v56  ;;  %1258 = vmatpush1.msra.mxu1 %v6027_v60 }
 0x249   :  { %1188 = vmatprep.subr.mxu0 %v6034_v2  ;;  %1259 = vmatprep.subr.mxu1 %v6039_v4 }
 0x24a   :  { %1189 = vmatpush1.msra.mxu0 %v6046_v58  ;;  %1260 = vmatpush1.msra.mxu1 %v6051_v0 }
 0x24b   :  { %1190 = vmatprep.subr.mxu0 %v6058_v5  ;;  %1261 = vmatprep.subr.mxu1 %v6063_v6 }
 0x24c   :  { %1191 = vmatpush1.msra.mxu0 %v6070_v7  ;;  %1262 = vmatpush1.msra.mxu1 %v6075_v8 }
 0x24d   :  { %1192 = vmatprep.subr.mxu0 %v6082_v9  ;;  %1263 = vmatprep.subr.mxu1 %v6087_v10 }
 0x24e   :  { %1193 = vmatpush1.msra.mxu0 %v6094_v12  ;;  %1264 = vmatpush1.msra.mxu1 %v6099_v13 }
 0x24f   :  { %1194 = vmatprep.subr.mxu0 %v6106_v14  ;;  %1265 = vmatprep.subr.mxu1 %v6111_v15 }
 0x250   :  { %1195 = vmatpush1.msra.mxu0 %v6118_v16  ;;  %1266 = vmatpush1.msra.mxu1 %v6123_v17 }
 0x251   :  { %1196 = vmatprep.subr.mxu0 %v6130_v18  ;;  %1267 = vmatprep.subr.mxu1 %v6135_v19 }
 0x252   :  { %1197 = vmatpush1.msra.mxu0 %v6142_v21  ;;  %1268 = vmatpush1.msra.mxu1 %v6147_v22 }
 0x253   :  { %1198 = vmatprep.subr.mxu0 %v6154_v23  ;;  %1269 = vmatprep.subr.mxu1 %v6159_v24 }
 0x254   :  { %1199 = vmatpush1.msra.mxu0 %v6164_v25  ;;  %1270 = vmatpush1.msra.mxu1 %v6171_v26 }
 0x255   :  { %1200 = vmatprep.subr.mxu0 %v6176_v28  ;;  %1271 = vmatprep.subr.mxu1 %v6181_v30 }
 0x256   :  { %1201 = vmatpush1.msra.mxu0 %v6188_v31  ;;  %1272 = vmatpush1.msra.mxu1 %v6193_v32 }
 0x257   :  { %1202 = vmatprep.subr.mxu0 %v6198_v33  ;;  %1273 = vmatprep.subr.mxu1 %v6205_v34 }
 0x258   :  { %1203 = vmatpush1.msra.mxu0 %v6210_v35  ;;  %1274 = vmatpush1.msra.mxu1 %v6215_v36 }
 0x259   :  { %1204 = vmatprep.subr.mxu0 %v6222_v37  ;;  %1275 = vmatprep.subr.mxu1 %v6227_v39 }
 0x25a   :  { %1205 = vmatpush1.msra.mxu0 %v6234_v40  ;;  %1276 = vmatpush1.msra.mxu1 %v6239_v41 }
 0x25b   :  { %1206 = vmatprep.subr.mxu0 %v6246_v42  ;;  %1277 = vmatprep.subr.mxu1 %v6251_v43 }
 0x25c   :  { %1207 = vmatpush1.msra.mxu0 %v6258_v44  ;;  %1278 = vmatpush1.msra.mxu1 %v6263_v45 }
 0x25d   :  { %1208 = vmatprep.subr.mxu0 %v6270_v46  ;;  %1279 = vmatprep.subr.mxu1 %v6275_v48  ;;  %v8808_v48 = vld [vmem:[#allocation32_spill] sm:$0xff] }
 0x25e   :  { %1209 = vmatpush1.msra.mxu0 %v6282_v49  ;;  %1280 = vmatpush1.msra.mxu1 %v6287_v50  ;;  %v8807_v49 = vld [vmem:[#allocation34_spill] sm:$0xff] }
 0x25f   :  { %1210 = vmatprep.subr.mxu0 %v6294_v59  ;;  %1281 = vmatprep.subr.mxu1 %v6299_v54 }
 0x260   :  { %1211 = vmatpush1.msra.mxu0 %v6306_v62  ;;  %1282 = vmatpush1.msra.mxu1 %v6311_v53  ;;  %v6359_v53 = vld [vmem:[%s8516_s2 + $0x10] sm:$0xff] }
 0x261   :  { %1212 = vmatprep.subr.mxu0 %v6318_v52  ;;  %1283 = vmatprep.subr.mxu1 %v6323_v1  ;;  %8804 = vst [vmem:[#allocation25_spill] sm:$0xff] %v6359_v53  ;;  %v8805_v52 = vld [vmem:[#allocation31_spill] sm:$0xff] }
 0x262   :  { %1213 = vmatpush1.msra.mxu0 %v6330_v11  ;;  %1284 = vmatpush1.msra.mxu1 %v6335_v38  ;;  %v8806_v11 = vld [vmem:[#allocation33_spill] sm:$0xff] }
 0x263   :  { %1214 = vmatprep.subr.mxu0 %v6342_v61  ;;  %1285 = vmatprep.subr.mxu1 %v6347_v47 }
 0x264   :  { %1215 = vmatpush1.msra.mxu0 %v6354_v27  ;;  %1286 = vmatpush1.msra.mxu1 %v6359_v53 }
 0x265   :  { %1425 = vmatprep.subr.mxu0 %v5986_v20  ;;  %1496 = vmatprep.subr.mxu1 %v5991_v51 }
 0x304   :  { %v1009_v1 = vpop.f32.mrf.mxu0  ;;  %v1080_v38 = vpop.f32.mrf.mxu1 }
 0x305   :  { %v1085_v62 = vadd.f32 %v1009_v1, %v8805_v52  ;;  %v1087_v53 = vadd.f32 %v1080_v38, %v8808_v48  ;;  %v8816_v38 = vld [vmem:[#allocation15_spill] sm:$0xff] }
 0x306   :  { %v1011_v54 = vpop.f32.mrf.mxu0  ;;  %v1082_v47 = vpop.f32.mrf.mxu1 }
 0x307   :  { %v4700_v59 = vmul.f32 -1.442695, %v1085_v62  ;;  %v1086_v50 = vadd.f32 %v1011_v54, %v8806_v11  ;;  %v1088_v27 = vadd.f32 %v1082_v47, %v8807_v49  ;;  %v8814_v49 = vld [vmem:[#allocation13_spill] sm:$0xff] }
 0x309   :  { %4829 = vpow2.f32 %v4700_v59  ;;  %v4701_v61 = vmul.f32 -1.442695, %v1086_v50  ;;  %v4702_v46 = vmul.f32 -1.442695, %v1088_v27 }
 0x30b   :  { %4831 = vpow2.f32 %v4701_v61 }
 0x30c   :  { %4833 = vtanh.f32 %v1087_v53  ;;  %v8815_v53 = vld [vmem:[#allocation14_spill] sm:$0xff] }
 0x30d   :  { %4835 = vpow2.f32 %v4702_v46  ;;  %v8813_v46 = vld [vmem:[#allocation12_spill] sm:$0xff] }
 0x316   :  { %v4830_v20 = vpop.eup %4829 }
 0x317   :  { %v1092_v45 = vadd.f32 1.0, %v4830_v20 }
 0x318   :  { %v4832_v51 = vpop.eup %4831 }
 0x319   :  { %4837 = vrcp.f32 %v1092_v45  ;;  %v1098_v52 = vadd.f32 1.0, %v4832_v51  ;;  %v4834_v62 = vpop.eup %4833  ;;  %v8811_v51 = vld [vmem:[#allocation10_spill] sm:$0xff]  ;;  %v8812_v45 = vld [vmem:[#allocation11_spill] sm:$0xff] }
 0x31a   :  { %v4836_v54 = vpop.eup %4835 }
 0x31b   :  { %4839 = vrcp.f32 %v1098_v52  ;;  %v1105_v61 = vadd.f32 1.0, %v4836_v54  ;;  %v8817_v52 = vld [vmem:[#allocation16_spill] sm:$0xff]  ;;  %v8819_v54 = vld [vmem:[#allocation18_spill] sm:$0xff] }
 0x31d   :  { %4841 = vrcp.f32 %v1105_v61  ;;  %v8823_v61 = vld [vmem:[#allocation22_spill] sm:$0xff] }
 0x326   :  { %v4838_v59 = vpop.eup %4837 }
 0x327   :  { %v1109_v1 = vmul.f32 %v4838_v59, %v4834_v62  ;;  %v8818_v62 = vld [vmem:[#allocation17_spill] sm:$0xff]  ;;  %v8820_v59 = vld [vmem:[#allocation19_spill] sm:$0xff] }
 0x328   :  { %v4840_v50 = vpop.eup %4839 }
 0x329   :  { %v1108_v11 = vmul.f32 %v4840_v50, %v5974_v63  ;;  %v8810_v63 = vld [vmem:[#allocation9_spill] sm:$0xff] }
 0x32a   :  { %v4842_v27 = vpop.eup %4841  ;;  %v8822_v50 = vld [vmem:[#allocation21_spill] sm:$0xff] }
 0x32b   :  { %v6374_v47 = vadd.f32 %v1109_v1, %v1108_v11  ;;  %v8821_v1 = vld [vmem:[#allocation20_spill] sm:$0xff]  ;;  %v8824_v11 = vld [vmem:[#allocation23_spill] sm:$0xff] }
 0x32d   :  { %4843 = vtanh.f32 %v6374_v47 }
 0x33a   :  { %v4844_v20 = vpop.eup %4843 }
 0x33b   :  { %v6377_v48 = vmul.f32 %v4844_v20, %v4842_v27  ;;  %v8825_v27 = vld [vmem:[#allocation24_spill] sm:$0xff]  ;;  %v8826_v20 = vmov 0.0  }
 0x33d   :  { %8809 = vst [vmem:[#allocation26_spill] sm:$0xff] %v6377_v48  ;;  %1249 = vmatmul.mubr.f32.vlgmr.msra.gmra.mxu0 %v6377_v48  ;;  %1320 = vmatmul.mubr.f32.vlgmr.msra.gmra.mxu1 %v6377_v48  ;;  %v8827_v48 = vld [vmem:[#allocation25_spill] sm:$0xff] }
 0x33e   :  { %1426 = vmatpush1.msra.mxu0 %v5998_v55  ;;  %1497 = vmatpush1.msra.mxu1 %v6003_v29 }
 0x33f   :  { %1427 = vmatprep.subr.mxu0 %v6010_v3  ;;  %1498 = vmatprep.subr.mxu1 %v6015_v57 }
 0x340   :  { %1428 = vmatpush1.msra.mxu0 %v6022_v56  ;;  %1499 = vmatpush1.msra.mxu1 %v6027_v60 }
 0x341   :  { %1429 = vmatprep.subr.mxu0 %v6034_v2  ;;  %1500 = vmatprep.subr.mxu1 %v6039_v4 }
 0x342   :  { %1430 = vmatpush1.msra.mxu0 %v6046_v58  ;;  %1501 = vmatpush1.msra.mxu1 %v6051_v0 }
 0x343   :  { %1431 = vmatprep.subr.mxu0 %v6058_v5  ;;  %1502 = vmatprep.subr.mxu1 %v6063_v6 }
 0x344   :  { %1432 = vmatpush1.msra.mxu0 %v6070_v7  ;;  %1503 = vmatpush1.msra.mxu1 %v6075_v8 }
 0x345   :  { %1433 = vmatprep.subr.mxu0 %v6082_v9  ;;  %1504 = vmatprep.subr.mxu1 %v6087_v10 }
 0x346   :  { %1434 = vmatpush1.msra.mxu0 %v6094_v12  ;;  %1505 = vmatpush1.msra.mxu1 %v6099_v13 }
 0x347   :  { %1435 = vmatprep.subr.mxu0 %v6106_v14  ;;  %1506 = vmatprep.subr.mxu1 %v6111_v15 }
 0x348   :  { %1436 = vmatpush1.msra.mxu0 %v6118_v16  ;;  %1507 = vmatpush1.msra.mxu1 %v6123_v17 }
 0x349   :  { %1437 = vmatprep.subr.mxu0 %v6130_v18  ;;  %1508 = vmatprep.subr.mxu1 %v6135_v19 }
 0x34a   :  { %1438 = vmatpush1.msra.mxu0 %v6142_v21  ;;  %1509 = vmatpush1.msra.mxu1 %v6147_v22 }
 0x34b   :  { %1439 = vmatprep.subr.mxu0 %v6154_v23  ;;  %1510 = vmatprep.subr.mxu1 %v6159_v24 }
 0x34c   :  { %1440 = vmatpush1.msra.mxu0 %v6164_v25  ;;  %1511 = vmatpush1.msra.mxu1 %v6171_v26 }
 0x34d   :  { %1441 = vmatprep.subr.mxu0 %v6176_v28  ;;  %1512 = vmatprep.subr.mxu1 %v6181_v30 }
 0x34e   :  { %1442 = vmatpush1.msra.mxu0 %v6188_v31  ;;  %1513 = vmatpush1.msra.mxu1 %v6193_v32 }
 0x34f   :  { %1443 = vmatprep.subr.mxu0 %v6198_v33  ;;  %1514 = vmatprep.subr.mxu1 %v6205_v34 }
 0x350   :  { %1444 = vmatpush1.msra.mxu0 %v6210_v35  ;;  %1515 = vmatpush1.msra.mxu1 %v6215_v36 }
 0x351   :  { %1445 = vmatprep.subr.mxu0 %v6222_v37  ;;  %1516 = vmatprep.subr.mxu1 %v6227_v39 }
 0x352   :  { %1446 = vmatpush1.msra.mxu0 %v6234_v40  ;;  %1517 = vmatpush1.msra.mxu1 %v6239_v41 }
 0x353   :  { %1447 = vmatprep.subr.mxu0 %v6246_v42  ;;  %1518 = vmatprep.subr.mxu1 %v6251_v43 }
 0x354   :  { %1448 = vmatpush1.msra.mxu0 %v6258_v44  ;;  %1519 = vmatpush1.msra.mxu1 %v8810_v63 }
 0x355   :  { %1449 = vmatprep.subr.mxu0 %v8811_v51  ;;  %1520 = vmatprep.subr.mxu1 %v8812_v45  ;;  %v8833_v45 = vld [vmem:[#allocation36_spill] sm:$0xff] }
 0x356   :  { %1450 = vmatpush1.msra.mxu0 %v8813_v46  ;;  %1521 = vmatpush1.msra.mxu1 %v8814_v49  ;;  %v8832_v46 = vld [vmem:[#allocation38_spill] sm:$0xff] }
 0x357   :  { %1451 = vmatprep.subr.mxu0 %v8815_v53  ;;  %1522 = vmatprep.subr.mxu1 %v8816_v38 }
 0x358   :  { %1452 = vmatpush1.msra.mxu0 %v8817_v52  ;;  %1523 = vmatpush1.msra.mxu1 %v8818_v62  ;;  %v8828_v62 = vld [vmem:[#allocation7_spill] sm:$0xff] }
 0x359   :  { %1453 = vmatprep.subr.mxu0 %v8819_v54  ;;  %1524 = vmatprep.subr.mxu1 %v8820_v59  ;;  %v8829_v54 = vld [vmem:[#allocation8_spill] sm:$0xff] }
 0x35a   :  { %1454 = vmatpush1.msra.mxu0 %v8821_v1  ;;  %1525 = vmatpush1.msra.mxu1 %v8822_v50  ;;  %v8830_v1 = vld [vmem:[#allocation35_spill] sm:$0xff] }
 0x35b   :  { %1455 = vmatprep.subr.mxu0 %v8823_v61  ;;  %1526 = vmatprep.subr.mxu1 %v8824_v11  ;;  %v8831_v61 = vld [vmem:[#allocation37_spill] sm:$0xff] }
 0x35c   :  { %1456 = vmatpush1.msra.mxu0 %v8825_v27  ;;  %1489 = vmatprep.mubr.f32.mxu0 %v8826_v20 }
 0x35d   :  { %1527 = vmatpush1.msra.mxu1 %v8827_v48  ;;  %1560 = vmatprep.mubr.f32.mxu1 %v8826_v20 }
 0x35e   :  { %1666 = vmatprep.subr.mxu0 %v8828_v62  ;;  %1737 = vmatprep.subr.mxu1 %v8829_v54 }
 0x3fd   :  { %v1250_v59 = vpop.f32.mrf.mxu0  ;;  %v1321_v11 = vpop.f32.mrf.mxu1 }
 0x3fe   :  { %v1326_v52 = vadd.f32 %v1250_v59, %v8830_v1  ;;  %v1328_v20 = vadd.f32 %v1321_v11, %v8833_v45  ;;  %v8840_v11 = vld [vmem:[#allocation14_spill] sm:$0xff] }
 0x3ff   :  { %v1252_v50 = vpop.f32.mrf.mxu0  ;;  %v1323_v49 = vpop.f32.mrf.mxu1 }
 0x400   :  { %v4703_v38 = vmul.f32 -1.442695, %v1326_v52  ;;  %v1327_v53 = vadd.f32 %v1252_v50, %v8831_v61  ;;  %v1329_v48 = vadd.f32 %v1323_v49, %v8832_v46 }
 0x402   :  { %4845 = vpow2.f32 %v4703_v38  ;;  %v4704_v27 = vmul.f32 -1.442695, %v1327_v53  ;;  %v4705_v51 = vmul.f32 -1.442695, %v1329_v48 }
 0x404   :  { %4847 = vpow2.f32 %v4704_v27 }
 0x405   :  { %4849 = vtanh.f32 %v1328_v20  ;;  %v8841_v20 = vld [vmem:[#allocation15_spill] sm:$0xff] }
 0x406   :  { %4851 = vpow2.f32 %v4705_v51  ;;  %v8837_v51 = vld [vmem:[#allocation11_spill] sm:$0xff] }
 0x40f   :  { %v4846_v62 = vpop.eup %4845 }
 0x410   :  { %v1333_v63 = vadd.f32 1.0, %v4846_v62  ;;  %v8838_v62 = vld [vmem:[#allocation12_spill] sm:$0xff] }
 0x411   :  { %v4848_v54 = vpop.eup %4847 }
 0x412   :  { %4853 = vrcp.f32 %v1333_v63  ;;  %v1339_v59 = vadd.f32 1.0, %v4848_v54  ;;  %v4850_v52 = vpop.eup %4849  ;;  %v8836_v63 = vld [vmem:[#allocation10_spill] sm:$0xff]  ;;  %v8839_v54 = vld [vmem:[#allocation13_spill] sm:$0xff] }
 0x413   :  { %v4852_v1 = vpop.eup %4851 }
 0x414   :  { %4855 = vrcp.f32 %v1339_v59  ;;  %v1346_v61 = vadd.f32 1.0, %v4852_v1  ;;  %v8842_v59 = vld [vmem:[#allocation16_spill] sm:$0xff]  ;;  %v8844_v1 = vld [vmem:[#allocation18_spill] sm:$0xff] }
 0x416   :  { %4857 = vrcp.f32 %v1346_v61  ;;  %v8848_v61 = vld [vmem:[#allocation22_spill] sm:$0xff] }
 0x41f   :  { %v4854_v38 = vpop.eup %4853 }
 0x420   :  { %v1350_v50 = vmul.f32 %v4854_v38, %v4850_v52  ;;  %v8843_v52 = vld [vmem:[#allocation17_spill] sm:$0xff]  ;;  %v8845_v38 = vld [vmem:[#allocation19_spill] sm:$0xff] }
 0x421   :  { %v4856_v53 = vpop.eup %4855 }
 0x422   :  { %v1349_v27 = vmul.f32 %v4856_v53, %v6374_v47  ;;  %v8835_v47 = vld [vmem:[#allocation9_spill] sm:$0xff] }
 0x423   :  { %v4858_v48 = vpop.eup %4857  ;;  %v8847_v53 = vld [vmem:[#allocation21_spill] sm:$0xff] }
 0x424   :  { %v6452_v46 = vadd.f32 %v1350_v50, %v1349_v27  ;;  %v8846_v50 = vld [vmem:[#allocation20_spill] sm:$0xff]  ;;  %v8849_v27 = vld [vmem:[#allocation23_spill] sm:$0xff] }
 0x426   :  { %4859 = vtanh.f32 %v6452_v46 }
 0x433   :  { %v4860_v45 = vpop.eup %4859 }
 0x434   :  { %v6455_v49 = vmul.f32 %v4860_v45, %v4858_v48  ;;  %v8850_v48 = vld [vmem:[#allocation24_spill] sm:$0xff]  ;;  %v8851_v45 = vmov 0.0  }
 0x436   :  { %8834 = vst [vmem:[#allocation29_spill] sm:$0xff] %v6455_v49  ;;  %1490 = vmatmul.mubr.f32.vlgmr.msra.gmra.mxu0 %v6455_v49  ;;  %1561 = vmatmul.mubr.f32.vlgmr.msra.gmra.mxu1 %v6455_v49  ;;  %v8852_v49 = vld [vmem:[#allocation25_spill] sm:$0xff] }
 0x437   :  { %1667 = vmatpush1.msra.mxu0 %v5998_v55  ;;  %1738 = vmatpush1.msra.mxu1 %v6003_v29 }
 0x438   :  { %1668 = vmatprep.subr.mxu0 %v6010_v3  ;;  %1739 = vmatprep.subr.mxu1 %v6015_v57 }
 0x439   :  { %1669 = vmatpush1.msra.mxu0 %v6022_v56  ;;  %1740 = vmatpush1.msra.mxu1 %v6027_v60 }
 0x43a   :  { %1670 = vmatprep.subr.mxu0 %v6034_v2  ;;  %1741 = vmatprep.subr.mxu1 %v6039_v4 }
 0x43b   :  { %1671 = vmatpush1.msra.mxu0 %v6046_v58  ;;  %1742 = vmatpush1.msra.mxu1 %v6051_v0 }
 0x43c   :  { %1672 = vmatprep.subr.mxu0 %v6058_v5  ;;  %1743 = vmatprep.subr.mxu1 %v6063_v6 }
 0x43d   :  { %1673 = vmatpush1.msra.mxu0 %v6070_v7  ;;  %1744 = vmatpush1.msra.mxu1 %v6075_v8 }
 0x43e   :  { %1674 = vmatprep.subr.mxu0 %v6082_v9  ;;  %1745 = vmatprep.subr.mxu1 %v6087_v10 }
 0x43f   :  { %1675 = vmatpush1.msra.mxu0 %v6094_v12  ;;  %1746 = vmatpush1.msra.mxu1 %v6099_v13 }
 0x440   :  { %1676 = vmatprep.subr.mxu0 %v6106_v14  ;;  %1747 = vmatprep.subr.mxu1 %v6111_v15 }
 0x441   :  { %1677 = vmatpush1.msra.mxu0 %v6118_v16  ;;  %1748 = vmatpush1.msra.mxu1 %v6123_v17 }
 0x442   :  { %1678 = vmatprep.subr.mxu0 %v6130_v18  ;;  %1749 = vmatprep.subr.mxu1 %v6135_v19 }
 0x443   :  { %1679 = vmatpush1.msra.mxu0 %v6142_v21  ;;  %1750 = vmatpush1.msra.mxu1 %v6147_v22 }
 0x444   :  { %1680 = vmatprep.subr.mxu0 %v6154_v23  ;;  %1751 = vmatprep.subr.mxu1 %v6159_v24 }
 0x445   :  { %1681 = vmatpush1.msra.mxu0 %v6164_v25  ;;  %1752 = vmatpush1.msra.mxu1 %v6171_v26 }
 0x446   :  { %1682 = vmatprep.subr.mxu0 %v6176_v28  ;;  %1753 = vmatprep.subr.mxu1 %v6181_v30 }
 0x447   :  { %1683 = vmatpush1.msra.mxu0 %v6188_v31  ;;  %1754 = vmatpush1.msra.mxu1 %v6193_v32 }
 0x448   :  { %1684 = vmatprep.subr.mxu0 %v6198_v33  ;;  %1755 = vmatprep.subr.mxu1 %v6205_v34 }
 0x449   :  { %1685 = vmatpush1.msra.mxu0 %v6210_v35  ;;  %1756 = vmatpush1.msra.mxu1 %v6215_v36 }
 0x44a   :  { %1686 = vmatprep.subr.mxu0 %v6222_v37  ;;  %1757 = vmatprep.subr.mxu1 %v6227_v39 }
 0x44b   :  { %1687 = vmatpush1.msra.mxu0 %v6234_v40  ;;  %1758 = vmatpush1.msra.mxu1 %v6239_v41 }
 0x44c   :  { %1688 = vmatprep.subr.mxu0 %v6246_v42  ;;  %1759 = vmatprep.subr.mxu1 %v6251_v43 }
 0x44d   :  { %1689 = vmatpush1.msra.mxu0 %v6258_v44  ;;  %1760 = vmatpush1.msra.mxu1 %v8835_v47 }
 0x44e   :  { %1690 = vmatprep.subr.mxu0 %v8836_v63  ;;  %1761 = vmatprep.subr.mxu1 %v8837_v51  ;;  %v8858_v51 = vld [vmem:[#allocation40_spill] sm:$0xff] }
 0x44f   :  { %1691 = vmatpush1.msra.mxu0 %v8838_v62  ;;  %1762 = vmatpush1.msra.mxu1 %v8839_v54  ;;  %v8857_v62 = vld [vmem:[#allocation42_spill] sm:$0xff] }
 0x450   :  { %1692 = vmatprep.subr.mxu0 %v8840_v11  ;;  %1763 = vmatprep.subr.mxu1 %v8841_v20 }
 0x451   :  { %1693 = vmatpush1.msra.mxu0 %v8842_v59  ;;  %1764 = vmatpush1.msra.mxu1 %v8843_v52  ;;  %v8853_v52 = vld [vmem:[#allocation7_spill] sm:$0xff] }
 0x452   :  { %1694 = vmatprep.subr.mxu0 %v8844_v1  ;;  %1765 = vmatprep.subr.mxu1 %v8845_v38  ;;  %v8854_v1 = vld [vmem:[#allocation8_spill] sm:$0xff] }
 0x453   :  { %1695 = vmatpush1.msra.mxu0 %v8846_v50  ;;  %1766 = vmatpush1.msra.mxu1 %v8847_v53  ;;  %v8855_v50 = vld [vmem:[#allocation39_spill] sm:$0xff] }
 0x454   :  { %1696 = vmatprep.subr.mxu0 %v8848_v61  ;;  %1767 = vmatprep.subr.mxu1 %v8849_v27  ;;  %v8856_v61 = vld [vmem:[#allocation41_spill] sm:$0xff] }
 0x455   :  { %1697 = vmatpush1.msra.mxu0 %v8850_v48  ;;  %1730 = vmatprep.mubr.f32.mxu0 %v8851_v45 }
 0x456   :  { %1768 = vmatpush1.msra.mxu1 %v8852_v49  ;;  %1801 = vmatprep.mubr.f32.mxu1 %v8851_v45 }
 0x457   :  { %1907 = vmatprep.subr.mxu0 %v8853_v52  ;;  %1978 = vmatprep.subr.mxu1 %v8854_v1 }
 0x4f6   :  { %v1491_v38 = vpop.f32.mrf.mxu0  ;;  %v1562_v27 = vpop.f32.mrf.mxu1 }
 0x4f7   :  { %v1567_v59 = vadd.f32 %v1491_v38, %v8855_v50  ;;  %v1569_v45 = vadd.f32 %v1562_v27, %v8858_v51  ;;  %v2145_v27 = vld [vmem:[%s8516_s2 + $0x1e8] sm:$0xff] }
 0x4f8   :  { %v1493_v53 = vpop.f32.mrf.mxu0  ;;  %v1564_v54 = vpop.f32.mrf.mxu1 }
 0x4f9   :  { %v4706_v20 = vmul.f32 -1.442695, %v1567_v59  ;;  %v1568_v11 = vadd.f32 %v1493_v53, %v8856_v61  ;;  %v1570_v49 = vadd.f32 %v1564_v54, %v8857_v62 }
 0x4fb   :  { %4861 = vpow2.f32 %v4706_v20  ;;  %v4707_v48 = vmul.f32 -1.442695, %v1568_v11  ;;  %v4708_v63 = vmul.f32 -1.442695, %v1570_v49 }
 0x4fd   :  { %4863 = vpow2.f32 %v4707_v48 }
 0x4fe   :  { %4865 = vtanh.f32 %v1569_v45  ;;  %v2147_v45 = vld [vmem:[%s8516_s2 + $0x1f8] sm:$0xff] }
 0x4ff   :  { %4867 = vpow2.f32 %v4708_v63 }
 0x508   :  { %v4862_v52 = vpop.eup %4861 }
 0x509   :  { %v1574_v47 = vadd.f32 1.0, %v4862_v52  ;;  %v2144_v52 = vld [vmem:[%s8516_s2 + $0x1e0] sm:$0xff] }
 0x50a   :  { %v4864_v1 = vpop.eup %4863 }
 0x50b   :  { %4869 = vrcp.f32 %v1574_v47  ;;  %v1580_v38 = vadd.f32 1.0, %v4864_v1  ;;  %v4866_v59 = vpop.eup %4865  ;;  %v2146_v1 = vld [vmem:[%s8516_s2 + $0x1f0] sm:$0xff] }
 0x50c   :  { %v4868_v50 = vpop.eup %4867 }
 0x50d   :  { %4871 = vrcp.f32 %v1580_v38  ;;  %v1587_v61 = vadd.f32 1.0, %v4868_v50  ;;  %v2141_v38 = vld [vmem:[%s8516_s2 + $0x1c8] sm:$0xff]  ;;  %v2140_v50 = vld [vmem:[%s8516_s2 + $0x1c0] sm:$0xff] }
 0x50f   :  { %4873 = vrcp.f32 %v1587_v61  ;;  %v2136_v61 = vld [vmem:[%s8516_s2 + $0x1a0] sm:$0xff] }
 0x518   :  { %v4870_v20 = vpop.eup %4869 }
 0x519   :  { %v1591_v53 = vmul.f32 %v4870_v20, %v4866_v59  ;;  %v2143_v59 = vld [vmem:[%s8516_s2 + $0x1d8] sm:$0xff]  ;;  %v2142_v20 = vld [vmem:[%s8516_s2 + $0x1d0] sm:$0xff] }
 0x51a   :  { %v4872_v11 = vpop.eup %4871 }
 0x51b   :  { %v1590_v48 = vmul.f32 %v4872_v11, %v6452_v46  ;;  %v2139_v11 = vld [vmem:[%s8516_s2 + $0x1b8] sm:$0xff] }
 0x51c   :  { %v4874_v49 = vpop.eup %4873 }
 0x51d   :  { %v6530_v62 = vadd.f32 %v1591_v53, %v1590_v48  ;;  %v2137_v53 = vld [vmem:[%s8516_s2 + $0x1a8] sm:$0xff]  ;;  %v2138_v48 = vld [vmem:[%s8516_s2 + $0x1b0] sm:$0xff] }
 0x51f   :  { %4875 = vtanh.f32 %v6530_v62 }
 0x52c   :  { %v4876_v51 = vpop.eup %4875 }
 0x52d   :  { %v6533_v54 = vmul.f32 %v4876_v51, %v4874_v49  ;;  %v2135_v49 = vld [vmem:[%s8516_s2 + $0x198] sm:$0xff]  ;;  %v2132_v51 = vld [vmem:[%s8516_s2 + $0x180] sm:$0xff] }
 0x52f   :  { %1731 = vmatmul.mubr.f32.vlgmr.msra.gmra.mxu0 %v6533_v54  ;;  %1802 = vmatmul.mubr.f32.vlgmr.msra.gmra.mxu1 %v6533_v54 }
 0x530   :  { %1908 = vmatpush1.msra.mxu0 %v5998_v55  ;;  %1979 = vmatpush1.msra.mxu1 %v6003_v29  ;;  %v8859_v55 = vld [vmem:[#allocation9_spill] sm:$0xff]  ;;  %v8860_v29 = vld [vmem:[#allocation10_spill] sm:$0xff] }
 0x531   :  { %1909 = vmatprep.subr.mxu0 %v6010_v3  ;;  %1980 = vmatprep.subr.mxu1 %v6015_v57  ;;  %v8861_v3 = vld [vmem:[#allocation11_spill] sm:$0xff]  ;;  %v8862_v57 = vld [vmem:[#allocation12_spill] sm:$0xff] }
 0x532   :  { %1910 = vmatpush1.msra.mxu0 %v6022_v56  ;;  %1981 = vmatpush1.msra.mxu1 %v6027_v60  ;;  %v8863_v56 = vld [vmem:[#allocation13_spill] sm:$0xff]  ;;  %v8864_v60 = vld [vmem:[#allocation14_spill] sm:$0xff] }
 0x533   :  { %1911 = vmatprep.subr.mxu0 %v6034_v2  ;;  %1982 = vmatprep.subr.mxu1 %v6039_v4  ;;  %v8865_v2 = vld [vmem:[#allocation15_spill] sm:$0xff]  ;;  %v8866_v4 = vld [vmem:[#allocation16_spill] sm:$0xff] }
 0x534   :  { %1912 = vmatpush1.msra.mxu0 %v6046_v58  ;;  %1983 = vmatpush1.msra.mxu1 %v6051_v0  ;;  %v8867_v58 = vld [vmem:[#allocation17_spill] sm:$0xff]  ;;  %v8868_v0 = vld [vmem:[#allocation18_spill] sm:$0xff] }
 0x535   :  { %1913 = vmatprep.subr.mxu0 %v6058_v5  ;;  %1984 = vmatprep.subr.mxu1 %v6063_v6  ;;  %v8869_v5 = vld [vmem:[#allocation19_spill] sm:$0xff]  ;;  %v8870_v6 = vld [vmem:[#allocation20_spill] sm:$0xff] }
 0x536   :  { %1914 = vmatpush1.msra.mxu0 %v6070_v7  ;;  %1985 = vmatpush1.msra.mxu1 %v6075_v8  ;;  %v8871_v7 = vld [vmem:[#allocation21_spill] sm:$0xff]  ;;  %v8872_v8 = vld [vmem:[#allocation22_spill] sm:$0xff] }
 0x537   :  { %1915 = vmatprep.subr.mxu0 %v6082_v9  ;;  %1986 = vmatprep.subr.mxu1 %v6087_v10  ;;  %v8873_v9 = vld [vmem:[#allocation23_spill] sm:$0xff]  ;;  %v8874_v10 = vld [vmem:[#allocation24_spill] sm:$0xff] }
 0x538   :  { %1916 = vmatpush1.msra.mxu0 %v6094_v12  ;;  %1987 = vmatpush1.msra.mxu1 %v6099_v13  ;;  %v8875_v12 = vmov 0.0   ;;  %v8876_v13 = vld [vmem:[#allocation25_spill] sm:$0xff] }
 0x539   :  { %1917 = vmatprep.subr.mxu0 %v6106_v14  ;;  %1988 = vmatprep.subr.mxu1 %v6111_v15  ;;  %v8877_v15 = vld [vmem:[#allocation43_spill] sm:$0xff] }
 0x53a   :  { %1918 = vmatpush1.msra.mxu0 %v6118_v16  ;;  %1989 = vmatpush1.msra.mxu1 %v6123_v17 }
 0x53b   :  { %1919 = vmatprep.subr.mxu0 %v6130_v18  ;;  %1990 = vmatprep.subr.mxu1 %v6135_v19  ;;  %v8878_v19 = vld [vmem:[#allocation45_spill] sm:$0xff] }
 0x53c   :  { %1920 = vmatpush1.msra.mxu0 %v6142_v21  ;;  %1991 = vmatpush1.msra.mxu1 %v6147_v22 }
 0x53d   :  { %1921 = vmatprep.subr.mxu0 %v6154_v23  ;;  %1992 = vmatprep.subr.mxu1 %v6159_v24 }
 0x53e   :  { %1922 = vmatpush1.msra.mxu0 %v6164_v25  ;;  %1993 = vmatpush1.msra.mxu1 %v6171_v26  ;;  %v8879_v25 = vld [vmem:[#allocation46_spill] sm:$0xff] }
 0x53f   :  { %1923 = vmatprep.subr.mxu0 %v6176_v28  ;;  %1994 = vmatprep.subr.mxu1 %v6181_v30  ;;  %v8880_v28 = vld [vmem:[#allocation44_spill] sm:$0xff] }
 0x540   :  { %1924 = vmatpush1.msra.mxu0 %v6188_v31  ;;  %1995 = vmatpush1.msra.mxu1 %v6193_v32 }
 0x541   :  { %1925 = vmatprep.subr.mxu0 %v6198_v33  ;;  %1996 = vmatprep.subr.mxu1 %v6205_v34 }
 0x542   :  { %1926 = vmatpush1.msra.mxu0 %v6210_v35  ;;  %1997 = vmatpush1.msra.mxu1 %v6215_v36 }
 0x543   :  { %1927 = vmatprep.subr.mxu0 %v6222_v37  ;;  %1998 = vmatprep.subr.mxu1 %v6227_v39 }
 0x544   :  { %1928 = vmatpush1.msra.mxu0 %v6234_v40  ;;  %1999 = vmatpush1.msra.mxu1 %v6239_v41 }
 0x545   :  { %1929 = vmatprep.subr.mxu0 %v6246_v42  ;;  %2000 = vmatprep.subr.mxu1 %v6251_v43 }
 0x546   :  { %1930 = vmatpush1.msra.mxu0 %v6258_v44  ;;  %2001 = vmatpush1.msra.mxu1 %v8859_v55  ;;  %v2134_v55 = vld [vmem:[%s8516_s2 + $0x190] sm:$0xff] }
 0x547   :  { %1931 = vmatprep.subr.mxu0 %v8860_v29  ;;  %2002 = vmatprep.subr.mxu1 %v8861_v3  ;;  %v2129_v29 = vld [vmem:[%s8516_s2 + $0x168] sm:$0xff]  ;;  %v2131_v3 = vld [vmem:[%s8516_s2 + $0x178] sm:$0xff] }
 0x548   :  { %1932 = vmatpush1.msra.mxu0 %v8862_v57  ;;  %2003 = vmatpush1.msra.mxu1 %v8863_v56  ;;  %v2128_v57 = vld [vmem:[%s8516_s2 + $0x160] sm:$0xff]  ;;  %v2130_v56 = vld [vmem:[%s8516_s2 + $0x170] sm:$0xff] }
 0x549   :  { %1933 = vmatprep.subr.mxu0 %v8864_v60  ;;  %2004 = vmatprep.subr.mxu1 %v8865_v2  ;;  %v2125_v60 = vld [vmem:[%s8516_s2 + $0x148] sm:$0xff]  ;;  %v2127_v2 = vld [vmem:[%s8516_s2 + $0x158] sm:$0xff] }
 0x54a   :  { %1934 = vmatpush1.msra.mxu0 %v8866_v4  ;;  %2005 = vmatpush1.msra.mxu1 %v8867_v58  ;;  %v2124_v4 = vld [vmem:[%s8516_s2 + $0x140] sm:$0xff]  ;;  %v2126_v58 = vld [vmem:[%s8516_s2 + $0x150] sm:$0xff] }
 0x54b   :  { %1935 = vmatprep.subr.mxu0 %v8868_v0  ;;  %2006 = vmatprep.subr.mxu1 %v8869_v5  ;;  %v2121_v0 = vld [vmem:[%s8516_s2 + $0x128] sm:$0xff]  ;;  %v2123_v5 = vld [vmem:[%s8516_s2 + $0x138] sm:$0xff] }
 0x54c   :  { %1936 = vmatpush1.msra.mxu0 %v8870_v6  ;;  %2007 = vmatpush1.msra.mxu1 %v8871_v7  ;;  %v2120_v6 = vld [vmem:[%s8516_s2 + $0x120] sm:$0xff]  ;;  %v2122_v7 = vld [vmem:[%s8516_s2 + $0x130] sm:$0xff] }
 0x54d   :  { %1937 = vmatprep.subr.mxu0 %v8872_v8  ;;  %2008 = vmatprep.subr.mxu1 %v8873_v9  ;;  %v2117_v8 = vld [vmem:[%s8516_s2 + $0x108] sm:$0xff]  ;;  %v2119_v9 = vld [vmem:[%s8516_s2 + $0x118] sm:$0xff] }
 0x54e   :  { %1938 = vmatpush1.msra.mxu0 %v8874_v10  ;;  %1971 = vmatprep.mubr.f32.mxu0 %v8875_v12  ;;  %v2116_v10 = vld [vmem:[%s8516_s2 + $0x100] sm:$0xff] }
 0x54f   :  { %2009 = vmatpush1.msra.mxu1 %v8876_v13  ;;  %2042 = vmatprep.mubr.f32.mxu1 %v8875_v12  ;;  %v2118_v13 = vld [vmem:[%s8516_s2 + $0x110] sm:$0xff] }
 0x550   :  { %2148 = vmatprep.subr.mxu0 %v2145_v27  ;;  %2219 = vmatprep.subr.mxu1 %v2147_v45  ;;  %v2085_v27 = vld [vmem:[%s8516_s2 + $0x8] sm:$0xff]  ;;  %v2087_v45 = vld [vmem:[%s8516_s2 + $0x18] sm:$0xff] }
 0x5ef   :  { %v1732_v14 = vpop.f32.mrf.mxu0  ;;  %v1803_v22 = vpop.f32.mrf.mxu1 }
 0x5f0   :  { %v1808_v16 = vadd.f32 %v1732_v14, %v8877_v15  ;;  %v1810_v30 = vadd.f32 %v1803_v22, %v8880_v28  ;;  %v2113_v14 = vld [vmem:[%s8516_s2 + $0xe8] sm:$0xff]  ;;  %v2115_v15 = vld [vmem:[%s8516_s2 + $0xf8] sm:$0xff]  ;;  %v2110_v22 = vld [vmem:[%s8516_s2 + $0xd0] sm:$0xff] }
 0x5f1   :  { %v1734_v17 = vpop.f32.mrf.mxu0  ;;  %v1805_v24 = vpop.f32.mrf.mxu1  ;;  %v2101_v28 = vld [vmem:[%s8516_s2 + $0x88] sm:$0xff] }
 0x5f2   :  { %v4709_v18 = vmul.f32 -1.442695, %v1808_v16  ;;  %v1809_v21 = vadd.f32 %v1734_v17, %v8878_v19  ;;  %v1811_v26 = vadd.f32 %v1805_v24, %v8879_v25  ;;  %v2112_v16 = vld [vmem:[%s8516_s2 + $0xe0] sm:$0xff]  ;;  %v2114_v17 = vld [vmem:[%s8516_s2 + $0xf0] sm:$0xff]  ;;  %v2111_v19 = vld [vmem:[%s8516_s2 + $0xd8] sm:$0xff] }
 0x5f3   :  { %v2107_v24 = vld [vmem:[%s8516_s2 + $0xb8] sm:$0xff]  ;;  %v2104_v25 = vld [vmem:[%s8516_s2 + $0xa0] sm:$0xff] }
 0x5f4   :  { %4877 = vpow2.f32 %v4709_v18  ;;  %v4710_v23 = vmul.f32 -1.442695, %v1809_v21  ;;  %v4711_v31 = vmul.f32 -1.442695, %v1811_v26  ;;  %v2109_v18 = vld [vmem:[%s8516_s2 + $0xc8] sm:$0xff]  ;;  %v2108_v21 = vld [vmem:[%s8516_s2 + $0xc0] sm:$0xff] }
 0x5f5   :  { %v2106_v26 = vld [vmem:[%s8516_s2 + $0xb0] sm:$0xff] }
 0x5f6   :  { %4879 = vpow2.f32 %v4710_v23  ;;  %v2105_v23 = vld [vmem:[%s8516_s2 + $0xa8] sm:$0xff] }
 0x5f7   :  { %4881 = vtanh.f32 %v1810_v30  ;;  %v2103_v30 = vld [vmem:[%s8516_s2 + $0x98] sm:$0xff] }
 0x5f8   :  { %4883 = vpow2.f32 %v4711_v31  ;;  %v2100_v31 = vld [vmem:[%s8516_s2 + $0x80] sm:$0xff] }
 0x601   :  { %v4878_v32 = vpop.eup %4877 }
 0x602   :  { %v1815_v33 = vadd.f32 1.0, %v4878_v32  ;;  %v2102_v32 = vld [vmem:[%s8516_s2 + $0x90] sm:$0xff] }
 0x603   :  { %v4880_v34 = vpop.eup %4879 }
 0x604   :  { %4885 = vrcp.f32 %v1815_v33  ;;  %v1821_v35 = vadd.f32 1.0, %v4880_v34  ;;  %v4882_v36 = vpop.eup %4881  ;;  %v2097_v33 = vld [vmem:[%s8516_s2 + $0x68] sm:$0xff]  ;;  %v2099_v34 = vld [vmem:[%s8516_s2 + $0x78] sm:$0xff] }
 0x605   :  { %v4884_v37 = vpop.eup %4883 }
 0x606   :  { %4887 = vrcp.f32 %v1821_v35  ;;  %v1828_v42 = vadd.f32 1.0, %v4884_v37  ;;  %v2096_v35 = vld [vmem:[%s8516_s2 + $0x60] sm:$0xff]  ;;  %v2093_v37 = vld [vmem:[%s8516_s2 + $0x48] sm:$0xff] }
 0x608   :  { %4889 = vrcp.f32 %v1828_v42  ;;  %v2089_v42 = vld [vmem:[%s8516_s2 + $0x28] sm:$0xff] }
 0x611   :  { %v4886_v39 = vpop.eup %4885 }
 0x612   :  { %v1832_v40 = vmul.f32 %v4886_v39, %v4882_v36  ;;  %v2098_v36 = vld [vmem:[%s8516_s2 + $0x70] sm:$0xff]  ;;  %v2095_v39 = vld [vmem:[%s8516_s2 + $0x58] sm:$0xff] }
 0x613   :  { %v4888_v41 = vpop.eup %4887 }
 0x614   :  { %v1831_v43 = vmul.f32 %v4888_v41, %v6530_v62  ;;  %v2133_v62 = vld [vmem:[%s8516_s2 + $0x188] sm:$0xff]  ;;  %v2094_v41 = vld [vmem:[%s8516_s2 + $0x50] sm:$0xff] }
 0x615   :  { %v4890_v46 = vpop.eup %4889 }
 0x616   :  { %v6606_v44 = vadd.f32 %v1832_v40, %v1831_v43  ;;  %v2092_v40 = vld [vmem:[%s8516_s2 + $0x40] sm:$0xff]  ;;  %v2091_v43 = vld [vmem:[%s8516_s2 + $0x38] sm:$0xff] }
 0x618   :  { %4891 = vtanh.f32 %v6606_v44 }
 0x625   :  { %v4892_v47 = vpop.eup %4891 }
 0x626   :  { %v6609_v63 = vmul.f32 %v4892_v47, %v4890_v46  ;;  %v2088_v46 = vld [vmem:[%s8516_s2 + $0x20] sm:$0xff]  ;;  %v2090_v47 = vld [vmem:[%s8516_s2 + $0x30] sm:$0xff] }
 0x628   :  { %1972 = vmatmul.mubr.f32.vlgmr.msra.gmra.mxu0 %v6609_v63  ;;  %2043 = vmatmul.mubr.f32.vlgmr.msra.gmra.mxu1 %v6609_v63 }
 0x629   :  { %2212 = vmatprep.mubr.f32.mxu0 %v8875_v12  ;;  %2283 = vmatprep.mubr.f32.mxu1 %v8875_v12 }
 0x62a   :  { %2149 = vmatpush1.msra.mxu0 %v2144_v52  ;;  %2220 = vmatpush1.msra.mxu1 %v2146_v1  ;;  %v2084_v52 = vld [vmem:[%s8516_s2] sm:$0xff]  ;;  %v2086_v1 = vld [vmem:[%s8516_s2 + $0x10] sm:$0xff] }
 0x62b   :  { %2150 = vmatprep.subr.mxu0 %v2141_v38  ;;  %2221 = vmatprep.subr.mxu1 %v2143_v59  ;;  %v2391_v38 = vld [vmem:[%s8518_s4 + $0x1e8] sm:$0xff]  ;;  %v2393_v59 = vld [vmem:[%s8518_s4 + $0x1f8] sm:$0xff] }
 0x62c   :  { %2151 = vmatpush1.msra.mxu0 %v2140_v50  ;;  %2222 = vmatpush1.msra.mxu1 %v2142_v20  ;;  %v8881_v20 = vld [vmem:[#allocation47_spill] sm:$0xff] }
 0x62d   :  { %2152 = vmatprep.subr.mxu0 %v2137_v53  ;;  %2223 = vmatprep.subr.mxu1 %v2139_v11 }
 0x62e   :  { %2153 = vmatpush1.msra.mxu0 %v2136_v61  ;;  %2224 = vmatpush1.msra.mxu1 %v2138_v48  ;;  %v8882_v48 = vld [vmem:[#allocation49_spill] sm:$0xff] }
 0x62f   :  { %2154 = vmatprep.subr.mxu0 %v2133_v62  ;;  %2225 = vmatprep.subr.mxu1 %v2135_v49 }
 0x630   :  { %2155 = vmatpush1.msra.mxu0 %v2132_v51  ;;  %2226 = vmatpush1.msra.mxu1 %v2134_v55 }
 0x631   :  { %2156 = vmatprep.subr.mxu0 %v2129_v29  ;;  %2227 = vmatprep.subr.mxu1 %v2131_v3  ;;  %v8883_v29 = vld [vmem:[#allocation50_spill] sm:$0xff] }
 0x632   :  { %2157 = vmatpush1.msra.mxu0 %v2128_v57  ;;  %2228 = vmatpush1.msra.mxu1 %v2130_v56  ;;  %v8884_v57 = vld [vmem:[#allocation48_spill] sm:$0xff] }
 0x633   :  { %2158 = vmatprep.subr.mxu0 %v2125_v60  ;;  %2229 = vmatprep.subr.mxu1 %v2127_v2 }
 0x634   :  { %2159 = vmatpush1.msra.mxu0 %v2124_v4  ;;  %2230 = vmatpush1.msra.mxu1 %v2126_v58 }
 0x635   :  { %2160 = vmatprep.subr.mxu0 %v2121_v0  ;;  %2231 = vmatprep.subr.mxu1 %v2123_v5 }
 0x636   :  { %2161 = vmatpush1.msra.mxu0 %v2120_v6  ;;  %2232 = vmatpush1.msra.mxu1 %v2122_v7 }
 0x637   :  { %2162 = vmatprep.subr.mxu0 %v2117_v8  ;;  %2233 = vmatprep.subr.mxu1 %v2119_v9 }
 0x638   :  { %2163 = vmatpush1.msra.mxu0 %v2116_v10  ;;  %2234 = vmatpush1.msra.mxu1 %v2118_v13 }
 0x639   :  { %2164 = vmatprep.subr.mxu0 %v2113_v14  ;;  %2235 = vmatprep.subr.mxu1 %v2115_v15 }
 0x63a   :  { %2165 = vmatpush1.msra.mxu0 %v2112_v16  ;;  %2236 = vmatpush1.msra.mxu1 %v2114_v17 }
 0x63b   :  { %2166 = vmatprep.subr.mxu0 %v2109_v18  ;;  %2237 = vmatprep.subr.mxu1 %v2111_v19  ;;  %v2390_v18 = vld [vmem:[%s8518_s4 + $0x1e0] sm:$0xff]  ;;  %v2392_v19 = vld [vmem:[%s8518_s4 + $0x1f0] sm:$0xff] }
 0x63c   :  { %2167 = vmatpush1.msra.mxu0 %v2108_v21  ;;  %2238 = vmatpush1.msra.mxu1 %v2110_v22  ;;  %v2389_v21 = vld [vmem:[%s8518_s4 + $0x1d8] sm:$0xff]  ;;  %v2386_v22 = vld [vmem:[%s8518_s4 + $0x1c0] sm:$0xff] }
 0x63d   :  { %2168 = vmatprep.subr.mxu0 %v2105_v23  ;;  %2239 = vmatprep.subr.mxu1 %v2107_v24  ;;  %v2388_v23 = vld [vmem:[%s8518_s4 + $0x1d0] sm:$0xff]  ;;  %v2383_v24 = vld [vmem:[%s8518_s4 + $0x1a8] sm:$0xff] }
 0x63e   :  { %2169 = vmatpush1.msra.mxu0 %v2104_v25  ;;  %2240 = vmatpush1.msra.mxu1 %v2106_v26  ;;  %v2385_v25 = vld [vmem:[%s8518_s4 + $0x1b8] sm:$0xff]  ;;  %v2382_v26 = vld [vmem:[%s8518_s4 + $0x1a0] sm:$0xff] }
 0x63f   :  { %2170 = vmatprep.subr.mxu0 %v2101_v28  ;;  %2241 = vmatprep.subr.mxu1 %v2103_v30  ;;  %v2384_v28 = vld [vmem:[%s8518_s4 + $0x1b0] sm:$0xff]  ;;  %v2379_v30 = vld [vmem:[%s8518_s4 + $0x188] sm:$0xff] }
 0x640   :  { %2171 = vmatpush1.msra.mxu0 %v2100_v31  ;;  %2242 = vmatpush1.msra.mxu1 %v2102_v32  ;;  %v2381_v31 = vld [vmem:[%s8518_s4 + $0x198] sm:$0xff]  ;;  %v2378_v32 = vld [vmem:[%s8518_s4 + $0x180] sm:$0xff] }
 0x641   :  { %2172 = vmatprep.subr.mxu0 %v2097_v33  ;;  %2243 = vmatprep.subr.mxu1 %v2099_v34  ;;  %v2380_v33 = vld [vmem:[%s8518_s4 + $0x190] sm:$0xff]  ;;  %v2375_v34 = vld [vmem:[%s8518_s4 + $0x168] sm:$0xff] }
 0x642   :  { %2173 = vmatpush1.msra.mxu0 %v2096_v35  ;;  %2244 = vmatpush1.msra.mxu1 %v2098_v36  ;;  %v2377_v35 = vld [vmem:[%s8518_s4 + $0x178] sm:$0xff]  ;;  %v2374_v36 = vld [vmem:[%s8518_s4 + $0x160] sm:$0xff] }
 0x643   :  { %2174 = vmatprep.subr.mxu0 %v2093_v37  ;;  %2245 = vmatprep.subr.mxu1 %v2095_v39  ;;  %v2376_v37 = vld [vmem:[%s8518_s4 + $0x170] sm:$0xff]  ;;  %v2371_v39 = vld [vmem:[%s8518_s4 + $0x148] sm:$0xff] }
 0x644   :  { %2175 = vmatpush1.msra.mxu0 %v2092_v40  ;;  %2246 = vmatpush1.msra.mxu1 %v2094_v41  ;;  %v2373_v40 = vld [vmem:[%s8518_s4 + $0x158] sm:$0xff]  ;;  %v2370_v41 = vld [vmem:[%s8518_s4 + $0x140] sm:$0xff] }
 0x645   :  { %2176 = vmatprep.subr.mxu0 %v2089_v42  ;;  %2247 = vmatprep.subr.mxu1 %v2091_v43  ;;  %v2372_v42 = vld [vmem:[%s8518_s4 + $0x150] sm:$0xff]  ;;  %v2367_v43 = vld [vmem:[%s8518_s4 + $0x128] sm:$0xff] }
 0x646   :  { %2177 = vmatpush1.msra.mxu0 %v2088_v46  ;;  %2248 = vmatpush1.msra.mxu1 %v2090_v47  ;;  %v2369_v46 = vld [vmem:[%s8518_s4 + $0x138] sm:$0xff]  ;;  %v2366_v47 = vld [vmem:[%s8518_s4 + $0x120] sm:$0xff] }
 0x647   :  { %2178 = vmatprep.subr.mxu0 %v2085_v27  ;;  %2249 = vmatprep.subr.mxu1 %v2087_v45  ;;  %v2368_v27 = vld [vmem:[%s8518_s4 + $0x130] sm:$0xff]  ;;  %v2363_v45 = vld [vmem:[%s8518_s4 + $0x108] sm:$0xff] }
 0x648   :  { %2179 = vmatpush1.msra.mxu0 %v2084_v52  ;;  %2250 = vmatpush1.msra.mxu1 %v2086_v1  ;;  %v2365_v52 = vld [vmem:[%s8518_s4 + $0x118] sm:$0xff]  ;;  %v2362_v1 = vld [vmem:[%s8518_s4 + $0x100] sm:$0xff] }
 0x649   :  { %2416 = vmatprep.subr.mxu0 %v2391_v38  ;;  %2529 = vmatprep.subr.mxu1 %v2393_v59  ;;  %v2364_v38 = vld [vmem:[%s8518_s4 + $0x110] sm:$0xff]  ;;  %v2359_v59 = vld [vmem:[%s8518_s4 + $0xe8] sm:$0xff] }
 0x6e8   :  { %v1973_v50 = vpop.f32.mrf.mxu0  ;;  %v2044_v49 = vpop.f32.mrf.mxu1 }
 0x6e9   :  { %v2049_v53 = vadd.f32 %v1973_v50, %v8881_v20  ;;  %v2051_v56 = vadd.f32 %v2044_v49, %v8884_v57  ;;  %v2361_v50 = vld [vmem:[%s8518_s4 + $0xf8] sm:$0xff]  ;;  %v2358_v20 = vld [vmem:[%s8518_s4 + $0xe0] sm:$0xff]  ;;  %v2351_v49 = vld [vmem:[%s8518_s4 + $0xa8] sm:$0xff] }
 0x6ea   :  { %v1975_v11 = vpop.f32.mrf.mxu0  ;;  %v2046_v55 = vpop.f32.mrf.mxu1  ;;  %v2349_v57 = vld [vmem:[%s8518_s4 + $0x98] sm:$0xff] }
 0x6eb   :  { %v4712_v61 = vmul.f32 -1.442695, %v2049_v53  ;;  %v2050_v62 = vadd.f32 %v1975_v11, %v8882_v48  ;;  %v2052_v3 = vadd.f32 %v2046_v55, %v8883_v29  ;;  %v2360_v53 = vld [vmem:[%s8518_s4 + $0xf0] sm:$0xff]  ;;  %v2355_v11 = vld [vmem:[%s8518_s4 + $0xc8] sm:$0xff]  ;;  %v2354_v48 = vld [vmem:[%s8518_s4 + $0xc0] sm:$0xff] }
 0x6ec   :  { %v2350_v55 = vld [vmem:[%s8518_s4 + $0xa0] sm:$0xff]  ;;  %v2352_v29 = vld [vmem:[%s8518_s4 + $0xb0] sm:$0xff] }
 0x6ed   :  { %4893 = vpow2.f32 %v4712_v61  ;;  %v4713_v51 = vmul.f32 -1.442695, %v2050_v62  ;;  %v4714_v60 = vmul.f32 -1.442695, %v2052_v3  ;;  %v2357_v61 = vld [vmem:[%s8518_s4 + $0xd8] sm:$0xff]  ;;  %v2356_v62 = vld [vmem:[%s8518_s4 + $0xd0] sm:$0xff] }
 0x6ee   :  { %v2347_v3 = vld [vmem:[%s8518_s4 + $0x88] sm:$0xff] }
 0x6ef   :  { %4895 = vpow2.f32 %v4713_v51  ;;  %v2353_v51 = vld [vmem:[%s8518_s4 + $0xb8] sm:$0xff] }
 0x6f0   :  { %4897 = vtanh.f32 %v2051_v56  ;;  %v2346_v56 = vld [vmem:[%s8518_s4 + $0x80] sm:$0xff] }
 0x6f1   :  { %4899 = vpow2.f32 %v4714_v60  ;;  %v2348_v60 = vld [vmem:[%s8518_s4 + $0x90] sm:$0xff] }
 0x6fa   :  { %v4894_v2 = vpop.eup %4893 }
 0x6fb   :  { %v2056_v4 = vadd.f32 1.0, %v4894_v2  ;;  %v2343_v2 = vld [vmem:[%s8518_s4 + $0x68] sm:$0xff] }
 0x6fc   :  { %v4896_v58 = vpop.eup %4895 }
 0x6fd   :  { %4901 = vrcp.f32 %v2056_v4  ;;  %v2062_v0 = vadd.f32 1.0, %v4896_v58  ;;  %v4898_v5 = vpop.eup %4897  ;;  %v2345_v4 = vld [vmem:[%s8518_s4 + $0x78] sm:$0xff]  ;;  %v2342_v58 = vld [vmem:[%s8518_s4 + $0x60] sm:$0xff] }
 0x6fe   :  { %v4900_v6 = vpop.eup %4899 }
 0x6ff   :  { %4903 = vrcp.f32 %v2062_v0  ;;  %v2069_v10 = vadd.f32 1.0, %v4900_v6  ;;  %v2344_v0 = vld [vmem:[%s8518_s4 + $0x70] sm:$0xff]  ;;  %v2341_v6 = vld [vmem:[%s8518_s4 + $0x58] sm:$0xff] }
 0x701   :  { %4905 = vrcp.f32 %v2069_v10  ;;  %v2337_v10 = vld [vmem:[%s8518_s4 + $0x38] sm:$0xff] }
 0x70a   :  { %v4902_v7 = vpop.eup %4901 }
 0x70b   :  { %v2073_v8 = vmul.f32 %v4902_v7, %v4898_v5  ;;  %v2339_v5 = vld [vmem:[%s8518_s4 + $0x48] sm:$0xff]  ;;  %v2338_v7 = vld [vmem:[%s8518_s4 + $0x40] sm:$0xff] }
 0x70c   :  { %v4904_v9 = vpop.eup %4903 }
 0x70d   :  { %v2072_v13 = vmul.f32 %v4904_v9, %v6606_v44  ;;  %v2387_v44 = vld [vmem:[%s8518_s4 + $0x1c8] sm:$0xff] }
 0x70e   :  { %v4906_v15 = vpop.eup %4905  ;;  %v2335_v9 = vld [vmem:[%s8518_s4 + $0x28] sm:$0xff] }
 0x70f   :  { %v6818_v14 = vadd.f32 %v2073_v8, %v2072_v13  ;;  %v2340_v8 = vld [vmem:[%s8518_s4 + $0x50] sm:$0xff]  ;;  %v2334_v13 = vld [vmem:[%s8518_s4 + $0x20] sm:$0xff] }
 0x711   :  { %4907 = vtanh.f32 %v6818_v14 }
 0x71e   :  { %v4908_v16 = vpop.eup %4907 }
 0x71f   :  { %v6821_v17 = vmul.f32 %v4908_v16, %v4906_v15  ;;  %v2336_v15 = vld [vmem:[%s8518_s4 + $0x30] sm:$0xff]  ;;  %v2331_v16 = vld [vmem:[%s8518_s4 + $0x8] sm:$0xff] }
 0x721   :  { %2213 = vmatmul.mubr.f32.vlgmr.msra.gmra.mxu0 %v6821_v17  ;;  %2284 = vmatmul.mubr.f32.vlgmr.msra.gmra.mxu1 %v6821_v17 }
 0x722   :  { %2417 = vmatpush1.msra.mxu0 %v2390_v18  ;;  %2530 = vmatpush1.msra.mxu1 %v2392_v19  ;;  %v2333_v18 = vld [vmem:[%s8518_s4 + $0x18] sm:$0xff]  ;;  %v2330_v19 = vld [vmem:[%s8518_s4] sm:$0xff] }
 0x723   :  { %2418 = vmatprep.subr.mxu0 %v2387_v44  ;;  %2531 = vmatprep.subr.mxu1 %v2389_v21  ;;  %v2332_v44 = vld [vmem:[%s8518_s4 + $0x10] sm:$0xff]  ;;  %v8885_v21 = vld [vmem:[#allocation55_spill] sm:$0xff] }
 0x724   :  { %2419 = vmatpush1.msra.mxu0 %v2386_v22  ;;  %2532 = vmatpush1.msra.mxu1 %v2388_v23  ;;  %v8886_v22 = vld [vmem:[#allocation6_spill] sm:$0xff] }
 0x725   :  { %2420 = vmatprep.subr.mxu0 %v2383_v24  ;;  %2533 = vmatprep.subr.mxu1 %v2385_v25  ;;  %v8887_v23 = vld [vmem:[#allocation26_spill] sm:$0xff]  ;;  %v8888_v24 = vld [vmem:[#allocation29_spill] sm:$0xff]  ;;  %v7061_v25 = vld [vmem:[%s8519_s5 + $0x1f0] sm:$0xff] }
 0x726   :  { %2421 = vmatpush1.msra.mxu0 %v2382_v26  ;;  %2534 = vmatpush1.msra.mxu1 %v2384_v28  ;;  %v7068_v26 = vld [vmem:[%s8519_s5 + $0x1c8] sm:$0xff]  ;;  %v7073_v28 = vld [vmem:[%s8519_s5 + $0x1d8] sm:$0xff] }
 0x727   :  { %2422 = vmatprep.subr.mxu0 %v2379_v30  ;;  %2535 = vmatprep.subr.mxu1 %v2381_v31  ;;  %v7080_v30 = vld [vmem:[%s8519_s5 + $0x1c0] sm:$0xff]  ;;  %v7085_v31 = vld [vmem:[%s8519_s5 + $0x1d0] sm:$0xff] }
 0x728   :  { %2423 = vmatpush1.msra.mxu0 %v2378_v32  ;;  %2536 = vmatpush1.msra.mxu1 %v2380_v33  ;;  %v7092_v32 = vld [vmem:[%s8519_s5 + $0x1a8] sm:$0xff]  ;;  %v7097_v33 = vld [vmem:[%s8519_s5 + $0x1b8] sm:$0xff] }
 0x729   :  { %2424 = vmatprep.subr.mxu0 %v2375_v34  ;;  %2537 = vmatprep.subr.mxu1 %v2377_v35  ;;  %v7104_v34 = vld [vmem:[%s8519_s5 + $0x1a0] sm:$0xff]  ;;  %v7109_v35 = vld [vmem:[%s8519_s5 + $0x1b0] sm:$0xff] }
 0x72a   :  { %2425 = vmatpush1.msra.mxu0 %v2374_v36  ;;  %2538 = vmatpush1.msra.mxu1 %v2376_v37  ;;  %v7116_v36 = vld [vmem:[%s8519_s5 + $0x188] sm:$0xff]  ;;  %v7121_v37 = vld [vmem:[%s8519_s5 + $0x198] sm:$0xff] }
 0x72b   :  { %2426 = vmatprep.subr.mxu0 %v2371_v39  ;;  %2539 = vmatprep.subr.mxu1 %v2373_v40  ;;  %v7128_v39 = vld [vmem:[%s8519_s5 + $0x180] sm:$0xff]  ;;  %v7133_v40 = vld [vmem:[%s8519_s5 + $0x190] sm:$0xff] }
 0x72c   :  { %2427 = vmatpush1.msra.mxu0 %v2370_v41  ;;  %2540 = vmatpush1.msra.mxu1 %v2372_v42  ;;  %v7140_v41 = vld [vmem:[%s8519_s5 + $0x168] sm:$0xff]  ;;  %v7145_v42 = vld [vmem:[%s8519_s5 + $0x178] sm:$0xff] }
 0x72d   :  { %2428 = vmatprep.subr.mxu0 %v2367_v43  ;;  %2541 = vmatprep.subr.mxu1 %v2369_v46  ;;  %v7152_v43 = vld [vmem:[%s8519_s5 + $0x160] sm:$0xff]  ;;  %v7157_v46 = vld [vmem:[%s8519_s5 + $0x170] sm:$0xff] }
 0x72e   :  { %2429 = vmatpush1.msra.mxu0 %v2366_v47  ;;  %2542 = vmatpush1.msra.mxu1 %v2368_v27  ;;  %v7164_v47 = vld [vmem:[%s8519_s5 + $0x148] sm:$0xff]  ;;  %v7169_v27 = vld [vmem:[%s8519_s5 + $0x158] sm:$0xff] }
 0x72f   :  { %2430 = vmatprep.subr.mxu0 %v2363_v45  ;;  %2543 = vmatprep.subr.mxu1 %v2365_v52  ;;  %v7176_v45 = vld [vmem:[%s8519_s5 + $0x140] sm:$0xff]  ;;  %v7181_v52 = vld [vmem:[%s8519_s5 + $0x150] sm:$0xff] }
 0x730   :  { %2431 = vmatpush1.msra.mxu0 %v2362_v1  ;;  %2544 = vmatpush1.msra.mxu1 %v2364_v38  ;;  %v7188_v1 = vld [vmem:[%s8519_s5 + $0x128] sm:$0xff]  ;;  %v7193_v38 = vld [vmem:[%s8519_s5 + $0x138] sm:$0xff] }
 0x731   :  { %2432 = vmatprep.subr.mxu0 %v2359_v59  ;;  %2545 = vmatprep.subr.mxu1 %v2361_v50  ;;  %v7200_v59 = vld [vmem:[%s8519_s5 + $0x120] sm:$0xff]  ;;  %v7205_v50 = vld [vmem:[%s8519_s5 + $0x130] sm:$0xff] }
 0x732   :  { %2433 = vmatpush1.msra.mxu0 %v2358_v20  ;;  %2546 = vmatpush1.msra.mxu1 %v2360_v53  ;;  %v7212_v20 = vld [vmem:[%s8519_s5 + $0x108] sm:$0xff]  ;;  %v7217_v53 = vld [vmem:[%s8519_s5 + $0x118] sm:$0xff] }
 0x733   :  { %2434 = vmatprep.subr.mxu0 %v2355_v11  ;;  %2547 = vmatprep.subr.mxu1 %v2357_v61  ;;  %v7224_v11 = vld [vmem:[%s8519_s5 + $0x100] sm:$0xff]  ;;  %v7229_v61 = vld [vmem:[%s8519_s5 + $0x110] sm:$0xff] }
 0x734   :  { %2435 = vmatpush1.msra.mxu0 %v2354_v48  ;;  %2548 = vmatpush1.msra.mxu1 %v2356_v62  ;;  %v7236_v48 = vld [vmem:[%s8519_s5 + $0xe8] sm:$0xff]  ;;  %v7241_v62 = vld [vmem:[%s8519_s5 + $0xf8] sm:$0xff] }
 0x735   :  { %2436 = vmatprep.subr.mxu0 %v2351_v49  ;;  %2549 = vmatprep.subr.mxu1 %v2353_v51  ;;  %v7248_v49 = vld [vmem:[%s8519_s5 + $0xe0] sm:$0xff]  ;;  %v7253_v51 = vld [vmem:[%s8519_s5 + $0xf0] sm:$0xff] }
 0x736   :  { %2437 = vmatpush1.msra.mxu0 %v2350_v55  ;;  %2550 = vmatpush1.msra.mxu1 %v2352_v29  ;;  %v7260_v55 = vld [vmem:[%s8519_s5 + $0xc8] sm:$0xff]  ;;  %v7265_v29 = vld [vmem:[%s8519_s5 + $0xd8] sm:$0xff] }
 0x737   :  { %2438 = vmatprep.subr.mxu0 %v2347_v3  ;;  %2551 = vmatprep.subr.mxu1 %v2349_v57  ;;  %v7272_v3 = vld [vmem:[%s8519_s5 + $0xc0] sm:$0xff]  ;;  %v7277_v57 = vld [vmem:[%s8519_s5 + $0xd0] sm:$0xff] }
 0x738   :  { %2439 = vmatpush1.msra.mxu0 %v2346_v56  ;;  %2552 = vmatpush1.msra.mxu1 %v2348_v60  ;;  %v7284_v56 = vld [vmem:[%s8519_s5 + $0xa8] sm:$0xff]  ;;  %v7289_v60 = vld [vmem:[%s8519_s5 + $0xb8] sm:$0xff] }
 0x739   :  { %2440 = vmatprep.subr.mxu0 %v2343_v2  ;;  %2553 = vmatprep.subr.mxu1 %v2345_v4  ;;  %v7296_v2 = vld [vmem:[%s8519_s5 + $0xa0] sm:$0xff]  ;;  %v7301_v4 = vld [vmem:[%s8519_s5 + $0xb0] sm:$0xff] }
 0x73a   :  { %2441 = vmatpush1.msra.mxu0 %v2342_v58  ;;  %2554 = vmatpush1.msra.mxu1 %v2344_v0  ;;  %v7308_v58 = vld [vmem:[%s8519_s5 + $0x88] sm:$0xff]  ;;  %v7313_v0 = vld [vmem:[%s8519_s5 + $0x98] sm:$0xff] }
 0x73b   :  { %2442 = vmatprep.subr.mxu0 %v2339_v5  ;;  %2555 = vmatprep.subr.mxu1 %v2341_v6  ;;  %8891 = vst [vmem:[#allocation31_spill] sm:$0xff] %v7308_v58  ;;  %8892 = vst [vmem:[#allocation33_spill] sm:$0xff] %v7313_v0  ;;  %v7320_v5 = vld [vmem:[%s8519_s5 + $0x80] sm:$0xff]  ;;  %v7325_v6 = vld [vmem:[%s8519_s5 + $0x90] sm:$0xff] }
 0x73c   :  { %2443 = vmatpush1.msra.mxu0 %v2338_v7  ;;  %2556 = vmatpush1.msra.mxu1 %v2340_v8  ;;  %8893 = vst [vmem:[#allocation34_spill] sm:$0xff] %v7320_v5  ;;  %8894 = vst [vmem:[#allocation32_spill] sm:$0xff] %v7325_v6  ;;  %v7332_v7 = vld [vmem:[%s8519_s5 + $0x68] sm:$0xff]  ;;  %v7337_v8 = vld [vmem:[%s8519_s5 + $0x78] sm:$0xff] }
 0x73d   :  { %2444 = vmatprep.subr.mxu0 %v2335_v9  ;;  %2557 = vmatprep.subr.mxu1 %v2337_v10  ;;  %8895 = vst [vmem:[#allocation35_spill] sm:$0xff] %v7332_v7  ;;  %8896 = vst [vmem:[#allocation37_spill] sm:$0xff] %v7337_v8  ;;  %v7344_v9 = vld [vmem:[%s8519_s5 + $0x60] sm:$0xff]  ;;  %v7349_v10 = vld [vmem:[%s8519_s5 + $0x70] sm:$0xff] }
 0x73e   :  { %2445 = vmatpush1.msra.mxu0 %v2334_v13  ;;  %2558 = vmatpush1.msra.mxu1 %v2336_v15  ;;  %8897 = vst [vmem:[#allocation38_spill] sm:$0xff] %v7344_v9  ;;  %8898 = vst [vmem:[#allocation36_spill] sm:$0xff] %v7349_v10  ;;  %v7356_v13 = vld [vmem:[%s8519_s5 + $0x48] sm:$0xff]  ;;  %v7361_v15 = vld [vmem:[%s8519_s5 + $0x58] sm:$0xff] }
 0x73f   :  { %2446 = vmatprep.subr.mxu0 %v2331_v16  ;;  %2559 = vmatprep.subr.mxu1 %v2333_v18  ;;  %8899 = vst [vmem:[#allocation7_spill] sm:$0xff] %v7356_v13  ;;  %8900 = vst [vmem:[#allocation8_spill] sm:$0xff] %v7361_v15  ;;  %v7368_v16 = vld [vmem:[%s8519_s5 + $0x40] sm:$0xff]  ;;  %v7373_v18 = vld [vmem:[%s8519_s5 + $0x50] sm:$0xff] }
 0x740   :  { %2447 = vmatpush1.msra.mxu0 %v2330_v19  ;;  %2480 = vmatprep.mubr.f32.mxu0 %v8875_v12  ;;  %8901 = vst [vmem:[#allocation39_spill] sm:$0xff] %v7368_v16  ;;  %8902 = vst [vmem:[#allocation41_spill] sm:$0xff] %v7373_v18  ;;  %v7380_v19 = vld [vmem:[%s8519_s5 + $0x28] sm:$0xff] }
 0x741   :  { %2560 = vmatpush1.msra.mxu1 %v2332_v44  ;;  %2593 = vmatprep.mubr.f32.mxu1 %v8875_v12  ;;  %8903 = vst [vmem:[#allocation42_spill] sm:$0xff] %v7380_v19  ;;  %v7385_v44 = vld [vmem:[%s8519_s5 + $0x38] sm:$0xff] }
 0x742   :  { %2481 = vmatmul.mubr.f32.vlgmr.msra.gmra.mxu0 %v8885_v21  ;;  %2594 = vmatmul.mubr.f32.vlgmr.msra.gmra.mxu1 %v8885_v21  ;;  %8904 = vst [vmem:[#allocation40_spill] sm:$0xff] %v7385_v44  ;;  %v7392_v21 = vld [vmem:[%s8519_s5 + $0x20] sm:$0xff] }
 0x743   :  { %2486 = vmatprep.mubr.f32.mxu0 %v8875_v12  ;;  %2599 = vmatprep.mubr.f32.mxu1 %v8875_v12  ;;  %8905 = vst [vmem:[#allocation9_spill] sm:$0xff] %v7392_v21 }
 0x746   :  { %2487 = vmatmul.mubr.f32.gmra.mxu0 %v8886_v22  ;;  %2600 = vmatmul.mubr.f32.gmra.mxu1 %v8886_v22  ;;  %v7397_v22 = vld [vmem:[%s8519_s5 + $0x30] sm:$0xff] }
 0x747   :  { %2492 = vmatprep.mubr.f32.mxu0 %v8875_v12  ;;  %2605 = vmatprep.mubr.f32.mxu1 %v8875_v12  ;;  %8906 = vst [vmem:[#allocation10_spill] sm:$0xff] %v7397_v22 }
 0x74a   :  { %2493 = vmatmul.mubr.f32.gmra.mxu0 %v8887_v23  ;;  %2606 = vmatmul.mubr.f32.gmra.mxu1 %v8887_v23  ;;  %v7404_v23 = vld [vmem:[%s8519_s5 + $0x8] sm:$0xff] }
 0x74b   :  { %2498 = vmatprep.mubr.f32.mxu0 %v8875_v12  ;;  %2611 = vmatprep.mubr.f32.mxu1 %v8875_v12  ;;  %8907 = vst [vmem:[#allocation11_spill] sm:$0xff] %v7404_v23 }
 0x74e   :  { %2499 = vmatmul.mubr.f32.gmra.mxu0 %v8888_v24  ;;  %2612 = vmatmul.mubr.f32.gmra.mxu1 %v8888_v24  ;;  %v7409_v24 = vld [vmem:[%s8519_s5 + $0x18] sm:$0xff] }
 0x74f   :  { %2504 = vmatprep.mubr.f32.mxu0 %v8875_v12  ;;  %2617 = vmatprep.mubr.f32.mxu1 %v8875_v12  ;;  %8908 = vst [vmem:[#allocation12_spill] sm:$0xff] %v7409_v24 }
 0x752   :  { %2505 = vmatmul.mubr.f32.gmra.mxu0 %v6533_v54  ;;  %2618 = vmatmul.mubr.f32.gmra.mxu1 %v6533_v54  ;;  %v7044_v54 = vld [vmem:[%s8519_s5 + $0x1e8] sm:$0xff] }
 0x753   :  { %2510 = vmatprep.mubr.f32.mxu0 %v8875_v12  ;;  %2623 = vmatprep.mubr.f32.mxu1 %v8875_v12  ;;  %8889 = vst [vmem:[#allocation30_spill] sm:$0xff] %v7044_v54 }
 0x754   :  { %2746 = vmatprep.subr.mxu0 %v7044_v54 }
 0x756   :  { %2511 = vmatmul.mubr.f32.gmra.mxu0 %v6609_v63  ;;  %2624 = vmatmul.mubr.f32.gmra.mxu1 %v6609_v63  ;;  %v7049_v63 = vld [vmem:[%s8519_s5 + $0x1f8] sm:$0xff] }
 0x757   :  { %2516 = vmatprep.mubr.f32.mxu0 %v8875_v12  ;;  %2629 = vmatprep.mubr.f32.mxu1 %v8875_v12  ;;  %8890 = vst [vmem:[#allocation28_spill] sm:$0xff] %v7049_v63 }
 0x758   :  { %2817 = vmatprep.subr.mxu1 %v7049_v63 }
 0x759   :  { %2818 = vmatpush1.msra.mxu1 %v7061_v25 }
 0x75a   :  { %2517 = vmatmul.mubr.f32.gmra.mxu0 %v6821_v17  ;;  %2630 = vmatmul.mubr.f32.gmra.mxu1 %v6821_v17  ;;  %v7056_v17 = vld [vmem:[%s8519_s5 + $0x1e0] sm:$0xff] }
 0x75b   :  { %2522 = vmatprep.mubr.f32.mxu0 %v8875_v12  ;;  %2635 = vmatprep.mubr.f32.mxu1 %v8875_v12 }
 0x75c   :  { %2747 = vmatpush1.msra.mxu0 %v7056_v17  ;;  %2819 = vmatprep.subr.mxu1 %v7073_v28 }
 0x75d   :  { %2748 = vmatprep.subr.mxu0 %v7068_v26  ;;  %2820 = vmatpush1.msra.mxu1 %v7085_v31 }
 0x75e   :  { %2749 = vmatpush1.msra.mxu0 %v7080_v30  ;;  %2821 = vmatprep.subr.mxu1 %v7097_v33 }
 0x75f   :  { %2750 = vmatprep.subr.mxu0 %v7092_v32  ;;  %2822 = vmatpush1.msra.mxu1 %v7109_v35 }
 0x760   :  { %2751 = vmatpush1.msra.mxu0 %v7104_v34  ;;  %2823 = vmatprep.subr.mxu1 %v7121_v37 }
 0x761   :  { %2752 = vmatprep.subr.mxu0 %v7116_v36  ;;  %2824 = vmatpush1.msra.mxu1 %v7133_v40 }
 0x762   :  { %2753 = vmatpush1.msra.mxu0 %v7128_v39  ;;  %2825 = vmatprep.subr.mxu1 %v7145_v42 }
 0x763   :  { %2754 = vmatprep.subr.mxu0 %v7140_v41  ;;  %2826 = vmatpush1.msra.mxu1 %v7157_v46 }
 0x764   :  { %2755 = vmatpush1.msra.mxu0 %v7152_v43  ;;  %2827 = vmatprep.subr.mxu1 %v7169_v27 }
 0x765   :  { %2756 = vmatprep.subr.mxu0 %v7164_v47  ;;  %2828 = vmatpush1.msra.mxu1 %v7181_v52 }
 0x766   :  { %2757 = vmatpush1.msra.mxu0 %v7176_v45  ;;  %2829 = vmatprep.subr.mxu1 %v7193_v38 }
 0x767   :  { %2758 = vmatprep.subr.mxu0 %v7188_v1  ;;  %2830 = vmatpush1.msra.mxu1 %v7205_v50 }
 0x768   :  { %2759 = vmatpush1.msra.mxu0 %v7200_v59  ;;  %2831 = vmatprep.subr.mxu1 %v7217_v53 }
 0x769   :  { %2760 = vmatprep.subr.mxu0 %v7212_v20  ;;  %2832 = vmatpush1.msra.mxu1 %v7229_v61 }
 0x76a   :  { %2761 = vmatpush1.msra.mxu0 %v7224_v11  ;;  %2833 = vmatprep.subr.mxu1 %v7241_v62 }
 0x76b   :  { %2762 = vmatprep.subr.mxu0 %v7236_v48  ;;  %2834 = vmatpush1.msra.mxu1 %v7253_v51 }
 0x76c   :  { %2763 = vmatpush1.msra.mxu0 %v7248_v49  ;;  %2835 = vmatprep.subr.mxu1 %v7265_v29 }
 0x76d   :  { %2764 = vmatprep.subr.mxu0 %v7260_v55  ;;  %2836 = vmatpush1.msra.mxu1 %v7277_v57 }
 0x76e   :  { %2765 = vmatpush1.msra.mxu0 %v7272_v3  ;;  %2837 = vmatprep.subr.mxu1 %v7289_v60 }
 0x76f   :  { %2766 = vmatprep.subr.mxu0 %v7284_v56  ;;  %2838 = vmatpush1.msra.mxu1 %v7301_v4 }
 0x770   :  { %2767 = vmatpush1.msra.mxu0 %v7296_v2  ;;  %2839 = vmatprep.subr.mxu1 %v7313_v0 }
 0x771   :  { %2768 = vmatprep.subr.mxu0 %v7308_v58  ;;  %2840 = vmatpush1.msra.mxu1 %v7325_v6 }
 0x772   :  { %2769 = vmatpush1.msra.mxu0 %v7320_v5  ;;  %2841 = vmatprep.subr.mxu1 %v7337_v8  ;;  %v8913_v8 = vld [vmem:[#allocation54_spill] sm:$0xff] }
 0x773   :  { %2770 = vmatprep.subr.mxu0 %v7332_v7  ;;  %2842 = vmatpush1.msra.mxu1 %v7349_v10  ;;  %v8914_v7 = vld [vmem:[#allocation52_spill] sm:$0xff] }
 0x774   :  { %2771 = vmatpush1.msra.mxu0 %v7344_v9  ;;  %2843 = vmatprep.subr.mxu1 %v7361_v15  ;;  %v8912_v15 = vld [vmem:[#allocation53_spill] sm:$0xff] }
 0x775   :  { %2772 = vmatprep.subr.mxu0 %v7356_v13  ;;  %2844 = vmatpush1.msra.mxu1 %v7373_v18 }
 0x776   :  { %2773 = vmatpush1.msra.mxu0 %v7368_v16  ;;  %2845 = vmatprep.subr.mxu1 %v7385_v44  ;;  %v7414_v44 = vld [vmem:[%s8519_s5] sm:$0xff] }
 0x777   :  { %2774 = vmatprep.subr.mxu0 %v7380_v19  ;;  %2846 = vmatpush1.msra.mxu1 %v7397_v22  ;;  %8909 = vst [vmem:[#allocation13_spill] sm:$0xff] %v7414_v44  ;;  %v7421_v22 = vld [vmem:[%s8519_s5 + $0x10] sm:$0xff]  ;;  %v8911_v19 = vld [vmem:[#allocation51_spill] sm:$0xff] }
 0x778   :  { %2775 = vmatpush1.msra.mxu0 %v7392_v21  ;;  %2847 = vmatprep.subr.mxu1 %v7409_v24  ;;  %8910 = vst [vmem:[#allocation14_spill] sm:$0xff] %v7421_v22 }
 0x779   :  { %2776 = vmatprep.subr.mxu0 %v7404_v23  ;;  %2848 = vmatpush1.msra.mxu1 %v7421_v22 }
 0x77a   :  { %2777 = vmatpush1.msra.mxu0 %v7414_v44  ;;  %3056 = vmatprep.subr.mxu1 %v7049_v63 }
 0x77b   :  { %2985 = vmatprep.subr.mxu0 %v7044_v54 }
 0x7e1   :  { %v2214_v21 = vpop.f32.mrf.mxu0  ;;  %v2285_v13 = vpop.f32.mrf.mxu1 }
 0x7e2   :  { %v2290_v18 = vadd.f32 %v2214_v21, %v8911_v19  ;;  %v2292_v22 = vadd.f32 %v2285_v13, %v8914_v7  ;;  %v8919_v13 = vld [vmem:[#allocation38_spill] sm:$0xff] }
 0x7e3   :  { %v2216_v16 = vpop.f32.mrf.mxu0  ;;  %v2287_v9 = vpop.f32.mrf.mxu1 }
 0x7e4   :  { %v4715_v23 = vmul.f32 -1.442695, %v2290_v18  ;;  %v2291_v24 = vadd.f32 %v2216_v16, %v8912_v15  ;;  %v2293_v44 = vadd.f32 %v2287_v9, %v8913_v8 }
 0x7e6   :  { %4909 = vpow2.f32 %v4715_v23  ;;  %v4716_v10 = vmul.f32 -1.442695, %v2291_v24  ;;  %v4717_v6 = vmul.f32 -1.442695, %v2293_v44  ;;  %v8920_v44 = vld [vmem:[#allocation36_spill] sm:$0xff] }
 0x7e8   :  { %4911 = vpow2.f32 %v4716_v10 }
 0x7e9   :  { %4913 = vtanh.f32 %v2292_v22  ;;  %v8921_v22 = vld [vmem:[#allocation7_spill] sm:$0xff] }
 0x7ea   :  { %4915 = vpow2.f32 %v4717_v6  ;;  %v8918_v6 = vld [vmem:[#allocation37_spill] sm:$0xff] }
 0x7f3   :  { %v4910_v54 = vpop.eup %4909 }
 0x7f4   :  { %v2297_v5 = vadd.f32 1.0, %v4910_v54 }
 0x7f5   :  { %v4912_v63 = vpop.eup %4911 }
 0x7f6   :  { %4917 = vrcp.f32 %v2297_v5  ;;  %v2303_v19 = vadd.f32 1.0, %v4912_v63  ;;  %v4914_v18 = vpop.eup %4913  ;;  %v8916_v63 = vld [vmem:[#allocation32_spill] sm:$0xff]  ;;  %v8917_v5 = vld [vmem:[#allocation35_spill] sm:$0xff] }
 0x7f7   :  { %v4916_v15 = vpop.eup %4915 }
 0x7f8   :  { %4919 = vrcp.f32 %v2303_v19  ;;  %v2310_v10 = vadd.f32 1.0, %v4916_v15  ;;  %v8922_v19 = vld [vmem:[#allocation8_spill] sm:$0xff]  ;;  %v8924_v15 = vld [vmem:[#allocation41_spill] sm:$0xff] }
 0x7fa   :  { %4921 = vrcp.f32 %v2310_v10  ;;  %v8928_v10 = vld [vmem:[#allocation10_spill] sm:$0xff] }
 0x803   :  { %v4918_v16 = vpop.eup %4917 }
 0x804   :  { %v2314_v21 = vmul.f32 %v4918_v16, %v4914_v18  ;;  %v8923_v18 = vld [vmem:[#allocation39_spill] sm:$0xff]  ;;  %v8925_v16 = vld [vmem:[#allocation42_spill] sm:$0xff] }
 0x805   :  { %v4920_v23 = vpop.eup %4919 }
 0x806   :  { %v2313_v24 = vmul.f32 %v4920_v23, %v6818_v14  ;;  %v8915_v14 = vld [vmem:[#allocation34_spill] sm:$0xff]  ;;  %v8927_v23 = vld [vmem:[#allocation9_spill] sm:$0xff] }
 0x807   :  { %v4922_v7 = vpop.eup %4921 }
 0x808   :  { %v2315_v8 = vadd.f32 %v2314_v21, %v2313_v24  ;;  %v8926_v21 = vld [vmem:[#allocation40_spill] sm:$0xff]  ;;  %v8929_v24 = vld [vmem:[#allocation11_spill] sm:$0xff] }
 0x80a   :  { %4923 = vtanh.f32 %v2315_v8  ;;  %v8930_v8 = vld [vmem:[#allocation12_spill] sm:$0xff] }
 0x817   :  { %v4924_v9 = vpop.eup %4923 }
 0x818   :  { %v2317_v54 = vmul.f32 %v4924_v9, %v4922_v7  ;;  %v8931_v7 = vld [vmem:[#allocation13_spill] sm:$0xff]  ;;  %v8932_v9 = vld [vmem:[#allocation14_spill] sm:$0xff] }
 0x81a   :  { %2523 = vmatmul.mubr.f32.gmra.mxu0 %v2317_v54  ;;  %2636 = vmatmul.mubr.f32.gmra.mxu1 %v2317_v54  ;;  %v8933_v54 = vld [vmem:[#allocation30_spill] sm:$0xff] }
 0x81b   :  { %2810 = vmatprep.mubr.f32.mxu0 %v8875_v12  ;;  %2881 = vmatprep.mubr.f32.mxu1 %v8875_v12 }
 0x81e   :  { %2811 = vmatmul.mubr.f32.vlgmr.msra.gmra.mxu0 %v8875_v12  ;;  %2882 = vmatmul.mubr.f32.vlgmr.msra.gmra.mxu1 %v8875_v12 }
 0x81f   :  { %2986 = vmatpush1.msra.mxu0 %v7056_v17  ;;  %3057 = vmatpush1.msra.mxu1 %v7061_v25 }
 0x820   :  { %2987 = vmatprep.subr.mxu0 %v7068_v26  ;;  %3058 = vmatprep.subr.mxu1 %v7073_v28 }
 0x821   :  { %2988 = vmatpush1.msra.mxu0 %v7080_v30  ;;  %3059 = vmatpush1.msra.mxu1 %v7085_v31 }
 0x822   :  { %2989 = vmatprep.subr.mxu0 %v7092_v32  ;;  %3060 = vmatprep.subr.mxu1 %v7097_v33 }
 0x823   :  { %2990 = vmatpush1.msra.mxu0 %v7104_v34  ;;  %3061 = vmatpush1.msra.mxu1 %v7109_v35 }
 0x824   :  { %2991 = vmatprep.subr.mxu0 %v7116_v36  ;;  %3062 = vmatprep.subr.mxu1 %v7121_v37 }
 0x825   :  { %2992 = vmatpush1.msra.mxu0 %v7128_v39  ;;  %3063 = vmatpush1.msra.mxu1 %v7133_v40 }
 0x826   :  { %2993 = vmatprep.subr.mxu0 %v7140_v41  ;;  %3064 = vmatprep.subr.mxu1 %v7145_v42 }
 0x827   :  { %2994 = vmatpush1.msra.mxu0 %v7152_v43  ;;  %3065 = vmatpush1.msra.mxu1 %v7157_v46 }
 0x828   :  { %2995 = vmatprep.subr.mxu0 %v7164_v47  ;;  %3066 = vmatprep.subr.mxu1 %v7169_v27 }
 0x829   :  { %2996 = vmatpush1.msra.mxu0 %v7176_v45  ;;  %3067 = vmatpush1.msra.mxu1 %v7181_v52 }
 0x82a   :  { %2997 = vmatprep.subr.mxu0 %v7188_v1  ;;  %3068 = vmatprep.subr.mxu1 %v7193_v38 }
 0x82b   :  { %2998 = vmatpush1.msra.mxu0 %v7200_v59  ;;  %3069 = vmatpush1.msra.mxu1 %v7205_v50 }
 0x82c   :  { %2999 = vmatprep.subr.mxu0 %v7212_v20  ;;  %3070 = vmatprep.subr.mxu1 %v7217_v53 }
 0x82d   :  { %3000 = vmatpush1.msra.mxu0 %v7224_v11  ;;  %3071 = vmatpush1.msra.mxu1 %v7229_v61 }
 0x82e   :  { %3001 = vmatprep.subr.mxu0 %v7236_v48  ;;  %3072 = vmatprep.subr.mxu1 %v7241_v62 }
 0x82f   :  { %3002 = vmatpush1.msra.mxu0 %v7248_v49  ;;  %3073 = vmatpush1.msra.mxu1 %v7253_v51 }
 0x830   :  { %3003 = vmatprep.subr.mxu0 %v7260_v55  ;;  %3074 = vmatprep.subr.mxu1 %v7265_v29 }
 0x831   :  { %3004 = vmatpush1.msra.mxu0 %v7272_v3  ;;  %3075 = vmatpush1.msra.mxu1 %v7277_v57 }
 0x832   :  { %3005 = vmatprep.subr.mxu0 %v7284_v56  ;;  %3076 = vmatprep.subr.mxu1 %v7289_v60 }
 0x833   :  { %3006 = vmatpush1.msra.mxu0 %v7296_v2  ;;  %3077 = vmatpush1.msra.mxu1 %v7301_v4 }
 0x834   :  { %3007 = vmatprep.subr.mxu0 %v7308_v58  ;;  %3078 = vmatprep.subr.mxu1 %v7313_v0 }
 0x835   :  { %3008 = vmatpush1.msra.mxu0 %v8915_v14  ;;  %3079 = vmatpush1.msra.mxu1 %v8916_v63 }
 0x836   :  { %3009 = vmatprep.subr.mxu0 %v8917_v5  ;;  %3080 = vmatprep.subr.mxu1 %v8918_v6 }
 0x837   :  { %3010 = vmatpush1.msra.mxu0 %v8919_v13  ;;  %3081 = vmatpush1.msra.mxu1 %v8920_v44 }
 0x838   :  { %3011 = vmatprep.subr.mxu0 %v8921_v22  ;;  %3082 = vmatprep.subr.mxu1 %v8922_v19 }
 0x839   :  { %3012 = vmatpush1.msra.mxu0 %v8923_v18  ;;  %3083 = vmatpush1.msra.mxu1 %v8924_v15 }
 0x83a   :  { %3013 = vmatprep.subr.mxu0 %v8925_v16  ;;  %3084 = vmatprep.subr.mxu1 %v8926_v21  ;;  %v8934_v16 = vld [vmem:[#allocation28_spill] sm:$0xff]  ;;  %v2482_v21 = vpop.f32.mrf.mxu0 }
 0x83b   :  { %3014 = vmatpush1.msra.mxu0 %v8927_v23  ;;  %3085 = vmatpush1.msra.mxu1 %v8928_v10  ;;  %v2595_v23 = vpop.f32.mrf.mxu1 }
 0x83c   :  { %3015 = vmatprep.subr.mxu0 %v8929_v24  ;;  %3086 = vmatprep.subr.mxu1 %v8930_v8  ;;  %v2484_v15 = vpop.f32.mrf.mxu0 }
 0x83d   :  { %3016 = vmatpush1.msra.mxu0 %v8931_v7  ;;  %3049 = vmatprep.mubr.f32.mxu0 %v8875_v12  ;;  %v2597_v10 = vpop.f32.mrf.mxu1 }
 0x83e   :  { %3087 = vmatpush1.msra.mxu1 %v8932_v9  ;;  %3120 = vmatprep.mubr.f32.mxu1 %v8875_v12  ;;  %v7502_v18 = vpop.f32.mrf.mxu0 }
 0x83f   :  { %3224 = vmatprep.subr.mxu0 %v8933_v54  ;;  %3295 = vmatprep.subr.mxu1 %v8934_v16  ;;  %8935 = vst [vmem:[#allocation15_spill] sm:$0xff] %v7502_v18  ;;  %v7504_v24 = vpop.f32.mrf.mxu1 }
 0x840   :  { %8936 = vst [vmem:[#allocation16_spill] sm:$0xff] %v7504_v24  ;;  %v7506_v8 = vpop.f32.mrf.mxu0 }
 0x841   :  { %8937 = vst [vmem:[#allocation17_spill] sm:$0xff] %v7506_v8  ;;  %v7508_v7 = vpop.f32.mrf.mxu1 }
 0x842   :  { %8938 = vst [vmem:[#allocation18_spill] sm:$0xff] %v7508_v7  ;;  %v7510_v19 = vpop.f32.mrf.mxu0 }
 0x843   :  { %8939 = vst [vmem:[#allocation19_spill] sm:$0xff] %v7510_v19  ;;  %v7512_v9 = vpop.f32.mrf.mxu1 }
 0x844   :  { %8940 = vst [vmem:[#allocation20_spill] sm:$0xff] %v7512_v9  ;;  %v7514_v12 = vpop.f32.mrf.mxu0 }
 0x845   :  { %8941 = vst [vmem:[#allocation21_spill] sm:$0xff] %v7514_v12  ;;  %v7516_v54 = vpop.f32.mrf.mxu1 }
 0x846   :  { %8942 = vst [vmem:[#allocation22_spill] sm:$0xff] %v7516_v54  ;;  %v7518_v16 = vpop.f32.mrf.mxu0 }
 0x847   :  { %8943 = vst [vmem:[#allocation23_spill] sm:$0xff] %v7518_v16  ;;  %v7520_v22 = vpop.f32.mrf.mxu1 }
 0x848   :  { %8944 = vst [vmem:[#allocation24_spill] sm:$0xff] %v7520_v22  ;;  %v7522_v44 = vpop.f32.mrf.mxu0 }
 0x849   :  { %8945 = vst [vmem:[#allocation25_spill] sm:$0xff] %v7522_v44  ;;  %v7524_v18 = vpop.f32.mrf.mxu1 }
 0x84a   :  { %8946 = vst [vmem:[#allocation43_spill] sm:$0xff] %v7524_v18  ;;  %v7526_v24 = vpop.f32.mrf.mxu0 }
 0x84b   :  { %8947 = vst [vmem:[#allocation45_spill] sm:$0xff] %v7526_v24  ;;  %v7528_v8 = vpop.f32.mrf.mxu1 }
 0x84c   :  { %8948 = vst [vmem:[#allocation46_spill] sm:$0xff] %v7528_v8  ;;  %v7530_v7 = vpop.f32.mrf.mxu0  ;;  %v2394_v8 = vld [vmem:[%s8520_s6] sm:$0xf] }
 0x84d   :  { %8949 = vst [vmem:[#allocation44_spill] sm:$0xff] %v7530_v7  ;;  %v7532_v19 = vpop.f32.mrf.mxu1  ;;  %v8958_v7 = vld [vmem:[#allocation27_spill] sm:$0xff] }
 0x84e   :  { %8950 = vst [vmem:[#allocation47_spill] sm:$0xff] %v7532_v19  ;;  %v7534_v9 = vpop.f32.mrf.mxu0  ;;  %v8959_v19 = vsub.s32 0, %v8958_v7 }
 0x84f   :  { %8951 = vst [vmem:[#allocation49_spill] sm:$0xff] %v7534_v9  ;;  %v7536_v12 = vpop.f32.mrf.mxu1 }
 0x850   :  { %8952 = vst [vmem:[#allocation50_spill] sm:$0xff] %v7536_v12  ;;  %v7538_v54 = vpop.f32.mrf.mxu0  ;;  %v7553_v18 = vrot.slane %v2394_v8, %v8959_v19 }
 0x851   :  { %8953 = vst [vmem:[#allocation48_spill] sm:$0xff] %v7538_v54  ;;  %v7540_v16 = vpop.f32.mrf.mxu1 }
 0x852   :  { %8954 = vst [vmem:[#allocation55_spill] sm:$0xff] %v7540_v16  ;;  %v7542_v22 = vpop.f32.mrf.mxu0  ;;  %8960 = vst [vmem:[#allocation51_spill] sm:$0xff] %v7553_v18  ;;  %v8963_v16 = vsub.s32 1, %v8958_v7  ;;  %v2483_v13 = vadd.f32 %v2482_v21, %v7553_v18 }
 0x853   :  { %8955 = vst [vmem:[#allocation6_spill] sm:$0xff] %v7542_v22  ;;  %v7544_v44 = vpop.f32.mrf.mxu1 }
 0x854   :  { %8956 = vst [vmem:[#allocation26_spill] sm:$0xff] %v7544_v44  ;;  %v7549_v24 = vpop.f32.mrf.mxu0  ;;  %v7561_v54 = vrot.slane %v2394_v8, %v8963_v16  ;;  %v8967_v16 = vsub.s32 3, %v8958_v7 }
 0x855   :  { %8957 = vst [vmem:[#allocation29_spill] sm:$0xff] %v7549_v24  ;;  %v7555_v9 = vpop.f32.mrf.mxu1 }
 0x856   :  { %8961 = vst [vmem:[#allocation53_spill] sm:$0xff] %v7555_v9  ;;  %v2485_v24 = vadd.f32 %v2484_v15, %v7561_v54  ;;  %v7573_v58 = vrot.slane %v2394_v8, %v8967_v16 }
 0x858   :  { %8968 = vst [vmem:[#allocation27_spill] sm:$0xff] %v7573_v58  ;;  %v2598_v21 = vadd.f32 %v2597_v10, %v7573_v58 }
 0x8da   :  { %v7557_v12 = vpop.f32.mrf.mxu0  ;;  %v7563_v22 = vpop.f32.mrf.mxu1 }
 0x8db   :  { %8962 = vst [vmem:[#allocation54_spill] sm:$0xff] %v7557_v12  ;;  %8964 = vst [vmem:[#allocation52_spill] sm:$0xff] %v7563_v22 }
 0x8dc   :  { %v7565_v44 = vpop.f32.mrf.mxu0  ;;  %v7569_v5 = vpop.f32.mrf.mxu1 }
 0x8dd   :  { %8965 = vst [vmem:[#allocation30_spill] sm:$0xff] %v7565_v44  ;;  %8966 = vst [vmem:[#allocation28_spill] sm:$0xff] %v7569_v5  ;;  %v8969_v44 = vsub.s32 2, %v8958_v7 }
 0x8de   :  { %v2812_v6 = vpop.f32.mrf.mxu0  ;;  %v2883_v12 = vpop.f32.mrf.mxu1 }
 0x8df   :  { %v2888_v19 = vadd.f32 %v2812_v6, %v2483_v13  ;;  %v7578_v15 = vrot.slane %v2394_v8, %v8969_v44 }
 0x8e0   :  { %v2814_v63 = vpop.f32.mrf.mxu0  ;;  %v2885_v22 = vpop.f32.mrf.mxu1 }
 0x8e1   :  { %v4718_v9 = vmul.f32 -1.442695, %v2888_v19  ;;  %v2889_v14 = vadd.f32 %v2814_v63, %v2485_v24  ;;  %v2891_v5 = vadd.f32 %v2885_v22, %v2598_v21  ;;  %v2596_v6 = vadd.f32 %v2595_v23, %v7578_v15 }
 0x8e3   :  { %4925 = vpow2.f32 %v4718_v9  ;;  %v4719_v0 = vmul.f32 -1.442695, %v2889_v14  ;;  %v4720_v13 = vmul.f32 -1.442695, %v2891_v5  ;;  %v2890_v24 = vadd.f32 %v2883_v12, %v2596_v6 }
 0x8e5   :  { %4927 = vpow2.f32 %v4719_v0 }
 0x8e6   :  { %4929 = vpow2.f32 %v4720_v13  ;;  %v8993_v13 = vld [vmem:[#allocation27_spill] sm:$0xff] }
 0x8f0   :  { %v4926_v63 = vpop.eup %4925 }
 0x8f1   :  { %v2895_v9 = vadd.f32 1.0, %v4926_v63  ;;  %v8994_v63 = vld [vmem:[#allocation18_spill] sm:$0xff] }
 0x8f2   :  { %v4928_v14 = vpop.eup %4927 }
 0x8f3   :  { %4931 = vrcp.f32 %v2895_v9  ;;  %v2901_v19 = vadd.f32 1.0, %v4928_v14  ;;  %v4930_v0 = vpop.eup %4929  ;;  %v8995_v14 = vld [vmem:[#allocation16_spill] sm:$0xff] }
 0x8f4   :  { %4933 = vtanh.f32 %v2890_v24  ;;  %v2908_v7 = vadd.f32 1.0, %v4930_v0  ;;  %v2604_v24 = vadd.f32 %v8994_v63, %v8993_v13  ;;  %v7694_v63 = vld [vmem:[%s8519_s5 + $0x1d8] sm:$0xff] }
 0x8f5   :  { %4935 = vrcp.f32 %v2901_v19  ;;  %v2602_v19 = vadd.f32 %v8995_v14, %v7578_v15  ;;  %v7713_v14 = vld [vmem:[%s8519_s5 + $0x1a8] sm:$0xff] }
 0x8f6   :  { %4937 = vrcp.f32 %v2908_v7 }
 0x900   :  { %v4932_v16 = vpop.eup %4931 }
 0x901   :  { %v4934_v10 = vpop.eup %4933 }
 0x902   :  { %v4936_v58 = vpop.eup %4935  ;;  %v2912_v8 = vmul.f32 %v4934_v10, %v4932_v16 }
 0x903   :  { %v2911_v44 = vmul.f32 0.0, %v4936_v58  ;;  %v4938_v12 = vpop.eup %4937 }
 0x905   :  { %v7581_v22 = vadd.f32 %v2912_v8, %v2911_v44 }
 0x907   :  { %4939 = vtanh.f32 %v7581_v22 }
 0x914   :  { %v4940_v5 = vpop.eup %4939 }
 0x915   :  { %v2915_v23 = vmul.f32 %v4940_v5, %v4938_v12 }
 0x917   :  { %3050 = vmatmul.mubr.f32.vlgmr.msra.gmra.mxu0 %v2915_v23  ;;  %3121 = vmatmul.mubr.f32.vlgmr.msra.gmra.mxu1 %v2915_v23 }
 0x918   :  { %3225 = vmatpush1.msra.mxu0 %v7056_v17  ;;  %3296 = vmatpush1.msra.mxu1 %v7061_v25  ;;  %v8970_v17 = vld [vmem:[#allocation31_spill] sm:$0xff]  ;;  %v8971_v25 = vld [vmem:[#allocation33_spill] sm:$0xff] }
 0x919   :  { %3226 = vmatprep.subr.mxu0 %v7068_v26  ;;  %3297 = vmatprep.subr.mxu1 %v7073_v28  ;;  %v8972_v26 = vld [vmem:[#allocation34_spill] sm:$0xff]  ;;  %v8973_v28 = vld [vmem:[#allocation32_spill] sm:$0xff] }
 0x91a   :  { %3227 = vmatpush1.msra.mxu0 %v7080_v30  ;;  %3298 = vmatpush1.msra.mxu1 %v7085_v31  ;;  %v8974_v30 = vld [vmem:[#allocation35_spill] sm:$0xff]  ;;  %v8975_v31 = vld [vmem:[#allocation37_spill] sm:$0xff] }
 0x91b   :  { %3228 = vmatprep.subr.mxu0 %v7092_v32  ;;  %3299 = vmatprep.subr.mxu1 %v7097_v33  ;;  %v8976_v32 = vld [vmem:[#allocation38_spill] sm:$0xff]  ;;  %v8977_v33 = vld [vmem:[#allocation36_spill] sm:$0xff] }
 0x91c   :  { %3229 = vmatpush1.msra.mxu0 %v7104_v34  ;;  %3300 = vmatpush1.msra.mxu1 %v7109_v35  ;;  %v8978_v34 = vld [vmem:[#allocation7_spill] sm:$0xff]  ;;  %v8979_v35 = vld [vmem:[#allocation8_spill] sm:$0xff] }
 0x91d   :  { %3230 = vmatprep.subr.mxu0 %v7116_v36  ;;  %3301 = vmatprep.subr.mxu1 %v7121_v37  ;;  %v8980_v36 = vld [vmem:[#allocation39_spill] sm:$0xff]  ;;  %v8981_v37 = vld [vmem:[#allocation41_spill] sm:$0xff] }
 0x91e   :  { %3231 = vmatpush1.msra.mxu0 %v7128_v39  ;;  %3302 = vmatpush1.msra.mxu1 %v7133_v40  ;;  %v8982_v39 = vld [vmem:[#allocation42_spill] sm:$0xff]  ;;  %v8983_v40 = vld [vmem:[#allocation40_spill] sm:$0xff] }
 0x91f   :  { %3232 = vmatprep.subr.mxu0 %v7140_v41  ;;  %3303 = vmatprep.subr.mxu1 %v7145_v42  ;;  %v8984_v41 = vld [vmem:[#allocation9_spill] sm:$0xff]  ;;  %v8985_v42 = vld [vmem:[#allocation10_spill] sm:$0xff] }
 0x920   :  { %3233 = vmatpush1.msra.mxu0 %v7152_v43  ;;  %3304 = vmatpush1.msra.mxu1 %v7157_v46  ;;  %v8986_v43 = vld [vmem:[#allocation11_spill] sm:$0xff]  ;;  %v8987_v46 = vld [vmem:[#allocation12_spill] sm:$0xff] }
 0x921   :  { %3234 = vmatprep.subr.mxu0 %v7164_v47  ;;  %3305 = vmatprep.subr.mxu1 %v7169_v27  ;;  %v8988_v47 = vld [vmem:[#allocation13_spill] sm:$0xff]  ;;  %v8989_v27 = vmov 0.0  }
 0x922   :  { %3235 = vmatpush1.msra.mxu0 %v7176_v45  ;;  %3306 = vmatpush1.msra.mxu1 %v7181_v52  ;;  %v8990_v45 = vld [vmem:[#allocation14_spill] sm:$0xff]  ;;  %v8991_v52 = vld [vmem:[#allocation15_spill] sm:$0xff] }
 0x923   :  { %3236 = vmatprep.subr.mxu0 %v7188_v1  ;;  %3307 = vmatprep.subr.mxu1 %v7193_v38  ;;  %v2489_v1 = vadd.f32 %v8991_v52, %v7553_v18 }
 0x924   :  { %3237 = vmatpush1.msra.mxu0 %v7200_v59  ;;  %3308 = vmatpush1.msra.mxu1 %v7205_v50  ;;  %v8992_v59 = vld [vmem:[#allocation17_spill] sm:$0xff] }
 0x925   :  { %3238 = vmatprep.subr.mxu0 %v7212_v20  ;;  %3309 = vmatprep.subr.mxu1 %v7217_v53  ;;  %v2491_v50 = vadd.f32 %v8992_v59, %v7561_v54 }
 0x926   :  { %3239 = vmatpush1.msra.mxu0 %v7224_v11  ;;  %3310 = vmatpush1.msra.mxu1 %v7229_v61 }
 0x927   :  { %3240 = vmatprep.subr.mxu0 %v7236_v48  ;;  %3311 = vmatprep.subr.mxu1 %v7241_v62 }
 0x928   :  { %3241 = vmatpush1.msra.mxu0 %v7248_v49  ;;  %3312 = vmatpush1.msra.mxu1 %v7253_v51 }
 0x929   :  { %3242 = vmatprep.subr.mxu0 %v7260_v55  ;;  %3313 = vmatprep.subr.mxu1 %v7265_v29 }
 0x92a   :  { %3243 = vmatpush1.msra.mxu0 %v7272_v3  ;;  %3314 = vmatpush1.msra.mxu1 %v7277_v57 }
 0x92b   :  { %3244 = vmatprep.subr.mxu0 %v7284_v56  ;;  %3315 = vmatprep.subr.mxu1 %v7289_v60 }
 0x92c   :  { %3245 = vmatpush1.msra.mxu0 %v7296_v2  ;;  %3316 = vmatpush1.msra.mxu1 %v7301_v4 }
 0x92d   :  { %3246 = vmatprep.subr.mxu0 %v8970_v17  ;;  %3317 = vmatprep.subr.mxu1 %v8971_v25 }
 0x92e   :  { %3247 = vmatpush1.msra.mxu0 %v8972_v26  ;;  %3318 = vmatpush1.msra.mxu1 %v8973_v28 }
 0x92f   :  { %3248 = vmatprep.subr.mxu0 %v8974_v30  ;;  %3319 = vmatprep.subr.mxu1 %v8975_v31 }
 0x930   :  { %3249 = vmatpush1.msra.mxu0 %v8976_v32  ;;  %3320 = vmatpush1.msra.mxu1 %v8977_v33 }
 0x931   :  { %3250 = vmatprep.subr.mxu0 %v8978_v34  ;;  %3321 = vmatprep.subr.mxu1 %v8979_v35 }
 0x932   :  { %3251 = vmatpush1.msra.mxu0 %v8980_v36  ;;  %3322 = vmatpush1.msra.mxu1 %v8981_v37 }
 0x933   :  { %3252 = vmatprep.subr.mxu0 %v8982_v39  ;;  %3323 = vmatprep.subr.mxu1 %v8983_v40 }
 0x934   :  { %3253 = vmatpush1.msra.mxu0 %v8984_v41  ;;  %3324 = vmatpush1.msra.mxu1 %v8985_v42 }
 0x935   :  { %3254 = vmatprep.subr.mxu0 %v8986_v43  ;;  %3325 = vmatprep.subr.mxu1 %v8987_v46 }
 0x936   :  { %3255 = vmatpush1.msra.mxu0 %v8988_v47  ;;  %3288 = vmatprep.mubr.f32.mxu0 %v8989_v27 }
 0x937   :  { %3326 = vmatpush1.msra.mxu1 %v8990_v45  ;;  %3359 = vmatprep.mubr.f32.mxu1 %v8989_v27 }
 0x9d7   :  { %v3051_v38 = vpop.f32.mrf.mxu0  ;;  %v3122_v58 = vpop.f32.mrf.mxu1 }
 0x9d8   :  { %v3127_v20 = vadd.f32 %v3051_v38, %v2489_v1  ;;  %v3129_v0 = vadd.f32 %v3122_v58, %v2602_v19  ;;  %v7677_v58 = vld [vmem:[%s8519_s5 + $0x1e0] sm:$0xff]  ;;  %v7718_v19 = vld [vmem:[%s8519_s5 + $0x1b8] sm:$0xff] }
 0x9d9   :  { %v3053_v53 = vpop.f32.mrf.mxu0  ;;  %v3124_v6 = vpop.f32.mrf.mxu1 }
 0x9da   :  { %v4721_v11 = vmul.f32 -1.442695, %v3127_v20  ;;  %v3128_v61 = vadd.f32 %v3053_v53, %v2491_v50  ;;  %v3130_v9 = vadd.f32 %v3124_v6, %v2604_v24  ;;  %v7689_v6 = vld [vmem:[%s8519_s5 + $0x1c8] sm:$0xff]  ;;  %v7701_v24 = vld [vmem:[%s8519_s5 + $0x1c0] sm:$0xff] }
 0x9dc   :  { %4941 = vpow2.f32 %v4721_v11  ;;  %v4722_v21 = vmul.f32 -1.442695, %v3128_v61  ;;  %v4723_v16 = vmul.f32 -1.442695, %v3130_v9  ;;  %v7665_v61 = vld [vmem:[%s8519_s5 + $0x1e8] sm:$0xff]  ;;  %v7706_v9 = vld [vmem:[%s8519_s5 + $0x1d0] sm:$0xff] }
 0x9dd   :  { %8996 = vst [vmem:[#allocation31_spill] sm:$0xff] %v7665_v61  ;;  %3463 = vmatprep.subr.mxu0 %v7665_v61 }
 0x9de   :  { %4943 = vpow2.f32 %v4722_v21  ;;  %v7682_v21 = vld [vmem:[%s8519_s5 + $0x1f0] sm:$0xff] }
 0x9df   :  { %4945 = vtanh.f32 %v3129_v0  ;;  %v7725_v0 = vld [vmem:[%s8519_s5 + $0x1a0] sm:$0xff] }
 0x9e0   :  { %4947 = vpow2.f32 %v4723_v16  ;;  %v7730_v16 = vld [vmem:[%s8519_s5 + $0x1b0] sm:$0xff] }
 0x9e9   :  { %v4942_v10 = vpop.eup %4941 }
 0x9ea   :  { %v3134_v7 = vadd.f32 1.0, %v4942_v10  ;;  %v7737_v10 = vld [vmem:[%s8519_s5 + $0x188] sm:$0xff] }
 0x9eb   :  { %v4944_v44 = vpop.eup %4943 }
 0x9ec   :  { %4949 = vrcp.f32 %v3134_v7  ;;  %v3140_v8 = vadd.f32 1.0, %v4944_v44  ;;  %v4946_v12 = vpop.eup %4945  ;;  %v7742_v7 = vld [vmem:[%s8519_s5 + $0x198] sm:$0xff]  ;;  %v7749_v44 = vld [vmem:[%s8519_s5 + $0x180] sm:$0xff] }
 0x9ed   :  { %v4948_v5 = vpop.eup %4947 }
 0x9ee   :  { %4951 = vrcp.f32 %v3140_v8  ;;  %v3147_v38 = vadd.f32 1.0, %v4948_v5  ;;  %v7754_v8 = vld [vmem:[%s8519_s5 + $0x190] sm:$0xff]  ;;  %v7766_v5 = vld [vmem:[%s8519_s5 + $0x178] sm:$0xff] }
 0x9f0   :  { %4953 = vrcp.f32 %v3147_v38  ;;  %v7790_v38 = vld [vmem:[%s8519_s5 + $0x158] sm:$0xff] }
 0x9f1   :  { %8998 = vst [vmem:[#allocation34_spill] sm:$0xff] %v7790_v38 }
 0x9f9   :  { %v4950_v23 = vpop.eup %4949 }
 0x9fa   :  { %v3151_v52 = vmul.f32 %v4950_v23, %v4946_v12  ;;  %v7761_v12 = vld [vmem:[%s8519_s5 + $0x168] sm:$0xff]  ;;  %v7773_v23 = vld [vmem:[%s8519_s5 + $0x160] sm:$0xff] }
 0x9fb   :  { %v4952_v1 = vpop.eup %4951 }
 0x9fc   :  { %v3150_v59 = vmul.f32 %v4952_v1, %v7581_v22  ;;  %v7670_v22 = vld [vmem:[%s8519_s5 + $0x1f8] sm:$0xff]  ;;  %v7785_v1 = vld [vmem:[%s8519_s5 + $0x148] sm:$0xff] }
 0x9fd   :  { %v4954_v20 = vpop.eup %4953  ;;  %8997 = vst [vmem:[#allocation33_spill] sm:$0xff] %v7670_v22  ;;  %3534 = vmatprep.subr.mxu1 %v7670_v22 }
 0x9fe   :  { %v7657_v50 = vadd.f32 %v3151_v52, %v3150_v59  ;;  %v7778_v52 = vld [vmem:[%s8519_s5 + $0x170] sm:$0xff]  ;;  %v7797_v59 = vld [vmem:[%s8519_s5 + $0x140] sm:$0xff] }
 0x9ff   :  { %8999 = vst [vmem:[#allocation32_spill] sm:$0xff] %v7797_v59 }
 0xa00   :  { %4955 = vtanh.f32 %v7657_v50 }
 0xa0d   :  { %v4956_v53 = vpop.eup %4955 }
 0xa0e   :  { %v3154_v11 = vmul.f32 %v4956_v53, %v4954_v20  ;;  %v7802_v20 = vld [vmem:[%s8519_s5 + $0x150] sm:$0xff]  ;;  %v7809_v53 = vld [vmem:[%s8519_s5 + $0x128] sm:$0xff] }
 0xa0f   :  { %9000 = vst [vmem:[#allocation35_spill] sm:$0xff] %v7802_v20  ;;  %9001 = vst [vmem:[#allocation37_spill] sm:$0xff] %v7809_v53 }
 0xa10   :  { %3289 = vmatmul.mubr.f32.vlgmr.msra.gmra.mxu0 %v3154_v11  ;;  %3360 = vmatmul.mubr.f32.vlgmr.msra.gmra.mxu1 %v3154_v11  ;;  %v7814_v11 = vld [vmem:[%s8519_s5 + $0x138] sm:$0xff] }
 0xa11   :  { %3527 = vmatprep.mubr.f32.mxu0 %v8989_v27  ;;  %3598 = vmatprep.mubr.f32.mxu1 %v8989_v27  ;;  %9002 = vst [vmem:[#allocation38_spill] sm:$0xff] %v7814_v11  ;;  %v7821_v27 = vld [vmem:[%s8519_s5 + $0x120] sm:$0xff] }
 0xa12   :  { %3464 = vmatpush1.msra.mxu0 %v7677_v58  ;;  %3535 = vmatpush1.msra.mxu1 %v7682_v21 }
 0xa13   :  { %3465 = vmatprep.subr.mxu0 %v7689_v6  ;;  %3536 = vmatprep.subr.mxu1 %v7694_v63 }
 0xa14   :  { %3466 = vmatpush1.msra.mxu0 %v7701_v24  ;;  %3537 = vmatpush1.msra.mxu1 %v7706_v9 }
 0xa15   :  { %3467 = vmatprep.subr.mxu0 %v7713_v14  ;;  %3538 = vmatprep.subr.mxu1 %v7718_v19 }
 0xa16   :  { %3468 = vmatpush1.msra.mxu0 %v7725_v0  ;;  %3539 = vmatpush1.msra.mxu1 %v7730_v16 }
 0xa17   :  { %3469 = vmatprep.subr.mxu0 %v7737_v10  ;;  %3540 = vmatprep.subr.mxu1 %v7742_v7 }
 0xa18   :  { %3470 = vmatpush1.msra.mxu0 %v7749_v44  ;;  %3541 = vmatpush1.msra.mxu1 %v7754_v8 }
 0xa19   :  { %3471 = vmatprep.subr.mxu0 %v7761_v12  ;;  %3542 = vmatprep.subr.mxu1 %v7766_v5 }
 0xa1a   :  { %3472 = vmatpush1.msra.mxu0 %v7773_v23  ;;  %3543 = vmatpush1.msra.mxu1 %v7778_v52 }
 0xa1b   :  { %3473 = vmatprep.subr.mxu0 %v7785_v1  ;;  %3544 = vmatprep.subr.mxu1 %v7790_v38  ;;  %v7848_v38 = vld [vmem:[%s8519_s5 + $0x110] sm:$0xff] }
 0xa1c   :  { %3474 = vmatpush1.msra.mxu0 %v7797_v59  ;;  %3545 = vmatpush1.msra.mxu1 %v7802_v20  ;;  %v7826_v20 = vld [vmem:[%s8519_s5 + $0x130] sm:$0xff]  ;;  %v7831_v59 = vld [vmem:[%s8519_s5 + $0x108] sm:$0xff] }
 0xa1d   :  { %3475 = vmatprep.subr.mxu0 %v7809_v53  ;;  %3546 = vmatprep.subr.mxu1 %v7814_v11  ;;  %v7838_v11 = vld [vmem:[%s8519_s5 + $0x118] sm:$0xff]  ;;  %v7843_v53 = vld [vmem:[%s8519_s5 + $0x100] sm:$0xff] }
 0xa1e   :  { %3476 = vmatpush1.msra.mxu0 %v7821_v27  ;;  %3547 = vmatpush1.msra.mxu1 %v7826_v20 }
 0xa1f   :  { %3477 = vmatprep.subr.mxu0 %v7831_v59  ;;  %3548 = vmatprep.subr.mxu1 %v7838_v11 }
 0xa20   :  { %3478 = vmatpush1.msra.mxu0 %v7843_v53  ;;  %3549 = vmatpush1.msra.mxu1 %v7848_v38 }
 0xa21   :  { %3479 = vmatprep.subr.mxu0 %v7236_v48  ;;  %3550 = vmatprep.subr.mxu1 %v7241_v62  ;;  %v9003_v48 = vld [vmem:[#allocation19_spill] sm:$0xff] }
 0xa22   :  { %3480 = vmatpush1.msra.mxu0 %v7248_v49  ;;  %3551 = vmatpush1.msra.mxu1 %v7253_v51  ;;  %v2495_v62 = vadd.f32 %v9003_v48, %v7553_v18  ;;  %v9004_v51 = vld [vmem:[#allocation21_spill] sm:$0xff] }
 0xa23   :  { %3481 = vmatprep.subr.mxu0 %v7260_v55  ;;  %3552 = vmatprep.subr.mxu1 %v7265_v29  ;;  %v2497_v55 = vadd.f32 %v9004_v51, %v7561_v54  ;;  %v9009_v51 = vld [vmem:[#allocation35_spill] sm:$0xff] }
 0xa24   :  { %3482 = vmatpush1.msra.mxu0 %v7272_v3  ;;  %3553 = vmatpush1.msra.mxu1 %v7277_v57 }
 0xa25   :  { %3483 = vmatprep.subr.mxu0 %v7284_v56  ;;  %3554 = vmatprep.subr.mxu1 %v7289_v60 }
 0xa26   :  { %3484 = vmatpush1.msra.mxu0 %v7296_v2  ;;  %3555 = vmatpush1.msra.mxu1 %v7301_v4 }
 0xa27   :  { %3485 = vmatprep.subr.mxu0 %v8970_v17  ;;  %3556 = vmatprep.subr.mxu1 %v8971_v25  ;;  %v9005_v17 = vld [vmem:[#allocation22_spill] sm:$0xff] }
 0xa28   :  { %3486 = vmatpush1.msra.mxu0 %v8972_v26  ;;  %3557 = vmatpush1.msra.mxu1 %v8973_v28  ;;  %v2610_v25 = vadd.f32 %v9005_v17, %v8993_v13  ;;  %v9006_v28 = vld [vmem:[#allocation20_spill] sm:$0xff]  ;;  %v7962_v17 = vld [vmem:[%s8519_s5 + $0xd8] sm:$0xff] }
 0xa29   :  { %3487 = vmatprep.subr.mxu0 %v8974_v30  ;;  %3558 = vmatprep.subr.mxu1 %v8975_v31  ;;  %v2608_v30 = vadd.f32 %v9006_v28, %v7578_v15  ;;  %v7979_v28 = vld [vmem:[%s8519_s5 + $0xa8] sm:$0xff] }
 0xa2a   :  { %3488 = vmatpush1.msra.mxu0 %v8976_v32  ;;  %3559 = vmatpush1.msra.mxu1 %v8977_v33 }
 0xa2b   :  { %3489 = vmatprep.subr.mxu0 %v8978_v34  ;;  %3560 = vmatprep.subr.mxu1 %v8979_v35 }
 0xa2c   :  { %3490 = vmatpush1.msra.mxu0 %v8980_v36  ;;  %3561 = vmatpush1.msra.mxu1 %v8981_v37 }
 0xa2d   :  { %3491 = vmatprep.subr.mxu0 %v8982_v39  ;;  %3562 = vmatprep.subr.mxu1 %v8983_v40 }
 0xa2e   :  { %3492 = vmatpush1.msra.mxu0 %v8984_v41  ;;  %3563 = vmatpush1.msra.mxu1 %v8985_v42 }
 0xa2f   :  { %3493 = vmatprep.subr.mxu0 %v8986_v43  ;;  %3564 = vmatprep.subr.mxu1 %v8987_v46 }
 0xa30   :  { %3494 = vmatpush1.msra.mxu0 %v8988_v47  ;;  %3565 = vmatpush1.msra.mxu1 %v8990_v45 }
 0xa31   :  { %3702 = vmatprep.subr.mxu0 %v7665_v61  ;;  %3773 = vmatprep.subr.mxu1 %v7670_v22 }
 0xad0   :  { %v3290_v49 = vpop.f32.mrf.mxu0  ;;  %v3361_v60 = vpop.f32.mrf.mxu1 }
 0xad1   :  { %v3366_v29 = vadd.f32 %v3290_v49, %v2495_v62  ;;  %v3368_v31 = vadd.f32 %v3361_v60, %v2608_v30  ;;  %v9008_v49 = vld [vmem:[#allocation32_spill] sm:$0xff]  ;;  %v7945_v60 = vld [vmem:[%s8519_s5 + $0xe0] sm:$0xff]  ;;  %v7986_v30 = vld [vmem:[%s8519_s5 + $0xb8] sm:$0xff] }
 0xad2   :  { %v3292_v3 = vpop.f32.mrf.mxu0  ;;  %v3363_v4 = vpop.f32.mrf.mxu1 }
 0xad3   :  { %v4724_v57 = vmul.f32 -1.442695, %v3366_v29  ;;  %v3367_v56 = vadd.f32 %v3292_v3, %v2497_v55  ;;  %v3369_v26 = vadd.f32 %v3363_v4, %v2610_v25  ;;  %v9010_v55 = vld [vmem:[#allocation37_spill] sm:$0xff]  ;;  %v9011_v29 = vld [vmem:[#allocation38_spill] sm:$0xff]  ;;  %v9012_v3 = vmov 0.0   ;;  %v7957_v4 = vld [vmem:[%s8519_s5 + $0xc8] sm:$0xff] }
 0xad4   :  { %v7969_v25 = vld [vmem:[%s8519_s5 + $0xc0] sm:$0xff] }
 0xad5   :  { %4957 = vpow2.f32 %v4724_v57  ;;  %v4725_v2 = vmul.f32 -1.442695, %v3367_v56  ;;  %v4726_v32 = vmul.f32 -1.442695, %v3369_v26  ;;  %v7935_v57 = vld [vmem:[%s8519_s5 + $0xe8] sm:$0xff]  ;;  %v7940_v56 = vld [vmem:[%s8519_s5 + $0xf8] sm:$0xff] }
 0xad6   :  { %v7974_v26 = vld [vmem:[%s8519_s5 + $0xd0] sm:$0xff] }
 0xad7   :  { %4959 = vpow2.f32 %v4725_v2  ;;  %v7952_v2 = vld [vmem:[%s8519_s5 + $0xf0] sm:$0xff] }
 0xad8   :  { %4961 = vtanh.f32 %v3368_v31  ;;  %v7991_v31 = vld [vmem:[%s8519_s5 + $0xa0] sm:$0xff] }
 0xad9   :  { %4963 = vpow2.f32 %v4726_v32  ;;  %v7996_v32 = vld [vmem:[%s8519_s5 + $0xb0] sm:$0xff] }
 0xada   :  { %9013 = vst [vmem:[#allocation36_spill] sm:$0xff] %v7996_v32 }
 0xae2   :  { %v4958_v33 = vpop.eup %4957 }
 0xae3   :  { %v3373_v34 = vadd.f32 1.0, %v4958_v33  ;;  %v8003_v33 = vld [vmem:[%s8519_s5 + $0x88] sm:$0xff] }
 0xae4   :  { %v4960_v35 = vpop.eup %4959  ;;  %9014 = vst [vmem:[#allocation7_spill] sm:$0xff] %v8003_v33 }
 0xae5   :  { %4965 = vrcp.f32 %v3373_v34  ;;  %v3379_v36 = vadd.f32 1.0, %v4960_v35  ;;  %v4962_v37 = vpop.eup %4961  ;;  %v8008_v34 = vld [vmem:[%s8519_s5 + $0x98] sm:$0xff]  ;;  %v8015_v35 = vld [vmem:[%s8519_s5 + $0x80] sm:$0xff] }
 0xae6   :  { %v4964_v39 = vpop.eup %4963  ;;  %9015 = vst [vmem:[#allocation8_spill] sm:$0xff] %v8008_v34  ;;  %9016 = vst [vmem:[#allocation39_spill] sm:$0xff] %v8015_v35 }
 0xae7   :  { %4967 = vrcp.f32 %v3379_v36  ;;  %v3386_v43 = vadd.f32 1.0, %v4964_v39  ;;  %v8020_v36 = vld [vmem:[%s8519_s5 + $0x90] sm:$0xff]  ;;  %v8032_v39 = vld [vmem:[%s8519_s5 + $0x78] sm:$0xff] }
 0xae8   :  { %9017 = vst [vmem:[#allocation41_spill] sm:$0xff] %v8020_v36  ;;  %9019 = vst [vmem:[#allocation40_spill] sm:$0xff] %v8032_v39 }
 0xae9   :  { %4969 = vrcp.f32 %v3386_v43  ;;  %v8056_v43 = vld [vmem:[%s8519_s5 + $0x58] sm:$0xff] }
 0xaea   :  { %9023 = vst [vmem:[#allocation12_spill] sm:$0xff] %v8056_v43 }
 0xaf2   :  { %v4966_v40 = vpop.eup %4965 }
 0xaf3   :  { %v3390_v41 = vmul.f32 %v4966_v40, %v4962_v37  ;;  %v8027_v37 = vld [vmem:[%s8519_s5 + $0x68] sm:$0xff]  ;;  %v8039_v40 = vld [vmem:[%s8519_s5 + $0x60] sm:$0xff] }
 0xaf4   :  { %v4968_v42 = vpop.eup %4967  ;;  %9018 = vst [vmem:[#allocation42_spill] sm:$0xff] %v8027_v37  ;;  %9020 = vst [vmem:[#allocation9_spill] sm:$0xff] %v8039_v40 }
 0xaf5   :  { %v3389_v46 = vmul.f32 %v4968_v42, %v7657_v50  ;;  %v9007_v50 = vld [vmem:[#allocation34_spill] sm:$0xff]  ;;  %v8051_v42 = vld [vmem:[%s8519_s5 + $0x48] sm:$0xff] }
 0xaf6   :  { %v4970_v45 = vpop.eup %4969  ;;  %9022 = vst [vmem:[#allocation11_spill] sm:$0xff] %v8051_v42 }
 0xaf7   :  { %v7897_v47 = vadd.f32 %v3390_v41, %v3389_v46  ;;  %v8044_v41 = vld [vmem:[%s8519_s5 + $0x70] sm:$0xff]  ;;  %v8063_v46 = vld [vmem:[%s8519_s5 + $0x40] sm:$0xff] }
 0xaf8   :  { %9021 = vst [vmem:[#allocation10_spill] sm:$0xff] %v8044_v41  ;;  %9024 = vst [vmem:[#allocation13_spill] sm:$0xff] %v8063_v46 }
 0xaf9   :  { %4971 = vtanh.f32 %v7897_v47 }
 0xb06   :  { %v4972_v48 = vpop.eup %4971 }
 0xb07   :  { %v3393_v62 = vmul.f32 %v4972_v48, %v4970_v45  ;;  %v8068_v45 = vld [vmem:[%s8519_s5 + $0x50] sm:$0xff]  ;;  %v8075_v48 = vld [vmem:[%s8519_s5 + $0x28] sm:$0xff] }
 0xb08   :  { %9025 = vst [vmem:[#allocation14_spill] sm:$0xff] %v8068_v45  ;;  %9026 = vst [vmem:[#allocation15_spill] sm:$0xff] %v8075_v48 }
 0xb09   :  { %3528 = vmatmul.mubr.f32.vlgmr.msra.gmra.mxu0 %v3393_v62  ;;  %3599 = vmatmul.mubr.f32.vlgmr.msra.gmra.mxu1 %v3393_v62  ;;  %v8080_v62 = vld [vmem:[%s8519_s5 + $0x38] sm:$0xff] }
 0xb0a   :  { %3703 = vmatpush1.msra.mxu0 %v7677_v58  ;;  %3774 = vmatpush1.msra.mxu1 %v7682_v21  ;;  %9027 = vst [vmem:[#allocation17_spill] sm:$0xff] %v8080_v62 }
 0xb0b   :  { %3704 = vmatprep.subr.mxu0 %v7689_v6  ;;  %3775 = vmatprep.subr.mxu1 %v7694_v63 }
 0xb0c   :  { %3705 = vmatpush1.msra.mxu0 %v7701_v24  ;;  %3776 = vmatpush1.msra.mxu1 %v7706_v9 }
 0xb0d   :  { %3706 = vmatprep.subr.mxu0 %v7713_v14  ;;  %3777 = vmatprep.subr.mxu1 %v7718_v19 }
 0xb0e   :  { %3707 = vmatpush1.msra.mxu0 %v7725_v0  ;;  %3778 = vmatpush1.msra.mxu1 %v7730_v16 }
 0xb0f   :  { %3708 = vmatprep.subr.mxu0 %v7737_v10  ;;  %3779 = vmatprep.subr.mxu1 %v7742_v7 }
 0xb10   :  { %3709 = vmatpush1.msra.mxu0 %v7749_v44  ;;  %3780 = vmatpush1.msra.mxu1 %v7754_v8 }
 0xb11   :  { %3710 = vmatprep.subr.mxu0 %v7761_v12  ;;  %3781 = vmatprep.subr.mxu1 %v7766_v5 }
 0xb12   :  { %3711 = vmatpush1.msra.mxu0 %v7773_v23  ;;  %3782 = vmatpush1.msra.mxu1 %v7778_v52 }
 0xb13   :  { %3712 = vmatprep.subr.mxu0 %v7785_v1  ;;  %3783 = vmatprep.subr.mxu1 %v9007_v50 }
 0xb14   :  { %3713 = vmatpush1.msra.mxu0 %v9008_v49  ;;  %3784 = vmatpush1.msra.mxu1 %v9009_v51 }
 0xb15   :  { %3714 = vmatprep.subr.mxu0 %v9010_v55  ;;  %3785 = vmatprep.subr.mxu1 %v9011_v29 }
 0xb16   :  { %3715 = vmatpush1.msra.mxu0 %v7821_v27  ;;  %3786 = vmatpush1.msra.mxu1 %v7826_v20 }
 0xb17   :  { %3716 = vmatprep.subr.mxu0 %v7831_v59  ;;  %3787 = vmatprep.subr.mxu1 %v7838_v11 }
 0xb18   :  { %3717 = vmatpush1.msra.mxu0 %v7843_v53  ;;  %3788 = vmatpush1.msra.mxu1 %v7848_v38 }
 0xb19   :  { %3766 = vmatprep.mubr.f32.mxu0 %v9012_v3  ;;  %3837 = vmatprep.mubr.f32.mxu1 %v9012_v3  ;;  %v8087_v3 = vld [vmem:[%s8519_s5 + $0x20] sm:$0xff] }
 0xb1a   :  { %3718 = vmatprep.subr.mxu0 %v7935_v57  ;;  %3789 = vmatprep.subr.mxu1 %v7940_v56  ;;  %9028 = vst [vmem:[#allocation27_spill] sm:$0xff] %v8087_v3 }
 0xb1b   :  { %3719 = vmatpush1.msra.mxu0 %v7945_v60  ;;  %3790 = vmatpush1.msra.mxu1 %v7952_v2 }
 0xb1c   :  { %3720 = vmatprep.subr.mxu0 %v7957_v4  ;;  %3791 = vmatprep.subr.mxu1 %v7962_v17 }
 0xb1d   :  { %3721 = vmatpush1.msra.mxu0 %v7969_v25  ;;  %3792 = vmatpush1.msra.mxu1 %v7974_v26 }
 0xb1e   :  { %3722 = vmatprep.subr.mxu0 %v7979_v28  ;;  %3793 = vmatprep.subr.mxu1 %v7986_v30 }
 0xb1f   :  { %3723 = vmatpush1.msra.mxu0 %v7991_v31  ;;  %3794 = vmatpush1.msra.mxu1 %v7996_v32 }
 0xb20   :  { %3724 = vmatprep.subr.mxu0 %v8003_v33  ;;  %3795 = vmatprep.subr.mxu1 %v8008_v34  ;;  %v9037_v34 = vld [vmem:[#allocation24_spill] sm:$0xff] }
 0xb21   :  { %3725 = vmatpush1.msra.mxu0 %v8015_v35  ;;  %3796 = vmatpush1.msra.mxu1 %v8020_v36 }
 0xb22   :  { %3726 = vmatprep.subr.mxu0 %v8027_v37  ;;  %3797 = vmatprep.subr.mxu1 %v8032_v39 }
 0xb23   :  { %3727 = vmatpush1.msra.mxu0 %v8039_v40  ;;  %3798 = vmatpush1.msra.mxu1 %v8044_v41  ;;  %v8092_v41 = vld [vmem:[%s8519_s5 + $0x30] sm:$0xff] }
 0xb24   :  { %3728 = vmatprep.subr.mxu0 %v8051_v42  ;;  %3799 = vmatprep.subr.mxu1 %v8056_v43  ;;  %9029 = vst [vmem:[#allocation18_spill] sm:$0xff] %v8092_v41  ;;  %v8099_v42 = vld [vmem:[%s8519_s5 + $0x8] sm:$0xff]  ;;  %v8104_v43 = vld [vmem:[%s8519_s5 + $0x18] sm:$0xff] }
 0xb25   :  { %3729 = vmatpush1.msra.mxu0 %v8063_v46  ;;  %3800 = vmatpush1.msra.mxu1 %v8068_v45  ;;  %9030 = vst [vmem:[#allocation16_spill] sm:$0xff] %v8099_v42  ;;  %9031 = vst [vmem:[#allocation19_spill] sm:$0xff] %v8104_v43  ;;  %v8111_v46 = vld [vmem:[%s8519_s5] sm:$0xff]  ;;  %v8116_v45 = vld [vmem:[%s8519_s5 + $0x10] sm:$0xff] }
 0xb26   :  { %3730 = vmatprep.subr.mxu0 %v8075_v48  ;;  %3801 = vmatprep.subr.mxu1 %v8080_v62  ;;  %9032 = vst [vmem:[#allocation21_spill] sm:$0xff] %v8111_v46  ;;  %9033 = vst [vmem:[#allocation22_spill] sm:$0xff] %v8116_v45  ;;  %v9034_v62 = vld [vmem:[#allocation23_spill] sm:$0xff] }
 0xb27   :  { %3731 = vmatpush1.msra.mxu0 %v8087_v3  ;;  %3802 = vmatpush1.msra.mxu1 %v8092_v41  ;;  %v2501_v48 = vadd.f32 %v9034_v62, %v7553_v18  ;;  %v9035_v3 = vld [vmem:[#allocation25_spill] sm:$0xff]  ;;  %v2614_v62 = vadd.f32 %v9037_v34, %v7578_v15  ;;  %v9040_v34 = vld [vmem:[#allocation8_spill] sm:$0xff] }
 0xb28   :  { %3732 = vmatprep.subr.mxu0 %v8099_v42  ;;  %3803 = vmatprep.subr.mxu1 %v8104_v43  ;;  %v2503_v39 = vadd.f32 %v9035_v3, %v7561_v54 }
 0xb29   :  { %3733 = vmatpush1.msra.mxu0 %v8111_v46  ;;  %3804 = vmatpush1.msra.mxu1 %v8116_v45 }
 0xb2a   :  { %3941 = vmatprep.subr.mxu0 %v7665_v61  ;;  %4012 = vmatprep.subr.mxu1 %v7670_v22  ;;  %v9036_v61 = vld [vmem:[#allocation43_spill] sm:$0xff] }
 0xb2b   :  { %v2616_v35 = vadd.f32 %v9036_v61, %v8993_v13 }
 0xbc9   :  { %v3529_v40 = vpop.f32.mrf.mxu0  ;;  %v3600_v43 = vpop.f32.mrf.mxu1 }
 0xbca   :  { %v3605_v41 = vadd.f32 %v3529_v40, %v2501_v48  ;;  %v3607_v18 = vadd.f32 %v3600_v43, %v2614_v62  ;;  %v9041_v43 = vld [vmem:[#allocation39_spill] sm:$0xff]  ;;  %v9042_v48 = vld [vmem:[#allocation41_spill] sm:$0xff]  ;;  %v9043_v62 = vld [vmem:[#allocation42_spill] sm:$0xff] }
 0xbcb   :  { %v3531_v37 = vpop.f32.mrf.mxu0  ;;  %v3602_v45 = vpop.f32.mrf.mxu1 }
 0xbcc   :  { %v4727_v42 = vmul.f32 -1.442695, %v3605_v41  ;;  %v3606_v36 = vadd.f32 %v3531_v37, %v2503_v39  ;;  %v3608_v22 = vadd.f32 %v3602_v45, %v2616_v35 }
 0xbce   :  { %4973 = vpow2.f32 %v4727_v42  ;;  %v4728_v46 = vmul.f32 -1.442695, %v3606_v36  ;;  %v4729_v33 = vmul.f32 -1.442695, %v3608_v22 }
 0xbd0   :  { %4975 = vpow2.f32 %v4728_v46 }
 0xbd1   :  { %4977 = vtanh.f32 %v3607_v18 }
 0xbd2   :  { %4979 = vpow2.f32 %v4729_v33  ;;  %v9039_v33 = vld [vmem:[#allocation7_spill] sm:$0xff] }
 0xbdb   :  { %v4974_v32 = vpop.eup %4973 }
 0xbdc   :  { %v3612_v3 = vadd.f32 1.0, %v4974_v32 }
 0xbdd   :  { %v4976_v40 = vpop.eup %4975 }
 0xbde   :  { %4981 = vrcp.f32 %v3612_v3  ;;  %v3618_v37 = vadd.f32 1.0, %v4976_v40  ;;  %v4978_v36 = vpop.eup %4977  ;;  %v9044_v3 = vld [vmem:[#allocation40_spill] sm:$0xff]  ;;  %v9045_v40 = vld [vmem:[#allocation9_spill] sm:$0xff] }
 0xbdf   :  { %v4980_v39 = vpop.eup %4979 }
 0xbe0   :  { %4983 = vrcp.f32 %v3618_v37  ;;  %v3625_v61 = vadd.f32 1.0, %v4980_v39  ;;  %v9046_v37 = vld [vmem:[#allocation10_spill] sm:$0xff]  ;;  %v9048_v39 = vld [vmem:[#allocation12_spill] sm:$0xff] }
 0xbe2   :  { %4985 = vrcp.f32 %v3625_v61  ;;  %v9052_v61 = vld [vmem:[#allocation17_spill] sm:$0xff] }
 0xbeb   :  { %v4982_v41 = vpop.eup %4981 }
 0xbec   :  { %v3629_v42 = vmul.f32 %v4982_v41, %v4978_v36  ;;  %v9047_v36 = vld [vmem:[#allocation11_spill] sm:$0xff]  ;;  %v9049_v41 = vld [vmem:[#allocation13_spill] sm:$0xff] }
 0xbed   :  { %v4984_v46 = vpop.eup %4983 }
 0xbee   :  { %v3628_v35 = vmul.f32 %v4984_v46, %v7897_v47  ;;  %v9038_v47 = vld [vmem:[#allocation36_spill] sm:$0xff]  ;;  %v9051_v46 = vld [vmem:[#allocation15_spill] sm:$0xff] }
 0xbef   :  { %v4986_v22 = vpop.eup %4985 }
 0xbf0   :  { %v8135_v45 = vadd.f32 %v3629_v42, %v3628_v35  ;;  %v9050_v42 = vld [vmem:[#allocation14_spill] sm:$0xff]  ;;  %v9053_v35 = vld [vmem:[#allocation27_spill] sm:$0xff] }
 0xbf2   :  { %4987 = vtanh.f32 %v8135_v45 }
 0xbff   :  { %v4988_v18 = vpop.eup %4987 }
 0xc00   :  { %v3632_v32 = vmul.f32 %v4988_v18, %v4986_v22  ;;  %v9054_v22 = vld [vmem:[#allocation18_spill] sm:$0xff]  ;;  %v9055_v18 = vld [vmem:[#allocation16_spill] sm:$0xff] }
 0xc02   :  { %3767 = vmatmul.mubr.f32.vlgmr.msra.gmra.mxu0 %v3632_v32  ;;  %3838 = vmatmul.mubr.f32.vlgmr.msra.gmra.mxu1 %v3632_v32  ;;  %v9056_v32 = vld [vmem:[#allocation19_spill] sm:$0xff] }
 0xc03   :  { %3942 = vmatpush1.msra.mxu0 %v7677_v58  ;;  %4013 = vmatpush1.msra.mxu1 %v7682_v21 }
 0xc04   :  { %3943 = vmatprep.subr.mxu0 %v7689_v6  ;;  %4014 = vmatprep.subr.mxu1 %v7694_v63 }
 0xc05   :  { %3944 = vmatpush1.msra.mxu0 %v7701_v24  ;;  %4015 = vmatpush1.msra.mxu1 %v7706_v9 }
 0xc06   :  { %3945 = vmatprep.subr.mxu0 %v7713_v14  ;;  %4016 = vmatprep.subr.mxu1 %v7718_v19 }
 0xc07   :  { %3946 = vmatpush1.msra.mxu0 %v7725_v0  ;;  %4017 = vmatpush1.msra.mxu1 %v7730_v16 }
 0xc08   :  { %3947 = vmatprep.subr.mxu0 %v7737_v10  ;;  %4018 = vmatprep.subr.mxu1 %v7742_v7 }
 0xc09   :  { %3948 = vmatpush1.msra.mxu0 %v7749_v44  ;;  %4019 = vmatpush1.msra.mxu1 %v7754_v8 }
 0xc0a   :  { %3949 = vmatprep.subr.mxu0 %v7761_v12  ;;  %4020 = vmatprep.subr.mxu1 %v7766_v5 }
 0xc0b   :  { %3950 = vmatpush1.msra.mxu0 %v7773_v23  ;;  %4021 = vmatpush1.msra.mxu1 %v7778_v52 }
 0xc0c   :  { %3951 = vmatprep.subr.mxu0 %v7785_v1  ;;  %4022 = vmatprep.subr.mxu1 %v9007_v50 }
 0xc0d   :  { %3952 = vmatpush1.msra.mxu0 %v9008_v49  ;;  %4023 = vmatpush1.msra.mxu1 %v9009_v51 }
 0xc0e   :  { %3953 = vmatprep.subr.mxu0 %v9010_v55  ;;  %4024 = vmatprep.subr.mxu1 %v9011_v29 }
 0xc0f   :  { %3954 = vmatpush1.msra.mxu0 %v7821_v27  ;;  %4025 = vmatpush1.msra.mxu1 %v7826_v20 }
 0xc10   :  { %3955 = vmatprep.subr.mxu0 %v7831_v59  ;;  %4026 = vmatprep.subr.mxu1 %v7838_v11 }
 0xc11   :  { %3956 = vmatpush1.msra.mxu0 %v7843_v53  ;;  %4027 = vmatpush1.msra.mxu1 %v7848_v38 }
 0xc12   :  { %3957 = vmatprep.subr.mxu0 %v7935_v57  ;;  %4028 = vmatprep.subr.mxu1 %v7940_v56 }
 0xc13   :  { %3958 = vmatpush1.msra.mxu0 %v7945_v60  ;;  %4029 = vmatpush1.msra.mxu1 %v7952_v2 }
 0xc14   :  { %3959 = vmatprep.subr.mxu0 %v7957_v4  ;;  %4030 = vmatprep.subr.mxu1 %v7962_v17 }
 0xc15   :  { %3960 = vmatpush1.msra.mxu0 %v7969_v25  ;;  %4031 = vmatpush1.msra.mxu1 %v7974_v26 }
 0xc16   :  { %3961 = vmatprep.subr.mxu0 %v7979_v28  ;;  %4032 = vmatprep.subr.mxu1 %v7986_v30 }
 0xc17   :  { %3962 = vmatpush1.msra.mxu0 %v7991_v31  ;;  %4033 = vmatpush1.msra.mxu1 %v9038_v47 }
 0xc18   :  { %3963 = vmatprep.subr.mxu0 %v9039_v33  ;;  %4034 = vmatprep.subr.mxu1 %v9040_v34  ;;  %v9066_v34 = vld [vmem:[#allocation46_spill] sm:$0xff] }
 0xc19   :  { %3964 = vmatpush1.msra.mxu0 %v9041_v43  ;;  %4035 = vmatpush1.msra.mxu1 %v9042_v48 }
 0xc1a   :  { %3965 = vmatprep.subr.mxu0 %v9043_v62  ;;  %4036 = vmatprep.subr.mxu1 %v9044_v3 }
 0xc1b   :  { %3966 = vmatpush1.msra.mxu0 %v9045_v40  ;;  %4037 = vmatpush1.msra.mxu1 %v9046_v37  ;;  %v9057_v37 = vld [vmem:[#allocation21_spill] sm:$0xff] }
 0xc1c   :  { %3967 = vmatprep.subr.mxu0 %v9047_v36  ;;  %4038 = vmatprep.subr.mxu1 %v9048_v39  ;;  %v9058_v36 = vmov 0.0   ;;  %v9059_v39 = vld [vmem:[#allocation22_spill] sm:$0xff] }
 0xc1d   :  { %3968 = vmatpush1.msra.mxu0 %v9049_v41  ;;  %4039 = vmatpush1.msra.mxu1 %v9050_v42  ;;  %v9060_v42 = vld [vmem:[#allocation31_spill] sm:$0xff] }
 0xc1e   :  { %3969 = vmatprep.subr.mxu0 %v9051_v46  ;;  %4040 = vmatprep.subr.mxu1 %v9052_v61  ;;  %v9061_v46 = vld [vmem:[#allocation33_spill] sm:$0xff]  ;;  %v9062_v61 = vld [vmem:[#allocation51_spill] sm:$0xff] }
 0xc1f   :  { %3970 = vmatpush1.msra.mxu0 %v9053_v35  ;;  %4041 = vmatpush1.msra.mxu1 %v9054_v22  ;;  %v9063_v35 = vld [vmem:[#allocation45_spill] sm:$0xff] }
 0xc20   :  { %3971 = vmatprep.subr.mxu0 %v9055_v18  ;;  %4042 = vmatprep.subr.mxu1 %v9056_v32  ;;  %v2507_v41 = vadd.f32 %v9063_v35, %v9062_v61  ;;  %v9064_v18 = vld [vmem:[#allocation44_spill] sm:$0xff]  ;;  %v2620_v35 = vadd.f32 %v9066_v34, %v7578_v15 }
 0xc21   :  { %3972 = vmatpush1.msra.mxu0 %v9057_v37  ;;  %4005 = vmatprep.mubr.f32.mxu0 %v9058_v36  ;;  %v2509_v40 = vadd.f32 %v9064_v18, %v7561_v54 }
 0xc22   :  { %4043 = vmatpush1.msra.mxu1 %v9059_v39  ;;  %4076 = vmatprep.mubr.f32.mxu1 %v9058_v36 }
 0xc23   :  { %4180 = vmatprep.subr.mxu0 %v9060_v42  ;;  %4251 = vmatprep.subr.mxu1 %v9061_v46  ;;  %v9065_v42 = vld [vmem:[#allocation47_spill] sm:$0xff] }
 0xc24   :  { %v2622_v43 = vadd.f32 %v9065_v42, %v8993_v13 }
 0xcc2   :  { %v3768_v22 = vpop.f32.mrf.mxu0  ;;  %v3839_v48 = vpop.f32.mrf.mxu1 }
 0xcc3   :  { %v3844_v32 = vadd.f32 %v3768_v22, %v2507_v41  ;;  %v3846_v61 = vadd.f32 %v3839_v48, %v2620_v35  ;;  %v9092_v35 = vld [vmem:[#allocation55_spill] sm:$0xff] }
 0xcc4   :  { %v3770_v3 = vpop.f32.mrf.mxu0  ;;  %v3841_v36 = vpop.f32.mrf.mxu1 }
 0xcc5   :  { %v4730_v37 = vmul.f32 -1.442695, %v3844_v32  ;;  %v3845_v62 = vadd.f32 %v3770_v3, %v2509_v40  ;;  %v3847_v46 = vadd.f32 %v3841_v36, %v2622_v43 }
 0xcc7   :  { %4989 = vpow2.f32 %v4730_v37  ;;  %v4731_v39 = vmul.f32 -1.442695, %v3845_v62  ;;  %v4732_v33 = vmul.f32 -1.442695, %v3847_v46 }
 0xcc9   :  { %4991 = vpow2.f32 %v4731_v39 }
 0xcca   :  { %4993 = vtanh.f32 %v3846_v61 }
 0xccb   :  { %4995 = vpow2.f32 %v4732_v33 }
 0xcd4   :  { %v4990_v47 = vpop.eup %4989 }
 0xcd5   :  { %v3851_v18 = vadd.f32 1.0, %v4990_v47 }
 0xcd6   :  { %v4992_v41 = vpop.eup %4991 }
 0xcd7   :  { %4997 = vrcp.f32 %v3851_v18  ;;  %v3857_v3 = vadd.f32 1.0, %v4992_v41  ;;  %v4994_v62 = vpop.eup %4993  ;;  %v2628_v18 = vadd.f32 %v9092_v35, %v8993_v13  ;;  %v4414_v35 = vld [vmem:[%s8519_s5 + $0x1d8] sm:$0xff] }
 0xcd8   :  { %v4996_v40 = vpop.eup %4995 }
 0xcd9   :  { %4999 = vrcp.f32 %v3857_v3  ;;  %v3864_v32 = vadd.f32 1.0, %v4996_v40  ;;  %v9093_v3 = vld [vmem:[#allocation50_spill] sm:$0xff] }
 0xcdb   :  { %5001 = vrcp.f32 %v3864_v32 }
 0xce4   :  { %v4998_v37 = vpop.eup %4997 }
 0xce5   :  { %v3868_v39 = vmul.f32 %v4998_v37, %v4994_v62  ;;  %v2626_v62 = vadd.f32 %v9093_v3, %v7578_v15  ;;  %v4408_v3 = vld [vmem:[%s8519_s5 + $0x1a8] sm:$0xff] }
 0xce6   :  { %v5000_v22 = vpop.eup %4999 }
 0xce7   :  { %v3867_v43 = vmul.f32 %v5000_v22, %v8135_v45 }
 0xce8   :  { %v5002_v47 = vpop.eup %5001 }
 0xce9   :  { %v8213_v36 = vadd.f32 %v3868_v39, %v3867_v43 }
 0xceb   :  { %5003 = vtanh.f32 %v8213_v36 }
 0xcf8   :  { %v5004_v34 = vpop.eup %5003 }
 0xcf9   :  { %v3871_v48 = vmul.f32 %v5004_v34, %v5002_v47 }
 0xcfb   :  { %4006 = vmatmul.mubr.f32.vlgmr.msra.gmra.mxu0 %v3871_v48  ;;  %4077 = vmatmul.mubr.f32.vlgmr.msra.gmra.mxu1 %v3871_v48 }
 0xcfc   :  { %4181 = vmatpush1.msra.mxu0 %v7677_v58  ;;  %4252 = vmatpush1.msra.mxu1 %v7682_v21  ;;  %v9068_v58 = vld [vmem:[#allocation7_spill] sm:$0xff]  ;;  %v9069_v21 = vld [vmem:[#allocation8_spill] sm:$0xff] }
 0xcfd   :  { %4182 = vmatprep.subr.mxu0 %v7689_v6  ;;  %4253 = vmatprep.subr.mxu1 %v7694_v63  ;;  %v9070_v6 = vld [vmem:[#allocation39_spill] sm:$0xff]  ;;  %v9071_v63 = vld [vmem:[#allocation41_spill] sm:$0xff] }
 0xcfe   :  { %4183 = vmatpush1.msra.mxu0 %v7701_v24  ;;  %4254 = vmatpush1.msra.mxu1 %v7706_v9  ;;  %v9072_v24 = vld [vmem:[#allocation42_spill] sm:$0xff]  ;;  %v9073_v9 = vld [vmem:[#allocation40_spill] sm:$0xff] }
 0xcff   :  { %4184 = vmatprep.subr.mxu0 %v7713_v14  ;;  %4255 = vmatprep.subr.mxu1 %v7718_v19  ;;  %v9074_v14 = vld [vmem:[#allocation9_spill] sm:$0xff]  ;;  %v9075_v19 = vld [vmem:[#allocation10_spill] sm:$0xff] }
 0xd00   :  { %4185 = vmatpush1.msra.mxu0 %v7725_v0  ;;  %4256 = vmatpush1.msra.mxu1 %v7730_v16  ;;  %v9076_v0 = vld [vmem:[#allocation11_spill] sm:$0xff]  ;;  %v9077_v16 = vld [vmem:[#allocation12_spill] sm:$0xff] }
 0xd01   :  { %4186 = vmatprep.subr.mxu0 %v7737_v10  ;;  %4257 = vmatprep.subr.mxu1 %v7742_v7  ;;  %v9078_v10 = vld [vmem:[#allocation13_spill] sm:$0xff]  ;;  %v9079_v7 = vld [vmem:[#allocation14_spill] sm:$0xff] }
 0xd02   :  { %4187 = vmatpush1.msra.mxu0 %v7749_v44  ;;  %4258 = vmatpush1.msra.mxu1 %v7754_v8  ;;  %v9080_v44 = vld [vmem:[#allocation15_spill] sm:$0xff]  ;;  %v9081_v8 = vld [vmem:[#allocation17_spill] sm:$0xff] }
 0xd03   :  { %4188 = vmatprep.subr.mxu0 %v7761_v12  ;;  %4259 = vmatprep.subr.mxu1 %v7766_v5  ;;  %v9082_v12 = vld [vmem:[#allocation27_spill] sm:$0xff]  ;;  %v9083_v5 = vld [vmem:[#allocation18_spill] sm:$0xff] }
 0xd04   :  { %4189 = vmatpush1.msra.mxu0 %v7773_v23  ;;  %4260 = vmatpush1.msra.mxu1 %v7778_v52  ;;  %v9084_v23 = vld [vmem:[#allocation16_spill] sm:$0xff]  ;;  %v9085_v52 = vld [vmem:[#allocation19_spill] sm:$0xff] }
 0xd05   :  { %4190 = vmatprep.subr.mxu0 %v7785_v1  ;;  %4261 = vmatprep.subr.mxu1 %v9007_v50  ;;  %v9086_v1 = vld [vmem:[#allocation21_spill] sm:$0xff] }
 0xd06   :  { %4191 = vmatpush1.msra.mxu0 %v9008_v49  ;;  %4262 = vmatpush1.msra.mxu1 %v9009_v51  ;;  %v9091_v49 = vld [vmem:[#allocation48_spill] sm:$0xff] }
 0xd07   :  { %4192 = vmatprep.subr.mxu0 %v9010_v55  ;;  %4263 = vmatprep.subr.mxu1 %v9011_v29  ;;  %v2515_v51 = vadd.f32 %v9091_v49, %v7561_v54 }
 0xd08   :  { %4193 = vmatpush1.msra.mxu0 %v7821_v27  ;;  %4264 = vmatpush1.msra.mxu1 %v7826_v20  ;;  %v9067_v27 = vld [vmem:[#allocation36_spill] sm:$0xff]  ;;  %v9089_v20 = vld [vmem:[#allocation51_spill] sm:$0xff] }
 0xd09   :  { %4194 = vmatprep.subr.mxu0 %v7831_v59  ;;  %4265 = vmatprep.subr.mxu1 %v7838_v11  ;;  %v9088_v59 = vld [vmem:[#allocation22_spill] sm:$0xff] }
 0xd0a   :  { %4195 = vmatpush1.msra.mxu0 %v7843_v53  ;;  %4266 = vmatpush1.msra.mxu1 %v7848_v38  ;;  %v9087_v38 = vmov 0.0   ;;  %v9090_v53 = vld [vmem:[#allocation49_spill] sm:$0xff] }
 0xd0b   :  { %4196 = vmatprep.subr.mxu0 %v7935_v57  ;;  %4267 = vmatprep.subr.mxu1 %v7940_v56  ;;  %v2513_v11 = vadd.f32 %v9090_v53, %v9089_v20 }
 0xd0c   :  { %4197 = vmatpush1.msra.mxu0 %v7945_v60  ;;  %4268 = vmatpush1.msra.mxu1 %v7952_v2 }
 0xd0d   :  { %4198 = vmatprep.subr.mxu0 %v7957_v4  ;;  %4269 = vmatprep.subr.mxu1 %v7962_v17 }
 0xd0e   :  { %4199 = vmatpush1.msra.mxu0 %v7969_v25  ;;  %4270 = vmatpush1.msra.mxu1 %v7974_v26 }
 0xd0f   :  { %4200 = vmatprep.subr.mxu0 %v7979_v28  ;;  %4271 = vmatprep.subr.mxu1 %v7986_v30 }
 0xd10   :  { %4201 = vmatpush1.msra.mxu0 %v7991_v31  ;;  %4272 = vmatpush1.msra.mxu1 %v9067_v27 }
 0xd11   :  { %4202 = vmatprep.subr.mxu0 %v9068_v58  ;;  %4273 = vmatprep.subr.mxu1 %v9069_v21 }
 0xd12   :  { %4203 = vmatpush1.msra.mxu0 %v9070_v6  ;;  %4274 = vmatpush1.msra.mxu1 %v9071_v63 }
 0xd13   :  { %4204 = vmatprep.subr.mxu0 %v9072_v24  ;;  %4275 = vmatprep.subr.mxu1 %v9073_v9 }
 0xd14   :  { %4205 = vmatpush1.msra.mxu0 %v9074_v14  ;;  %4276 = vmatpush1.msra.mxu1 %v9075_v19 }
 0xd15   :  { %4206 = vmatprep.subr.mxu0 %v9076_v0  ;;  %4277 = vmatprep.subr.mxu1 %v9077_v16 }
 0xd16   :  { %4207 = vmatpush1.msra.mxu0 %v9078_v10  ;;  %4278 = vmatpush1.msra.mxu1 %v9079_v7 }
 0xd17   :  { %4208 = vmatprep.subr.mxu0 %v9080_v44  ;;  %4279 = vmatprep.subr.mxu1 %v9081_v8 }
 0xd18   :  { %4209 = vmatpush1.msra.mxu0 %v9082_v12  ;;  %4280 = vmatpush1.msra.mxu1 %v9083_v5 }
 0xd19   :  { %4210 = vmatprep.subr.mxu0 %v9084_v23  ;;  %4281 = vmatprep.subr.mxu1 %v9085_v52 }
 0xd1a   :  { %4211 = vmatpush1.msra.mxu0 %v9086_v1  ;;  %4244 = vmatprep.mubr.f32.mxu0 %v9087_v38 }
 0xd1b   :  { %4282 = vmatpush1.msra.mxu1 %v9088_v59  ;;  %4315 = vmatprep.mubr.f32.mxu1 %v9087_v38 }
 0xdbb   :  { %v4007_v50 = vpop.f32.mrf.mxu0  ;;  %v4078_v61 = vpop.f32.mrf.mxu1 }
 0xdbc   :  { %v4083_v55 = vadd.f32 %v4007_v50, %v2513_v11  ;;  %v4085_v40 = vadd.f32 %v4078_v61, %v2626_v62  ;;  %v4415_v61 = vld [vmem:[%s8519_s5 + $0x1e0] sm:$0xff]  ;;  %v4410_v62 = vld [vmem:[%s8519_s5 + $0x1b8] sm:$0xff] }
 0xdbd   :  { %v4009_v29 = vpop.f32.mrf.mxu0  ;;  %v4080_v46 = vpop.f32.mrf.mxu1 }
 0xdbe   :  { %v4733_v45 = vmul.f32 -1.442695, %v4083_v55  ;;  %v4084_v33 = vadd.f32 %v4009_v29, %v2515_v51  ;;  %v4086_v41 = vadd.f32 %v4080_v46, %v2628_v18  ;;  %v4412_v46 = vld [vmem:[%s8519_s5 + $0x1c8] sm:$0xff]  ;;  %v4411_v18 = vld [vmem:[%s8519_s5 + $0x1c0] sm:$0xff] }
 0xdc0   :  { %5005 = vpow2.f32 %v4733_v45  ;;  %v4734_v42 = vmul.f32 -1.442695, %v4084_v33  ;;  %v4735_v37 = vmul.f32 -1.442695, %v4086_v41  ;;  %v4416_v33 = vld [vmem:[%s8519_s5 + $0x1e8] sm:$0xff]  ;;  %v4413_v41 = vld [vmem:[%s8519_s5 + $0x1d0] sm:$0xff] }
 0xdc1   :  { %4419 = vmatprep.subr.mxu0 %v4416_v33  ;;  %v4391_v33 = vld [vmem:[%s8519_s5 + $0x120] sm:$0xff] }
 0xdc2   :  { %5007 = vpow2.f32 %v4734_v42  ;;  %v4417_v42 = vld [vmem:[%s8519_s5 + $0x1f0] sm:$0xff] }
 0xdc3   :  { %5009 = vtanh.f32 %v4085_v40  ;;  %v4407_v40 = vld [vmem:[%s8519_s5 + $0x1a0] sm:$0xff] }
 0xdc4   :  { %5011 = vpow2.f32 %v4735_v37  ;;  %v4409_v37 = vld [vmem:[%s8519_s5 + $0x1b0] sm:$0xff] }
 0xdcd   :  { %v5006_v39 = vpop.eup %5005 }
 0xdce   :  { %v4090_v22 = vadd.f32 1.0, %v5006_v39  ;;  %v4404_v39 = vld [vmem:[%s8519_s5 + $0x188] sm:$0xff] }
 0xdcf   :  { %v5008_v32 = vpop.eup %5007 }
 0xdd0   :  { %5013 = vrcp.f32 %v4090_v22  ;;  %v4096_v43 = vadd.f32 1.0, %v5008_v32  ;;  %v5010_v47 = vpop.eup %5009  ;;  %v4406_v22 = vld [vmem:[%s8519_s5 + $0x198] sm:$0xff]  ;;  %v4403_v32 = vld [vmem:[%s8519_s5 + $0x180] sm:$0xff] }
 0xdd1   :  { %v5012_v34 = vpop.eup %5011 }
 0xdd2   :  { %5015 = vrcp.f32 %v4096_v43  ;;  %v4103_v50 = vadd.f32 1.0, %v5012_v34  ;;  %v4405_v43 = vld [vmem:[%s8519_s5 + $0x190] sm:$0xff]  ;;  %v4402_v34 = vld [vmem:[%s8519_s5 + $0x178] sm:$0xff] }
 0xdd4   :  { %5017 = vrcp.f32 %v4103_v50  ;;  %v4398_v50 = vld [vmem:[%s8519_s5 + $0x158] sm:$0xff] }
 0xddd   :  { %v5014_v48 = vpop.eup %5013 }
 0xdde   :  { %v4107_v53 = vmul.f32 %v5014_v48, %v5010_v47  ;;  %v4400_v47 = vld [vmem:[%s8519_s5 + $0x168] sm:$0xff]  ;;  %v4399_v48 = vld [vmem:[%s8519_s5 + $0x160] sm:$0xff] }
 0xddf   :  { %v5016_v11 = vpop.eup %5015 }
 0xde0   :  { %v4106_v49 = vmul.f32 %v5016_v11, %v8213_v36  ;;  %v4418_v36 = vld [vmem:[%s8519_s5 + $0x1f8] sm:$0xff]  ;;  %v4396_v11 = vld [vmem:[%s8519_s5 + $0x148] sm:$0xff] }
 0xde1   :  { %v5018_v55 = vpop.eup %5017  ;;  %4490 = vmatprep.subr.mxu1 %v4418_v36  ;;  %v4393_v36 = vld [vmem:[%s8519_s5 + $0x130] sm:$0xff] }
 0xde2   :  { %v8289_v51 = vadd.f32 %v4107_v53, %v4106_v49  ;;  %v4401_v53 = vld [vmem:[%s8519_s5 + $0x170] sm:$0xff]  ;;  %v4395_v49 = vld [vmem:[%s8519_s5 + $0x140] sm:$0xff] }
 0xde4   :  { %5019 = vtanh.f32 %v8289_v51 }
 0xdf1   :  { %v5020_v29 = vpop.eup %5019 }
 0xdf2   :  { %v4110_v45 = vmul.f32 %v5020_v29, %v5018_v55  ;;  %v4397_v55 = vld [vmem:[%s8519_s5 + $0x150] sm:$0xff]  ;;  %v4392_v29 = vld [vmem:[%s8519_s5 + $0x128] sm:$0xff] }
 0xdf4   :  { %4245 = vmatmul.mubr.f32.vlgmr.msra.gmra.mxu0 %v4110_v45  ;;  %4316 = vmatmul.mubr.f32.vlgmr.msra.gmra.mxu1 %v4110_v45  ;;  %v4394_v45 = vld [vmem:[%s8519_s5 + $0x138] sm:$0xff] }
 0xdf5   :  { %4483 = vmatprep.mubr.f32.mxu0 %v9087_v38  ;;  %4554 = vmatprep.mubr.f32.mxu1 %v9087_v38 }
 0xdf6   :  { %4420 = vmatpush1.msra.mxu0 %v4415_v61  ;;  %4491 = vmatpush1.msra.mxu1 %v4417_v42  ;;  %v4388_v61 = vld [vmem:[%s8519_s5 + $0x108] sm:$0xff]  ;;  %v4390_v42 = vld [vmem:[%s8519_s5 + $0x118] sm:$0xff] }
 0xdf7   :  { %4421 = vmatprep.subr.mxu0 %v4412_v46  ;;  %4492 = vmatprep.subr.mxu1 %v4414_v35  ;;  %v4387_v46 = vld [vmem:[%s8519_s5 + $0x100] sm:$0xff]  ;;  %v4389_v35 = vld [vmem:[%s8519_s5 + $0x110] sm:$0xff] }
 0xdf8   :  { %4422 = vmatpush1.msra.mxu0 %v4411_v18  ;;  %4493 = vmatpush1.msra.mxu1 %v4413_v41 }
 0xdf9   :  { %4423 = vmatprep.subr.mxu0 %v4408_v3  ;;  %4494 = vmatprep.subr.mxu1 %v4410_v62  ;;  %v4611_v3 = vld [vmem:[%s8521_s7 + $0x78] sm:$0xff]  ;;  %v4609_v62 = vld [vmem:[%s8521_s7 + $0x68] sm:$0xff] }
 0xdfa   :  { %4424 = vmatpush1.msra.mxu0 %v4407_v40  ;;  %4495 = vmatpush1.msra.mxu1 %v4409_v37  ;;  %v4608_v40 = vld [vmem:[%s8521_s7 + $0x60] sm:$0xff]  ;;  %v4607_v37 = vld [vmem:[%s8521_s7 + $0x58] sm:$0xff] }
 0xdfb   :  { %4425 = vmatprep.subr.mxu0 %v4404_v39  ;;  %4496 = vmatprep.subr.mxu1 %v4406_v22  ;;  %v4606_v39 = vld [vmem:[%s8521_s7 + $0x50] sm:$0xff]  ;;  %v4605_v22 = vld [vmem:[%s8521_s7 + $0x48] sm:$0xff] }
 0xdfc   :  { %4426 = vmatpush1.msra.mxu0 %v4403_v32  ;;  %4497 = vmatpush1.msra.mxu1 %v4405_v43  ;;  %v4604_v32 = vld [vmem:[%s8521_s7 + $0x40] sm:$0xff]  ;;  %v4603_v43 = vld [vmem:[%s8521_s7 + $0x38] sm:$0xff] }
 0xdfd   :  { %4427 = vmatprep.subr.mxu0 %v4400_v47  ;;  %4498 = vmatprep.subr.mxu1 %v4402_v34  ;;  %v4602_v47 = vld [vmem:[%s8521_s7 + $0x30] sm:$0xff]  ;;  %v4601_v34 = vld [vmem:[%s8521_s7 + $0x28] sm:$0xff] }
 0xdfe   :  { %4428 = vmatpush1.msra.mxu0 %v4399_v48  ;;  %4499 = vmatpush1.msra.mxu1 %v4401_v53  ;;  %v4600_v48 = vld [vmem:[%s8521_s7 + $0x20] sm:$0xff]  ;;  %v4599_v53 = vld [vmem:[%s8521_s7 + $0x18] sm:$0xff] }
 0xdff   :  { %4429 = vmatprep.subr.mxu0 %v4396_v11  ;;  %4500 = vmatprep.subr.mxu1 %v4398_v50  ;;  %v4598_v11 = vld [vmem:[%s8521_s7 + $0x10] sm:$0xff]  ;;  %v4597_v50 = vld [vmem:[%s8521_s7 + $0x8] sm:$0xff] }
 0xe00   :  { %4430 = vmatpush1.msra.mxu0 %v4395_v49  ;;  %4501 = vmatpush1.msra.mxu1 %v4397_v55  ;;  %v4596_v49 = vld [vmem:[%s8521_s7] sm:$0xff] }
 0xe01   :  { %4431 = vmatprep.subr.mxu0 %v4392_v29  ;;  %4502 = vmatprep.subr.mxu1 %v4394_v45  ;;  %v9098_v55 = vld [vmem:[#allocation54_spill] sm:$0xff] }
 0xe02   :  { %4432 = vmatpush1.msra.mxu0 %v4391_v33  ;;  %4503 = vmatpush1.msra.mxu1 %v4393_v36  ;;  %v2525_v29 = vadd.f32 %v9098_v55, %v9089_v20  ;;  %v9099_v33 = vld [vmem:[#allocation30_spill] sm:$0xff] }
 0xe03   :  { %4433 = vmatprep.subr.mxu0 %v4388_v61  ;;  %4504 = vmatprep.subr.mxu1 %v4390_v42  ;;  %v2527_v36 = vadd.f32 %v9099_v33, %v7561_v54 }
 0xe04   :  { %4434 = vmatpush1.msra.mxu0 %v4387_v46  ;;  %4505 = vmatpush1.msra.mxu1 %v4389_v35 }
 0xe05   :  { %4435 = vmatprep.subr.mxu0 %v7935_v57  ;;  %4506 = vmatprep.subr.mxu1 %v7940_v56  ;;  %v9094_v57 = vld [vmem:[#allocation6_spill] sm:$0xff] }
 0xe06   :  { %4436 = vmatpush1.msra.mxu0 %v7945_v60  ;;  %4507 = vmatpush1.msra.mxu1 %v7952_v2  ;;  %v2519_v56 = vadd.f32 %v9094_v57, %v9089_v20  ;;  %v9095_v2 = vld [vmem:[#allocation29_spill] sm:$0xff] }
 0xe07   :  { %4437 = vmatprep.subr.mxu0 %v7957_v4  ;;  %4508 = vmatprep.subr.mxu1 %v7962_v17  ;;  %v2521_v4 = vadd.f32 %v9095_v2, %v7561_v54  ;;  %v9100_v2 = vld [vmem:[#allocation28_spill] sm:$0xff] }
 0xe08   :  { %4438 = vmatpush1.msra.mxu0 %v7969_v25  ;;  %4509 = vmatpush1.msra.mxu1 %v7974_v26 }
 0xe09   :  { %4439 = vmatprep.subr.mxu0 %v7979_v28  ;;  %4510 = vmatprep.subr.mxu1 %v7986_v30 }
 0xe0a   :  { %4440 = vmatpush1.msra.mxu0 %v7991_v31  ;;  %4511 = vmatpush1.msra.mxu1 %v9067_v27 }
 0xe0b   :  { %4441 = vmatprep.subr.mxu0 %v9068_v58  ;;  %4512 = vmatprep.subr.mxu1 %v9069_v21  ;;  %v9096_v58 = vld [vmem:[#allocation53_spill] sm:$0xff] }
 0xe0c   :  { %4442 = vmatpush1.msra.mxu0 %v9070_v6  ;;  %4513 = vmatpush1.msra.mxu1 %v9071_v63  ;;  %v2634_v21 = vadd.f32 %v9096_v58, %v8993_v13  ;;  %v9097_v63 = vld [vmem:[#allocation26_spill] sm:$0xff] }
 0xe0d   :  { %4443 = vmatprep.subr.mxu0 %v9072_v24  ;;  %4514 = vmatprep.subr.mxu1 %v9073_v9  ;;  %v2632_v24 = vadd.f32 %v9097_v63, %v7578_v15 }
 0xe0e   :  { %4444 = vmatpush1.msra.mxu0 %v9074_v14  ;;  %4515 = vmatpush1.msra.mxu1 %v9075_v19 }
 0xe0f   :  { %4445 = vmatprep.subr.mxu0 %v9076_v0  ;;  %4516 = vmatprep.subr.mxu1 %v9077_v16 }
 0xe10   :  { %4446 = vmatpush1.msra.mxu0 %v9078_v10  ;;  %4517 = vmatpush1.msra.mxu1 %v9079_v7 }
 0xe11   :  { %4447 = vmatprep.subr.mxu0 %v9080_v44  ;;  %4518 = vmatprep.subr.mxu1 %v9081_v8 }
 0xe12   :  { %4448 = vmatpush1.msra.mxu0 %v9082_v12  ;;  %4519 = vmatpush1.msra.mxu1 %v9083_v5 }
 0xe13   :  { %4449 = vmatprep.subr.mxu0 %v9084_v23  ;;  %4520 = vmatprep.subr.mxu1 %v9085_v52 }
 0xe14   :  { %4450 = vmatpush1.msra.mxu0 %v9086_v1  ;;  %4521 = vmatpush1.msra.mxu1 %v9088_v59 }
 0xe15   :  { %4760 = vmatprep.subr.mxu0 %v9087_v38 }
 0xeb4   :  { %v4246_v60 = vpop.f32.mrf.mxu0  ;;  %v4317_v30 = vpop.f32.mrf.mxu1 }
 0xeb5   :  { %v4322_v17 = vadd.f32 %v4246_v60, %v2519_v56  ;;  %v4324_v9 = vadd.f32 %v4317_v30, %v2632_v24 }
 0xeb6   :  { %v4248_v25 = vpop.f32.mrf.mxu0  ;;  %v4319_v27 = vpop.f32.mrf.mxu1 }
 0xeb7   :  { %v4736_v26 = vmul.f32 -1.442695, %v4322_v17  ;;  %v4323_v28 = vadd.f32 %v4248_v25, %v2521_v4  ;;  %v4325_v6 = vadd.f32 %v4319_v27, %v2634_v21  ;;  %v9101_v17 = vld [vmem:[#allocation52_spill] sm:$0xff] }
 0xeb8   :  { %v2638_v20 = vadd.f32 %v9101_v17, %v7578_v15 }
 0xeb9   :  { %5021 = vpow2.f32 %v4736_v26  ;;  %v4737_v31 = vmul.f32 -1.442695, %v4323_v28  ;;  %v4738_v14 = vmul.f32 -1.442695, %v4325_v6 }
 0xebb   :  { %5023 = vpow2.f32 %v4737_v31 }
 0xebc   :  { %5025 = vtanh.f32 %v4324_v9 }
 0xebd   :  { %5027 = vpow2.f32 %v4738_v14 }
 0xec6   :  { %v5022_v19 = vpop.eup %5021 }
 0xec7   :  { %v4329_v0 = vadd.f32 1.0, %v5022_v19 }
 0xec8   :  { %v5024_v16 = vpop.eup %5023 }
 0xec9   :  { %5029 = vrcp.f32 %v4329_v0  ;;  %v4335_v10 = vadd.f32 1.0, %v5024_v16  ;;  %v5026_v7 = vpop.eup %5025  ;;  %v4742_v0 = vld [vmem:[%s8522_s8] ss:$0 sm:$0xff] }
 0xeca   :  { %v5028_v44 = vpop.eup %5027 }
 0xecb   :  { %5031 = vrcp.f32 %v4335_v10  ;;  %v4342_v23 = vadd.f32 1.0, %v5028_v44 }
 0xecd   :  { %5033 = vrcp.f32 %v4342_v23 }
 0xed6   :  { %v5030_v8 = vpop.eup %5029 }
 0xed7   :  { %v4346_v12 = vmul.f32 %v5030_v8, %v5026_v7 }
 0xed8   :  { %v5032_v5 = vpop.eup %5031 }
 0xed9   :  { %v4345_v52 = vmul.f32 %v5032_v5, %v8289_v51  ;;  %v4610_v51 = vld [vmem:[%s8521_s7 + $0x70] sm:$0xff] }
 0xeda   :  { %v5034_v59 = vpop.eup %5033 }
 0xedb   :  { %v8432_v1 = vadd.f32 %v4346_v12, %v4345_v52 }
 0xedd   :  { %5035 = vtanh.f32 %v8432_v1 }
 0xeea   :  { %v5036_v18 = vpop.eup %5035 }
 0xeeb   :  { %v4349_v41 = vmul.f32 %v5036_v18, %v5034_v59 }
 0xeed   :  { %4484 = vmatmul.mubr.f32.vlgmr.msra.gmra.mxu0 %v4349_v41  ;;  %4555 = vmatmul.mubr.f32.vlgmr.msra.gmra.mxu1 %v4349_v41 }
 0xeee   :  { %4761 = vmatpush3.msra.mxu0 %v4611_v3  ;;  %4792 = vmatprep.mubr.msk.f32.mxu0 %vm5054_vm0, %v9087_v38 }
 0xeef   :  { %4762 = vmatprep.subr.mxu0 %v9087_v38 }
 0xef0   :  { %4763 = vmatpush3.msra.mxu0 %v4610_v51 }
 0xef1   :  { %4764 = vmatprep.subr.mxu0 %v9087_v38 }
 0xef2   :  { %4765 = vmatpush3.msra.mxu0 %v4609_v62 }
 0xef3   :  { %4766 = vmatprep.subr.mxu0 %v9087_v38 }
 0xef4   :  { %4767 = vmatpush3.msra.mxu0 %v4608_v40 }
 0xef5   :  { %4768 = vmatprep.subr.mxu0 %v9087_v38 }
 0xef6   :  { %4769 = vmatpush3.msra.mxu0 %v4607_v37 }
 0xef7   :  { %4770 = vmatprep.subr.mxu0 %v9087_v38 }
 0xef8   :  { %4771 = vmatpush3.msra.mxu0 %v4606_v39 }
 0xef9   :  { %4772 = vmatprep.subr.mxu0 %v9087_v38 }
 0xefa   :  { %4773 = vmatpush3.msra.mxu0 %v4605_v22 }
 0xefb   :  { %4774 = vmatprep.subr.mxu0 %v9087_v38 }
 0xefc   :  { %4775 = vmatpush3.msra.mxu0 %v4604_v32 }
 0xefd   :  { %4776 = vmatprep.subr.mxu0 %v9087_v38 }
 0xefe   :  { %4777 = vmatpush3.msra.mxu0 %v4603_v43 }
 0xeff   :  { %4778 = vmatprep.subr.mxu0 %v9087_v38 }
 0xf00   :  { %4779 = vmatpush3.msra.mxu0 %v4602_v47 }
 0xf01   :  { %4780 = vmatprep.subr.mxu0 %v9087_v38 }
 0xf02   :  { %4781 = vmatpush3.msra.mxu0 %v4601_v34 }
 0xf03   :  { %4782 = vmatprep.subr.mxu0 %v9087_v38 }
 0xf04   :  { %4783 = vmatpush3.msra.mxu0 %v4600_v48 }
 0xf05   :  { %4784 = vmatprep.subr.mxu0 %v9087_v38 }
 0xf06   :  { %4785 = vmatpush3.msra.mxu0 %v4599_v53 }
 0xf07   :  { %4786 = vmatprep.subr.mxu0 %v9087_v38 }
 0xf08   :  { %4787 = vmatpush3.msra.mxu0 %v4598_v11 }
 0xf09   :  { %4788 = vmatprep.subr.mxu0 %v9087_v38 }
 0xf0a   :  { %4789 = vmatpush3.msra.mxu0 %v4597_v50 }
 0xf0b   :  { %4790 = vmatprep.subr.mxu0 %v9087_v38  ;;  %v2640_v38 = vadd.f32 %v9100_v2, %v8993_v13 }
 0xf0c   :  { %4791 = vmatpush3.msra.mxu0 %v4596_v49 }
 0xfad   :  { %v4485_v45 = vpop.f32.mrf.mxu0  ;;  %v4556_v57 = vpop.f32.mrf.mxu1 }
 0xfae   :  { %v4561_v61 = vadd.f32 %v4485_v45, %v2525_v29  ;;  %v4563_v25 = vadd.f32 %v4556_v57, %v2638_v20 }
 0xfaf   :  { %v4487_v42 = vpop.f32.mrf.mxu0  ;;  %v4558_v60 = vpop.f32.mrf.mxu1 }
 0xfb0   :  { %v4739_v46 = vmul.f32 -1.442695, %v4561_v61  ;;  %v4562_v35 = vadd.f32 %v4487_v42, %v2527_v36  ;;  %v4564_v4 = vadd.f32 %v4558_v60, %v2640_v38 }
 0xfb2   :  { %5037 = vpow2.f32 %v4739_v46  ;;  %v4740_v56 = vmul.f32 -1.442695, %v4562_v35  ;;  %v4741_v26 = vmul.f32 -1.442695, %v4564_v4 }
 0xfb4   :  { %5039 = vpow2.f32 %v4740_v56 }
 0xfb5   :  { %5041 = vtanh.f32 %v4563_v25 }
 0xfb6   :  { %5043 = vpow2.f32 %v4741_v26 }
 0xfbf   :  { %v5038_v28 = vpop.eup %5037 }
 0xfc0   :  { %v4568_v54 = vadd.f32 1.0, %v5038_v28 }
 0xfc1   :  { %v5040_v30 = vpop.eup %5039 }
 0xfc2   :  { %5045 = vrcp.f32 %v4568_v54  ;;  %v4574_v31 = vadd.f32 1.0, %v5040_v30  ;;  %v5042_v27 = vpop.eup %5041 }
 0xfc3   :  { %v5044_v58 = vpop.eup %5043 }
 0xfc4   :  { %5047 = vrcp.f32 %v4574_v31  ;;  %v4581_v13 = vadd.f32 1.0, %v5044_v58 }
 0xfc6   :  { %5049 = vrcp.f32 %v4581_v13 }
 0xfcf   :  { %v5046_v21 = vpop.eup %5045 }
 0xfd0   :  { %v4585_v6 = vmul.f32 %v5046_v21, %v5042_v27 }
 0xfd1   :  { %v5048_v63 = vpop.eup %5047 }
 0xfd2   :  { %v4584_v24 = vmul.f32 %v5048_v63, %v8432_v1 }
 0xfd3   :  { %v5050_v15 = vpop.eup %5049 }
 0xfd4   :  { %v4586_v9 = vadd.f32 %v4585_v6, %v4584_v24 }
 0xfd6   :  { %5051 = vtanh.f32 %v4586_v9 }
 0xfe3   :  { %v5052_v14 = vpop.eup %5051 }
 0xfe4   :  { %v4588_v19 = vmul.f32 %v5052_v14, %v5050_v15 }
 0xfe6   :  { %4793 = vmatmul.mubr.f32.vlgmr.msra.gmra.mxu0 %v4588_v19 }
0x10a6   :  { %v4685_v16 = vpop.f32.mrf.mxu0 }
0x10a7   :  { %v4686_v10 = vadd.f32 %v4742_v0, %v4685_v16 }
0x10a8   :  { %v4794_v7 = vpop.f32.mrf.mxu0 }
0x10a9   :  { %4689 = vst [vmem:[%s8523_s9] sm:$0xff] %v4686_v10 }

</bundles_post_ra>
